<compile_context>
chip_gen: v7x
topology: tpu7x:2x2x1
jax: 0.10.0
libtpu: 0.0.40
codegen_flags: <defaults>
</compile_context>

<pallas_src>
import jax
import jax.numpy as jnp
from jax.experimental import pallas as pl
from jax.experimental.pallas import tpu as pltpu

VMEM_SPEC = pl.BlockSpec(memory_space=pltpu.MemorySpace.VMEM)
_VMEM_LIMIT = 32 * 1024 * 1024


def _round_up(v, m):
    return (v + m - 1) // m * m


# ----------------------------------------------------------------------------
# Pallas kernels
# ----------------------------------------------------------------------------
def _mm_bias_kernel(x_ref, w_ref, b_ref, o_ref):
    acc = jnp.dot(x_ref[...], w_ref[...], preferred_element_type=jnp.float32)
    o_ref[...] = acc + b_ref[...]


def _mm_bias_relu_kernel(x_ref, w_ref, b_ref, o_ref):
    acc = jnp.dot(x_ref[...], w_ref[...], preferred_element_type=jnp.float32)
    o_ref[...] = jnp.maximum(acc + b_ref[...], 0.0)


def _mm_bias_add_relu_kernel(x_ref, w_ref, b_ref, id_ref, o_ref):
    # conv3 of a bottleneck: matmul + bias + residual add + ReLU, all fused.
    acc = jnp.dot(x_ref[...], w_ref[...], preferred_element_type=jnp.float32)
    o_ref[...] = jnp.maximum(acc + b_ref[...] + id_ref[...], 0.0)


def _maxpool_kernel(p_ref, o_ref):
    # p_ref: (taps, tm, C) window taps; reduce max over the tap axis.
    o_ref[...] = jnp.max(p_ref[...], axis=0)


def _avgpool_kernel(x_ref, o_ref):
    # x_ref: (HW, N, C); global average over the spatial axis.
    o_ref[...] = jnp.mean(x_ref[...], axis=0)


# ----------------------------------------------------------------------------
# Pallas wrappers
# ----------------------------------------------------------------------------
def matmul_bias(x, w, bias, *, relu=False, identity=None):
    """y = x @ w + bias [+ identity] [ReLU].  x:(M,K), w:(K,N), bias:(N,).

    Grid-tiled over (M, N), bf16 MXU inputs, f32 accumulate/epilogue.
    N is zero-padded to a multiple of 128 for lane-dense stores."""
    M, K = x.shape
    N = w.shape[1]

    # Lane-dense output: pad N to a multiple of 128; 256-wide tiles feed the
    # full 256-wide MXU on v6e/v7x when possible.
    Np = _round_up(N, 128)
    tn = 256 if Np % 256 == 0 else 128
    # Row tiling: pipeline over M when it is large; else one sublane-aligned tile.
    TM = 256
    if M > TM:
        Mp, tm = _round_up(M, TM), TM
    else:
        Mp = _round_up(M, 16)   # bf16 sublane packing
        tm = Mp

    xb = x.astype(jnp.bfloat16)
    wb = w.astype(jnp.bfloat16)
    if Mp != M:
        xb = jnp.pad(xb, ((0, Mp - M), (0, 0)))
    if Np != N:
        wb = jnp.pad(wb, ((0, 0), (0, Np - N)))
        bias = jnp.pad(bias, (0, Np - N))
    b2 = bias.astype(jnp.float32).reshape(1, Np)

    x_spec = pl.BlockSpec((tm, K), lambda i, j: (i, 0))
    w_spec = pl.BlockSpec((K, tn), lambda i, j: (0, j))
    b_spec = pl.BlockSpec((1, tn), lambda i, j: (0, j))
    o_spec = pl.BlockSpec((tm, tn), lambda i, j: (i, j))

    if identity is not None:
        idp = identity.astype(jnp.float32)
        idp = jnp.pad(idp, ((0, Mp - M), (0, Np - N)))
        kern = _mm_bias_add_relu_kernel
        in_specs = [x_spec, w_spec, b_spec,
                    pl.BlockSpec((tm, tn), lambda i, j: (i, j))]
        args = (xb, wb, b2, idp)
    else:
        kern = _mm_bias_relu_kernel if relu else _mm_bias_kernel
        in_specs = [x_spec, w_spec, b_spec]
        args = (xb, wb, b2)

    out = pl.pallas_call(
        kern,
        out_shape=jax.ShapeDtypeStruct((Mp, Np), jnp.float32),
        grid=(Mp // tm, Np // tn),
        in_specs=in_specs,
        out_specs=o_spec,
        compiler_params=pltpu.CompilerParams(
            dimension_semantics=("parallel", "parallel"),
            vmem_limit_bytes=_VMEM_LIMIT),
    )(*args)
    return out[:M, :N]


def _extract_patches(x, kh, kw, stride, pad, pad_value=0.0):
    """x: NHWC.  Returns (N, OH, OW, kh*kw, C), OH, OW  (im2col gather, JAX glue)."""
    N, H, W, C = x.shape
    xp = jnp.pad(x, ((0, 0), (pad, pad), (pad, pad), (0, 0)),
                 constant_values=pad_value)
    OH = (H + 2 * pad - kh) // stride + 1
    OW = (W + 2 * pad - kw) // stride + 1
    cols = []
    for i in range(kh):
        for j in range(kw):
            cols.append(xp[:, i:i + stride * OH:stride,
                           j:j + stride * OW:stride, :])
    patches = jnp.stack(cols, axis=3)  # (N, OH, OW, kh*kw, C)
    return patches, OH, OW


def conv_bn(x, w, bias, *, stride, pad, relu, identity=None):
    """Conv2d(no bias) with eval-mode BatchNorm pre-folded into (w, bias).

    x: (N,H,W,Cin) NHWC;  w: (kh,kw,Cin,Cout) (BN scale folded, bf16);
    bias: (Cout,).  `identity` (conv-output-shaped) fuses residual add+ReLU."""
    kh, kw, cin, cout = w.shape
    N = x.shape[0]
    if kh == 1 and kw == 1 and pad == 0:
        # 1x1 conv: plain (strided) matmul, no im2col materialization.
        xs = x if stride == 1 else x[:, ::stride, ::stride, :]
        OH, OW = xs.shape[1], xs.shape[2]
        xm = xs.reshape(N * OH * OW, cin)
    else:
        # Spatial conv (3x3 / 7x7): bf16 im2col then MXU matmul.
        patches, OH, OW = _extract_patches(x.astype(jnp.bfloat16), kh, kw,
                                           stride, pad, 0.0)
        xm = patches.reshape(N * OH * OW, kh * kw * cin)
    wm = w.reshape(kh * kw * cin, cout)
    id_m = None if identity is None else identity.reshape(N * OH * OW, cout)
    y = matmul_bias(xm, wm, bias, relu=relu, identity=id_m)
    return y.reshape(N, OH, OW, cout)


def maxpool_3x3_s2(x):
    N, H, W, C = x.shape
    patches, OH, OW = _extract_patches(x, 3, 3, 2, 1, pad_value=-jnp.inf)
    M = N * OH * OW
    pm = patches.reshape(M, 9, C).transpose(1, 0, 2)      # (9, M, C)
    TM = 512
    if M > TM:
        Mp, tm = _round_up(M, TM), TM
    else:
        Mp = _round_up(M, 8)
        tm = Mp
    if Mp != M:
        pm = jnp.pad(pm, ((0, 0), (0, Mp - M), (0, 0)))
    out = pl.pallas_call(
        _maxpool_kernel,
        out_shape=jax.ShapeDtypeStruct((Mp, C), jnp.float32),
        grid=(Mp // tm,),
        in_specs=[pl.BlockSpec((9, tm, C), lambda i: (0, i, 0))],
        out_specs=pl.BlockSpec((tm, C), lambda i: (i, 0)),
        compiler_params=pltpu.CompilerParams(
            dimension_semantics=("parallel",),
            vmem_limit_bytes=_VMEM_LIMIT),
    )(pm)
    return out[:M].reshape(N, OH, OW, C)


def global_avgpool(x):
    N, H, W, C = x.shape
    x2 = x.reshape(N, H * W, C).transpose(1, 0, 2)        # (HW, N, C)
    return pl.pallas_call(
        _avgpool_kernel,
        out_shape=jax.ShapeDtypeStruct((N, C), jnp.float32),
        in_specs=[VMEM_SPEC],
        out_specs=VMEM_SPEC,
        compiler_params=pltpu.CompilerParams(vmem_limit_bytes=_VMEM_LIMIT),
    )(x2)


# ----------------------------------------------------------------------------
# Parameter construction (deterministic, synthetic; BN folded at build time)
# ----------------------------------------------------------------------------
def make_conv_bn_params(key, cin, cout, k):
    k1, k2, k3, k4, k5 = jax.random.split(key, 5)
    fan_in = k * k * cin
    w = jax.random.normal(k1, (k, k, cin, cout), jnp.float32) / jnp.sqrt(fan_in)
    gamma = 1.0 + 0.1 * jax.random.normal(k2, (cout,), jnp.float32)
    beta = 0.1 * jax.random.normal(k3, (cout,), jnp.float32)
    running_mean = 0.1 * jax.random.normal(k4, (cout,), jnp.float32)
    running_var = jnp.abs(jax.random.normal(k5, (cout,), jnp.float32)) + 0.5
    eps = 1e-5
    scale = gamma / jnp.sqrt(running_var + eps)
    bias = beta - running_mean * scale
    # Fold the eval-mode BN scale into the conv weights so the matmul epilogue
    # is bias-add only; pre-cast to bf16 for the MXU.
    w_folded = (w * scale[None, None, None, :]).astype(jnp.bfloat16)
    return {"w": w_folded, "bias": bias}


def make_bottleneck_params(key, in_c, planes, has_downsample):
    ks = jax.random.split(key, 4)
    p = {
        "conv1": make_conv_bn_params(ks[0], in_c, planes, 1),
        "conv2": make_conv_bn_params(ks[1], planes, planes, 3),
        "conv3": make_conv_bn_params(ks[2], planes, planes * 4, 1),
    }
    if has_downsample:
        p["downsample"] = make_conv_bn_params(ks[3], in_c, planes * 4, 1)
    return p


def make_layer_params(key, in_c, planes, num_blocks, stride):
    keys = jax.random.split(key, num_blocks)
    has_ds = (stride != 1) or (in_c != planes * 4)
    first = make_bottleneck_params(keys[0], in_c, planes, has_ds)
    rest = [make_bottleneck_params(keys[i], planes * 4, planes, False)
            for i in range(1, num_blocks)]
    rest_stacked = (jax.tree_util.tree_map(lambda *xs: jnp.stack(xs), *rest)
                    if rest else None)
    return {"first": first, "rest": rest_stacked}


def make_resnet_params(key, base, blocks, num_classes):
    keys = jax.random.split(key, 7)
    params = {"conv1": make_conv_bn_params(keys[0], 3, base, 7)}
    in_c = base
    planes = base
    strides = (1, 2, 2, 2)
    for li, (nb, st) in enumerate(zip(blocks, strides)):
        params[f"layer{li + 1}"] = make_layer_params(keys[1 + li], in_c,
                                                     planes, nb, st)
        in_c = planes * 4
        planes *= 2
    kw_, kb_ = jax.random.split(keys[5])
    w = jax.random.normal(kw_, (in_c, num_classes), jnp.float32) / jnp.sqrt(in_c)
    b = 0.01 * jax.random.normal(kb_, (num_classes,), jnp.float32)
    params["fc"] = {"w": w, "b": b}
    return params


# ----------------------------------------------------------------------------
# Forward pass
# ----------------------------------------------------------------------------
def bottleneck_forward(x, p, stride):
    out = conv_bn(x, p["conv1"]["w"], p["conv1"]["bias"],
                  stride=1, pad=0, relu=True)
    out = conv_bn(out, p["conv2"]["w"], p["conv2"]["bias"],
                  stride=stride, pad=1, relu=True)
    if "downsample" in p:
        identity = conv_bn(x, p["downsample"]["w"], p["downsample"]["bias"],
                           stride=stride, pad=0, relu=False)
    else:
        identity = x
    # conv3 with the residual add + ReLU fused into its matmul epilogue.
    return conv_bn(out, p["conv3"]["w"], p["conv3"]["bias"],
                   stride=1, pad=0, relu=True, identity=identity)


def layer_forward(x, layer_p, stride):
    x = bottleneck_forward(x, layer_p["first"], stride)
    if layer_p["rest"] is not None:
        # Identical bottleneck blocks (stride 1, no downsample) run as a scan
        # over stacked params so the Pallas kernels are traced/compiled once.
        def body(carry, block_p):
            return bottleneck_forward(carry, block_p, 1), None

        x, _ = jax.lax.scan(body, x, layer_p["rest"])
    return x


def resnet_forward(params, x_nchw):
    # TODO(synk): PyTorch's `.to(device)` transfer has no Pallas equivalent (no-op here).
    x = jnp.transpose(x_nchw, (0, 2, 3, 1)).astype(jnp.float32)  # NCHW -> NHWC
    c1 = params["conv1"]
    x = conv_bn(x, c1["w"], c1["bias"], stride=2, pad=3, relu=True)
    x = maxpool_3x3_s2(x)
    x = layer_forward(x, params["layer1"], 1)
    x = layer_forward(x, params["layer2"], 2)
    x = layer_forward(x, params["layer3"], 2)
    x = layer_forward(x, params["layer4"], 2)
    x = global_avgpool(x)                       # == flatten(avgpool(x), 1)
    return matmul_bias(x, params["fc"]["w"], params["fc"]["b"], relu=False)


# ----------------------------------------------------------------------------
if __name__ == "__main__":
    key = jax.random.PRNGKey(0)
    pkey, xkey = jax.random.split(key)

    base = 8                     # scaled-down width (torchvision uses 64)
    blocks = (3, 4, 23, 3)       # ResNet-101 bottleneck layout
    num_classes = 10

    params = make_resnet_params(pkey, base, blocks, num_classes)
    x = jax.random.normal(xkey, (2, 3, 32, 32), jnp.float32)  # NCHW like PyTorch

    fwd = jax.jit(resnet_forward)
    out = jax.block_until_ready(fwd(params, x))

    assert out.shape == (2, num_classes), out.shape
    assert jnp.all(jnp.isfinite(out))
    print("KERNEL_OK")
</pallas_src>

<mosaic_0001>
module attributes {stable_mosaic.version = 11 : i64} {
  func.func @_mm_bias_relu_kernel(%arg0: i32, %arg1: i32, %arg2: memref<256x147xbf16, #tpu.memory_space<vmem>>, %arg3: memref<147x128xbf16, #tpu.memory_space<vmem>>, %arg4: memref<1x128xf32, #tpu.memory_space<vmem>>, %arg5: memref<256x128xf32, #tpu.memory_space<vmem>>) attributes {dimension_semantics = [#tpu.dimension_semantics<parallel>, #tpu.dimension_semantics<parallel>], iteration_bounds = array<i64: 2, 1>, scalar_prefetch = 0 : i64, scratch_operands = 0 : i64, tpu.core_type = #tpu.core_type<tc>, window_params = [{transform_indices = @transform_0, window_bounds = array<i64: 256, 147>}, {transform_indices = @transform_1, window_bounds = array<i64: 147, 128>}, {transform_indices = @transform_2, window_bounds = array<i64: 1, 128>}, {transform_indices = @transform_3, window_bounds = array<i64: 256, 128>}]} {
    %c0 = arith.constant 0 : index
    %c0_0 = arith.constant 0 : index
    %0 = vector.load %arg2[%c0, %c0_0] : memref<256x147xbf16, #tpu.memory_space<vmem>>, vector<256x147xbf16>
    %c0_1 = arith.constant 0 : index
    %c0_2 = arith.constant 0 : index
    %1 = vector.load %arg3[%c0_1, %c0_2] : memref<147x128xbf16, #tpu.memory_space<vmem>>, vector<147x128xbf16>
    %cst = arith.constant dense<0.000000e+00> : vector<256x128xf32>
    %2 = tpu.matmul %0, %1, %cst {dimension_numbers = #tpu.dot_dimension_numbers<[1], [0], [0], [1], [0, 0, 1, 1], [], []>} : vector<256x147xbf16>, vector<147x128xbf16>, vector<256x128xf32> -> vector<256x128xf32>
    %c0_3 = arith.constant 0 : index
    %c0_4 = arith.constant 0 : index
    %3 = vector.load %arg4[%c0_3, %c0_4] : memref<1x128xf32, #tpu.memory_space<vmem>>, vector<1x128xf32>
    %4 = vector.broadcast %3 : vector<1x128xf32> to vector<256x128xf32>
    %5 = arith.addf %2, %4 : vector<256x128xf32>
    %cst_5 = arith.constant 0.000000e+00 : f32
    %6 = vector.broadcast %cst_5 : f32 to vector<256x128xf32>
    %7 = arith.maximumf %5, %6 : vector<256x128xf32>
    %c0_6 = arith.constant 0 : index
    %c0_7 = arith.constant 0 : index
    %8 = vector.load %arg5[%c0_6, %c0_7] : memref<256x128xf32, #tpu.memory_space<vmem>>, vector<256x128xf32>
    tpu.vector_store %arg5[%c0_6, %c0_7], %7 {strides = array<i32>} : memref<256x128xf32, #tpu.memory_space<vmem>>, vector<256x128xf32>,
    return
  }
  func.func @transform_0(%arg0: i32, %arg1: i32) -> (i32, i32) {
    %c0_i32 = arith.constant 0 : i32
    %c0_i32_0 = arith.constant 0 : i32
    return %arg0, %c0_i32 : i32, i32
  }
  func.func @transform_1(%arg0: i32, %arg1: i32) -> (i32, i32) {
    %c0_i32 = arith.constant 0 : i32
    %c0_i32_0 = arith.constant 0 : i32
    return %c0_i32, %arg1 : i32, i32
  }
  func.func @transform_2(%arg0: i32, %arg1: i32) -> (i32, i32) {
    %c0_i32 = arith.constant 0 : i32
    %c0_i32_0 = arith.constant 0 : i32
    return %c0_i32, %arg1 : i32, i32
  }
  func.func @transform_3(%arg0: i32, %arg1: i32) -> (i32, i32) {
    %c0_i32 = arith.constant 0 : i32
    return %arg0, %arg1 : i32, i32
  }
}

module attributes {stable_mosaic.version = 11 : i64} {
  func.func @_maxpool_kernel(%arg0: i32, %arg1: memref<9x128x8xf32, #tpu.memory_space<vmem>>, %arg2: memref<128x8xf32, #tpu.memory_space<vmem>>) attributes {dimension_semantics = [#tpu.dimension_semantics<parallel>], iteration_bounds = array<i64: 1>, scalar_prefetch = 0 : i64, scratch_operands = 0 : i64, tpu.core_type = #tpu.core_type<tc>, window_params = [{transform_indices = @transform_0, window_bounds = array<i64: 9, 128, 8>}, {transform_indices = @transform_1, window_bounds = array<i64: 128, 8>}]} {
    %c0 = arith.constant 0 : index
    %c0_0 = arith.constant 0 : index
    %c0_1 = arith.constant 0 : index
    %0 = vector.load %arg1[%c0, %c0_0, %c0_1] : memref<9x128x8xf32, #tpu.memory_space<vmem>>, vector<9x128x8xf32>
    %cst = arith.constant dense<0xFF800000> : vector<128x8xf32>
    %1 = vector.multi_reduction <maximumf>, %0, %cst [0] : vector<9x128x8xf32> to vector<128x8xf32>
    %c0_2 = arith.constant 0 : index
    %c0_3 = arith.constant 0 : index
    %2 = vector.load %arg2[%c0_2, %c0_3] : memref<128x8xf32, #tpu.memory_space<vmem>>, vector<128x8xf32>
    tpu.vector_store %arg2[%c0_2, %c0_3], %1 {strides = array<i32>} : memref<128x8xf32, #tpu.memory_space<vmem>>, vector<128x8xf32>,
    return
  }
  func.func @transform_0(%arg0: i32) -> (i32, i32, i32) {
    %c0_i32 = arith.constant 0 : i32
    %c0_i32_0 = arith.constant 0 : i32
    %c0_i32_1 = arith.constant 0 : i32
    return %c0_i32, %arg0, %c0_i32_0 : i32, i32, i32
  }
  func.func @transform_1(%arg0: i32) -> (i32, i32) {
    %c0_i32 = arith.constant 0 : i32
    %c0_i32_0 = arith.constant 0 : i32
    return %arg0, %c0_i32 : i32, i32
  }
}

module attributes {stable_mosaic.version = 11 : i64} {
  func.func @_mm_bias_relu_kernel(%arg0: i32, %arg1: i32, %arg2: memref<128x8xbf16, #tpu.memory_space<vmem>>, %arg3: memref<8x128xbf16, #tpu.memory_space<vmem>>, %arg4: memref<1x128xf32, #tpu.memory_space<vmem>>, %arg5: memref<128x128xf32, #tpu.memory_space<vmem>>) attributes {dimension_semantics = [#tpu.dimension_semantics<parallel>, #tpu.dimension_semantics<parallel>], iteration_bounds = array<i64: 1, 1>, scalar_prefetch = 0 : i64, scratch_operands = 0 : i64, tpu.core_type = #tpu.core_type<tc>, window_params = [{transform_indices = @transform_0, window_bounds = array<i64: 128, 8>}, {transform_indices = @transform_1, window_bounds = array<i64: 8, 128>}, {transform_indices = @transform_2, window_bounds = array<i64: 1, 128>}, {transform_indices = @transform_3, window_bounds = array<i64: 128, 128>}]} {
    %c0 = arith.constant 0 : index
    %c0_0 = arith.constant 0 : index
    %0 = vector.load %arg2[%c0, %c0_0] : memref<128x8xbf16, #tpu.memory_space<vmem>>, vector<128x8xbf16>
    %c0_1 = arith.constant 0 : index
    %c0_2 = arith.constant 0 : index
    %1 = vector.load %arg3[%c0_1, %c0_2] : memref<8x128xbf16, #tpu.memory_space<vmem>>, vector<8x128xbf16>
    %cst = arith.constant dense<0.000000e+00> : vector<128x128xf32>
    %2 = tpu.matmul %0, %1, %cst {dimension_numbers = #tpu.dot_dimension_numbers<[1], [0], [0], [1], [0, 0, 1, 1], [], []>} : vector<128x8xbf16>, vector<8x128xbf16>, vector<128x128xf32> -> vector<128x128xf32>
    %c0_3 = arith.constant 0 : index
    %c0_4 = arith.constant 0 : index
    %3 = vector.load %arg4[%c0_3, %c0_4] : memref<1x128xf32, #tpu.memory_space<vmem>>, vector<1x128xf32>
    %4 = vector.broadcast %3 : vector<1x128xf32> to vector<128x128xf32>
    %5 = arith.addf %2, %4 : vector<128x128xf32>
    %cst_5 = arith.constant 0.000000e+00 : f32
    %6 = vector.broadcast %cst_5 : f32 to vector<128x128xf32>
    %7 = arith.maximumf %5, %6 : vector<128x128xf32>
    %c0_6 = arith.constant 0 : index
    %c0_7 = arith.constant 0 : index
    %8 = vector.load %arg5[%c0_6, %c0_7] : memref<128x128xf32, #tpu.memory_space<vmem>>, vector<128x128xf32>
    tpu.vector_store %arg5[%c0_6, %c0_7], %7 {strides = array<i32>} : memref<128x128xf32, #tpu.memory_space<vmem>>, vector<128x128xf32>,
    return
  }
  func.func @transform_0(%arg0: i32, %arg1: i32) -> (i32, i32) {
    %c0_i32 = arith.constant 0 : i32
    %c0_i32_0 = arith.constant 0 : i32
    return %arg0, %c0_i32 : i32, i32
  }
  func.func @transform_1(%arg0: i32, %arg1: i32) -> (i32, i32) {
    %c0_i32 = arith.constant 0 : i32
    %c0_i32_0 = arith.constant 0 : i32
    return %c0_i32, %arg1 : i32, i32
  }
  func.func @transform_2(%arg0: i32, %arg1: i32) -> (i32, i32) {
    %c0_i32 = arith.constant 0 : i32
    %c0_i32_0 = arith.constant 0 : i32
    return %c0_i32, %arg1 : i32, i32
  }
  func.func @transform_3(%arg0: i32, %arg1: i32) -> (i32, i32) {
    %c0_i32 = arith.constant 0 : i32
    return %arg0, %arg1 : i32, i32
  }
}

module attributes {stable_mosaic.version = 11 : i64} {
  func.func @_mm_bias_relu_kernel(%arg0: i32, %arg1: i32, %arg2: memref<128x72xbf16, #tpu.memory_space<vmem>>, %arg3: memref<72x128xbf16, #tpu.memory_space<vmem>>, %arg4: memref<1x128xf32, #tpu.memory_space<vmem>>, %arg5: memref<128x128xf32, #tpu.memory_space<vmem>>) attributes {dimension_semantics = [#tpu.dimension_semantics<parallel>, #tpu.dimension_semantics<parallel>], iteration_bounds = array<i64: 1, 1>, scalar_prefetch = 0 : i64, scratch_operands = 0 : i64, tpu.core_type = #tpu.core_type<tc>, window_params = [{transform_indices = @transform_0, window_bounds = array<i64: 128, 72>}, {transform_indices = @transform_1, window_bounds = array<i64: 72, 128>}, {transform_indices = @transform_2, window_bounds = array<i64: 1, 128>}, {transform_indices = @transform_3, window_bounds = array<i64: 128, 128>}]} {
    %c0 = arith.constant 0 : index
    %c0_0 = arith.constant 0 : index
    %0 = vector.load %arg2[%c0, %c0_0] : memref<128x72xbf16, #tpu.memory_space<vmem>>, vector<128x72xbf16>
    %c0_1 = arith.constant 0 : index
    %c0_2 = arith.constant 0 : index
    %1 = vector.load %arg3[%c0_1, %c0_2] : memref<72x128xbf16, #tpu.memory_space<vmem>>, vector<72x128xbf16>
    %cst = arith.constant dense<0.000000e+00> : vector<128x128xf32>
    %2 = tpu.matmul %0, %1, %cst {dimension_numbers = #tpu.dot_dimension_numbers<[1], [0], [0], [1], [0, 0, 1, 1], [], []>} : vector<128x72xbf16>, vector<72x128xbf16>, vector<128x128xf32> -> vector<128x128xf32>
    %c0_3 = arith.constant 0 : index
    %c0_4 = arith.constant 0 : index
    %3 = vector.load %arg4[%c0_3, %c0_4] : memref<1x128xf32, #tpu.memory_space<vmem>>, vector<1x128xf32>
    %4 = vector.broadcast %3 : vector<1x128xf32> to vector<128x128xf32>
    %5 = arith.addf %2, %4 : vector<128x128xf32>
    %cst_5 = arith.constant 0.000000e+00 : f32
    %6 = vector.broadcast %cst_5 : f32 to vector<128x128xf32>
    %7 = arith.maximumf %5, %6 : vector<128x128xf32>
    %c0_6 = arith.constant 0 : index
    %c0_7 = arith.constant 0 : index
    %8 = vector.load %arg5[%c0_6, %c0_7] : memref<128x128xf32, #tpu.memory_space<vmem>>, vector<128x128xf32>
    tpu.vector_store %arg5[%c0_6, %c0_7], %7 {strides = array<i32>} : memref<128x128xf32, #tpu.memory_space<vmem>>, vector<128x128xf32>,
    return
  }
  func.func @transform_0(%arg0: i32, %arg1: i32) -> (i32, i32) {
    %c0_i32 = arith.constant 0 : i32
    %c0_i32_0 = arith.constant 0 : i32
    return %arg0, %c0_i32 : i32, i32
  }
  func.func @transform_1(%arg0: i32, %arg1: i32) -> (i32, i32) {
    %c0_i32 = arith.constant 0 : i32
    %c0_i32_0 = arith.constant 0 : i32
    return %c0_i32, %arg1 : i32, i32
  }
  func.func @transform_2(%arg0: i32, %arg1: i32) -> (i32, i32) {
    %c0_i32 = arith.constant 0 : i32
    %c0_i32_0 = arith.constant 0 : i32
    return %c0_i32, %arg1 : i32, i32
  }
  func.func @transform_3(%arg0: i32, %arg1: i32) -> (i32, i32) {
    %c0_i32 = arith.constant 0 : i32
    return %arg0, %arg1 : i32, i32
  }
}

module attributes {stable_mosaic.version = 11 : i64} {
  func.func @_mm_bias_kernel(%arg0: i32, %arg1: i32, %arg2: memref<128x8xbf16, #tpu.memory_space<vmem>>, %arg3: memref<8x128xbf16, #tpu.memory_space<vmem>>, %arg4: memref<1x128xf32, #tpu.memory_space<vmem>>, %arg5: memref<128x128xf32, #tpu.memory_space<vmem>>) attributes {dimension_semantics = [#tpu.dimension_semantics<parallel>, #tpu.dimension_semantics<parallel>], iteration_bounds = array<i64: 1, 1>, scalar_prefetch = 0 : i64, scratch_operands = 0 : i64, tpu.core_type = #tpu.core_type<tc>, window_params = [{transform_indices = @transform_0, window_bounds = array<i64: 128, 8>}, {transform_indices = @transform_1, window_bounds = array<i64: 8, 128>}, {transform_indices = @transform_2, window_bounds = array<i64: 1, 128>}, {transform_indices = @transform_3, window_bounds = array<i64: 128, 128>}]} {
    %c0 = arith.constant 0 : index
    %c0_0 = arith.constant 0 : index
    %0 = vector.load %arg2[%c0, %c0_0] : memref<128x8xbf16, #tpu.memory_space<vmem>>, vector<128x8xbf16>
    %c0_1 = arith.constant 0 : index
    %c0_2 = arith.constant 0 : index
    %1 = vector.load %arg3[%c0_1, %c0_2] : memref<8x128xbf16, #tpu.memory_space<vmem>>, vector<8x128xbf16>
    %cst = arith.constant dense<0.000000e+00> : vector<128x128xf32>
    %2 = tpu.matmul %0, %1, %cst {dimension_numbers = #tpu.dot_dimension_numbers<[1], [0], [0], [1], [0, 0, 1, 1], [], []>} : vector<128x8xbf16>, vector<8x128xbf16>, vector<128x128xf32> -> vector<128x128xf32>
    %c0_3 = arith.constant 0 : index
    %c0_4 = arith.constant 0 : index
    %3 = vector.load %arg4[%c0_3, %c0_4] : memref<1x128xf32, #tpu.memory_space<vmem>>, vector<1x128xf32>
    %4 = vector.broadcast %3 : vector<1x128xf32> to vector<128x128xf32>
    %5 = arith.addf %2, %4 : vector<128x128xf32>
    %c0_5 = arith.constant 0 : index
    %c0_6 = arith.constant 0 : index
    %6 = vector.load %arg5[%c0_5, %c0_6] : memref<128x128xf32, #tpu.memory_space<vmem>>, vector<128x128xf32>
    tpu.vector_store %arg5[%c0_5, %c0_6], %5 {strides = array<i32>} : memref<128x128xf32, #tpu.memory_space<vmem>>, vector<128x128xf32>,
    return
  }
  func.func @transform_0(%arg0: i32, %arg1: i32) -> (i32, i32) {
    %c0_i32 = arith.constant 0 : i32
    %c0_i32_0 = arith.constant 0 : i32
    return %arg0, %c0_i32 : i32, i32
  }
  func.func @transform_1(%arg0: i32, %arg1: i32) -> (i32, i32) {
    %c0_i32 = arith.constant 0 : i32
    %c0_i32_0 = arith.constant 0 : i32
    return %c0_i32, %arg1 : i32, i32
  }
  func.func @transform_2(%arg0: i32, %arg1: i32) -> (i32, i32) {
    %c0_i32 = arith.constant 0 : i32
    %c0_i32_0 = arith.constant 0 : i32
    return %c0_i32, %arg1 : i32, i32
  }
  func.func @transform_3(%arg0: i32, %arg1: i32) -> (i32, i32) {
    %c0_i32 = arith.constant 0 : i32
    return %arg0, %arg1 : i32, i32
  }
}

module attributes {stable_mosaic.version = 11 : i64} {
  func.func @_mm_bias_add_relu_kernel(%arg0: i32, %arg1: i32, %arg2: memref<128x8xbf16, #tpu.memory_space<vmem>>, %arg3: memref<8x128xbf16, #tpu.memory_space<vmem>>, %arg4: memref<1x128xf32, #tpu.memory_space<vmem>>, %arg5: memref<128x128xf32, #tpu.memory_space<vmem>>, %arg6: memref<128x128xf32, #tpu.memory_space<vmem>>) attributes {dimension_semantics = [#tpu.dimension_semantics<parallel>, #tpu.dimension_semantics<parallel>], iteration_bounds = array<i64: 1, 1>, scalar_prefetch = 0 : i64, scratch_operands = 0 : i64, tpu.core_type = #tpu.core_type<tc>, window_params = [{transform_indices = @transform_0, window_bounds = array<i64: 128, 8>}, {transform_indices = @transform_1, window_bounds = array<i64: 8, 128>}, {transform_indices = @transform_2, window_bounds = array<i64: 1, 128>}, {transform_indices = @transform_3, window_bounds = array<i64: 128, 128>}, {transform_indices = @transform_4, window_bounds = array<i64: 128, 128>}]} {
    %c0 = arith.constant 0 : index
    %c0_0 = arith.constant 0 : index
    %0 = vector.load %arg2[%c0, %c0_0] : memref<128x8xbf16, #tpu.memory_space<vmem>>, vector<128x8xbf16>
    %c0_1 = arith.constant 0 : index
    %c0_2 = arith.constant 0 : index
    %1 = vector.load %arg3[%c0_1, %c0_2] : memref<8x128xbf16, #tpu.memory_space<vmem>>, vector<8x128xbf16>
    %cst = arith.constant dense<0.000000e+00> : vector<128x128xf32>
    %2 = tpu.matmul %0, %1, %cst {dimension_numbers = #tpu.dot_dimension_numbers<[1], [0], [0], [1], [0, 0, 1, 1], [], []>} : vector<128x8xbf16>, vector<8x128xbf16>, vector<128x128xf32> -> vector<128x128xf32>
    %c0_3 = arith.constant 0 : index
    %c0_4 = arith.constant 0 : index
    %3 = vector.load %arg4[%c0_3, %c0_4] : memref<1x128xf32, #tpu.memory_space<vmem>>, vector<1x128xf32>
    %4 = vector.broadcast %3 : vector<1x128xf32> to vector<128x128xf32>
    %5 = arith.addf %2, %4 : vector<128x128xf32>
    %c0_5 = arith.constant 0 : index
    %c0_6 = arith.constant 0 : index
    %6 = vector.load %arg5[%c0_5, %c0_6] : memref<128x128xf32, #tpu.memory_space<vmem>>, vector<128x128xf32>
    %7 = arith.addf %5, %6 : vector<128x128xf32>
    %cst_7 = arith.constant 0.000000e+00 : f32
    %8 = vector.broadcast %cst_7 : f32 to vector<128x128xf32>
    %9 = arith.maximumf %7, %8 : vector<128x128xf32>
    %c0_8 = arith.constant 0 : index
    %c0_9 = arith.constant 0 : index
    %10 = vector.load %arg6[%c0_8, %c0_9] : memref<128x128xf32, #tpu.memory_space<vmem>>, vector<128x128xf32>
    tpu.vector_store %arg6[%c0_8, %c0_9], %9 {strides = array<i32>} : memref<128x128xf32, #tpu.memory_space<vmem>>, vector<128x128xf32>,
    return
  }
  func.func @transform_0(%arg0: i32, %arg1: i32) -> (i32, i32) {
    %c0_i32 = arith.constant 0 : i32
    %c0_i32_0 = arith.constant 0 : i32
    return %arg0, %c0_i32 : i32, i32
  }
  func.func @transform_1(%arg0: i32, %arg1: i32) -> (i32, i32) {
    %c0_i32 = arith.constant 0 : i32
    %c0_i32_0 = arith.constant 0 : i32
    return %c0_i32, %arg1 : i32, i32
  }
  func.func @transform_2(%arg0: i32, %arg1: i32) -> (i32, i32) {
    %c0_i32 = arith.constant 0 : i32
    %c0_i32_0 = arith.constant 0 : i32
    return %c0_i32, %arg1 : i32, i32
  }
  func.func @transform_3(%arg0: i32, %arg1: i32) -> (i32, i32) {
    %c0_i32 = arith.constant 0 : i32
    return %arg0, %arg1 : i32, i32
  }
  func.func @transform_4(%arg0: i32, %arg1: i32) -> (i32, i32) {
    %c0_i32 = arith.constant 0 : i32
    return %arg0, %arg1 : i32, i32
  }
}

module attributes {stable_mosaic.version = 11 : i64} {
  func.func @_mm_bias_relu_kernel(%arg0: i32, %arg1: i32, %arg2: memref<128x32xbf16, #tpu.memory_space<vmem>>, %arg3: memref<32x128xbf16, #tpu.memory_space<vmem>>, %arg4: memref<1x128xf32, #tpu.memory_space<vmem>>, %arg5: memref<128x128xf32, #tpu.memory_space<vmem>>) attributes {dimension_semantics = [#tpu.dimension_semantics<parallel>, #tpu.dimension_semantics<parallel>], iteration_bounds = array<i64: 1, 1>, scalar_prefetch = 0 : i64, scratch_operands = 0 : i64, tpu.core_type = #tpu.core_type<tc>, window_params = [{transform_indices = @transform_0, window_bounds = array<i64: 128, 32>}, {transform_indices = @transform_1, window_bounds = array<i64: 32, 128>}, {transform_indices = @transform_2, window_bounds = array<i64: 1, 128>}, {transform_indices = @transform_3, window_bounds = array<i64: 128, 128>}]} {
    %c0 = arith.constant 0 : index
    %c0_0 = arith.constant 0 : index
    %0 = vector.load %arg2[%c0, %c0_0] : memref<128x32xbf16, #tpu.memory_space<vmem>>, vector<128x32xbf16>
    %c0_1 = arith.constant 0 : index
    %c0_2 = arith.constant 0 : index
    %1 = vector.load %arg3[%c0_1, %c0_2] : memref<32x128xbf16, #tpu.memory_space<vmem>>, vector<32x128xbf16>
    %cst = arith.constant dense<0.000000e+00> : vector<128x128xf32>
    %2 = tpu.matmul %0, %1, %cst {dimension_numbers = #tpu.dot_dimension_numbers<[1], [0], [0], [1], [0, 0, 1, 1], [], []>} : vector<128x32xbf16>, vector<32x128xbf16>, vector<128x128xf32> -> vector<128x128xf32>
    %c0_3 = arith.constant 0 : index
    %c0_4 = arith.constant 0 : index
    %3 = vector.load %arg4[%c0_3, %c0_4] : memref<1x128xf32, #tpu.memory_space<vmem>>, vector<1x128xf32>
    %4 = vector.broadcast %3 : vector<1x128xf32> to vector<128x128xf32>
    %5 = arith.addf %2, %4 : vector<128x128xf32>
    %cst_5 = arith.constant 0.000000e+00 : f32
    %6 = vector.broadcast %cst_5 : f32 to vector<128x128xf32>
    %7 = arith.maximumf %5, %6 : vector<128x128xf32>
    %c0_6 = arith.constant 0 : index
    %c0_7 = arith.constant 0 : index
    %8 = vector.load %arg5[%c0_6, %c0_7] : memref<128x128xf32, #tpu.memory_space<vmem>>, vector<128x128xf32>
    tpu.vector_store %arg5[%c0_6, %c0_7], %7 {strides = array<i32>} : memref<128x128xf32, #tpu.memory_space<vmem>>, vector<128x128xf32>,
    return
  }
  func.func @transform_0(%arg0: i32, %arg1: i32) -> (i32, i32) {
    %c0_i32 = arith.constant 0 : i32
    %c0_i32_0 = arith.constant 0 : i32
    return %arg0, %c0_i32 : i32, i32
  }
  func.func @transform_1(%arg0: i32, %arg1: i32) -> (i32, i32) {
    %c0_i32 = arith.constant 0 : i32
    %c0_i32_0 = arith.constant 0 : i32
    return %c0_i32, %arg1 : i32, i32
  }
  func.func @transform_2(%arg0: i32, %arg1: i32) -> (i32, i32) {
    %c0_i32 = arith.constant 0 : i32
    %c0_i32_0 = arith.constant 0 : i32
    return %c0_i32, %arg1 : i32, i32
  }
  func.func @transform_3(%arg0: i32, %arg1: i32) -> (i32, i32) {
    %c0_i32 = arith.constant 0 : i32
    return %arg0, %arg1 : i32, i32
  }
}

module attributes {stable_mosaic.version = 11 : i64} {
  func.func @_mm_bias_relu_kernel(%arg0: i32, %arg1: i32, %arg2: memref<32x144xbf16, #tpu.memory_space<vmem>>, %arg3: memref<144x128xbf16, #tpu.memory_space<vmem>>, %arg4: memref<1x128xf32, #tpu.memory_space<vmem>>, %arg5: memref<32x128xf32, #tpu.memory_space<vmem>>) attributes {dimension_semantics = [#tpu.dimension_semantics<parallel>, #tpu.dimension_semantics<parallel>], iteration_bounds = array<i64: 1, 1>, scalar_prefetch = 0 : i64, scratch_operands = 0 : i64, tpu.core_type = #tpu.core_type<tc>, window_params = [{transform_indices = @transform_0, window_bounds = array<i64: 32, 144>}, {transform_indices = @transform_1, window_bounds = array<i64: 144, 128>}, {transform_indices = @transform_2, window_bounds = array<i64: 1, 128>}, {transform_indices = @transform_3, window_bounds = array<i64: 32, 128>}]} {
    %c0 = arith.constant 0 : index
    %c0_0 = arith.constant 0 : index
    %0 = vector.load %arg2[%c0, %c0_0] : memref<32x144xbf16, #tpu.memory_space<vmem>>, vector<32x144xbf16>
    %c0_1 = arith.constant 0 : index
    %c0_2 = arith.constant 0 : index
    %1 = vector.load %arg3[%c0_1, %c0_2] : memref<144x128xbf16, #tpu.memory_space<vmem>>, vector<144x128xbf16>
    %cst = arith.constant dense<0.000000e+00> : vector<32x128xf32>
    %2 = tpu.matmul %0, %1, %cst {dimension_numbers = #tpu.dot_dimension_numbers<[1], [0], [0], [1], [0, 0, 1, 1], [], []>} : vector<32x144xbf16>, vector<144x128xbf16>, vector<32x128xf32> -> vector<32x128xf32>
    %c0_3 = arith.constant 0 : index
    %c0_4 = arith.constant 0 : index
    %3 = vector.load %arg4[%c0_3, %c0_4] : memref<1x128xf32, #tpu.memory_space<vmem>>, vector<1x128xf32>
    %4 = vector.broadcast %3 : vector<1x128xf32> to vector<32x128xf32>
    %5 = arith.addf %2, %4 : vector<32x128xf32>
    %cst_5 = arith.constant 0.000000e+00 : f32
    %6 = vector.broadcast %cst_5 : f32 to vector<32x128xf32>
    %7 = arith.maximumf %5, %6 : vector<32x128xf32>
    %c0_6 = arith.constant 0 : index
    %c0_7 = arith.constant 0 : index
    %8 = vector.load %arg5[%c0_6, %c0_7] : memref<32x128xf32, #tpu.memory_space<vmem>>, vector<32x128xf32>
    tpu.vector_store %arg5[%c0_6, %c0_7], %7 {strides = array<i32>} : memref<32x128xf32, #tpu.memory_space<vmem>>, vector<32x128xf32>,
    return
  }
  func.func @transform_0(%arg0: i32, %arg1: i32) -> (i32, i32) {
    %c0_i32 = arith.constant 0 : i32
    %c0_i32_0 = arith.constant 0 : i32
    return %arg0, %c0_i32 : i32, i32
  }
  func.func @transform_1(%arg0: i32, %arg1: i32) -> (i32, i32) {
    %c0_i32 = arith.constant 0 : i32
    %c0_i32_0 = arith.constant 0 : i32
    return %c0_i32, %arg1 : i32, i32
  }
  func.func @transform_2(%arg0: i32, %arg1: i32) -> (i32, i32) {
    %c0_i32 = arith.constant 0 : i32
    %c0_i32_0 = arith.constant 0 : i32
    return %c0_i32, %arg1 : i32, i32
  }
  func.func @transform_3(%arg0: i32, %arg1: i32) -> (i32, i32) {
    %c0_i32 = arith.constant 0 : i32
    return %arg0, %arg1 : i32, i32
  }
}

module attributes {stable_mosaic.version = 11 : i64} {
  func.func @_mm_bias_kernel(%arg0: i32, %arg1: i32, %arg2: memref<32x32xbf16, #tpu.memory_space<vmem>>, %arg3: memref<32x128xbf16, #tpu.memory_space<vmem>>, %arg4: memref<1x128xf32, #tpu.memory_space<vmem>>, %arg5: memref<32x128xf32, #tpu.memory_space<vmem>>) attributes {dimension_semantics = [#tpu.dimension_semantics<parallel>, #tpu.dimension_semantics<parallel>], iteration_bounds = array<i64: 1, 1>, scalar_prefetch = 0 : i64, scratch_operands = 0 : i64, tpu.core_type = #tpu.core_type<tc>, window_params = [{transform_indices = @transform_0, window_bounds = array<i64: 32, 32>}, {transform_indices = @transform_1, window_bounds = array<i64: 32, 128>}, {transform_indices = @transform_2, window_bounds = array<i64: 1, 128>}, {transform_indices = @transform_3, window_bounds = array<i64: 32, 128>}]} {
    %c0 = arith.constant 0 : index
    %c0_0 = arith.constant 0 : index
    %0 = vector.load %arg2[%c0, %c0_0] : memref<32x32xbf16, #tpu.memory_space<vmem>>, vector<32x32xbf16>
    %c0_1 = arith.constant 0 : index
    %c0_2 = arith.constant 0 : index
    %1 = vector.load %arg3[%c0_1, %c0_2] : memref<32x128xbf16, #tpu.memory_space<vmem>>, vector<32x128xbf16>
    %cst = arith.constant dense<0.000000e+00> : vector<32x128xf32>
    %2 = tpu.matmul %0, %1, %cst {dimension_numbers = #tpu.dot_dimension_numbers<[1], [0], [0], [1], [0, 0, 1, 1], [], []>} : vector<32x32xbf16>, vector<32x128xbf16>, vector<32x128xf32> -> vector<32x128xf32>
    %c0_3 = arith.constant 0 : index
    %c0_4 = arith.constant 0 : index
    %3 = vector.load %arg4[%c0_3, %c0_4] : memref<1x128xf32, #tpu.memory_space<vmem>>, vector<1x128xf32>
    %4 = vector.broadcast %3 : vector<1x128xf32> to vector<32x128xf32>
    %5 = arith.addf %2, %4 : vector<32x128xf32>
    %c0_5 = arith.constant 0 : index
    %c0_6 = arith.constant 0 : index
    %6 = vector.load %arg5[%c0_5, %c0_6] : memref<32x128xf32, #tpu.memory_space<vmem>>, vector<32x128xf32>
    tpu.vector_store %arg5[%c0_5, %c0_6], %5 {strides = array<i32>} : memref<32x128xf32, #tpu.memory_space<vmem>>, vector<32x128xf32>,
    return
  }
  func.func @transform_0(%arg0: i32, %arg1: i32) -> (i32, i32) {
    %c0_i32 = arith.constant 0 : i32
    %c0_i32_0 = arith.constant 0 : i32
    return %arg0, %c0_i32 : i32, i32
  }
  func.func @transform_1(%arg0: i32, %arg1: i32) -> (i32, i32) {
    %c0_i32 = arith.constant 0 : i32
    %c0_i32_0 = arith.constant 0 : i32
    return %c0_i32, %arg1 : i32, i32
  }
  func.func @transform_2(%arg0: i32, %arg1: i32) -> (i32, i32) {
    %c0_i32 = arith.constant 0 : i32
    %c0_i32_0 = arith.constant 0 : i32
    return %c0_i32, %arg1 : i32, i32
  }
  func.func @transform_3(%arg0: i32, %arg1: i32) -> (i32, i32) {
    %c0_i32 = arith.constant 0 : i32
    return %arg0, %arg1 : i32, i32
  }
}

module attributes {stable_mosaic.version = 11 : i64} {
  func.func @_mm_bias_add_relu_kernel(%arg0: i32, %arg1: i32, %arg2: memref<32x16xbf16, #tpu.memory_space<vmem>>, %arg3: memref<16x128xbf16, #tpu.memory_space<vmem>>, %arg4: memref<1x128xf32, #tpu.memory_space<vmem>>, %arg5: memref<32x128xf32, #tpu.memory_space<vmem>>, %arg6: memref<32x128xf32, #tpu.memory_space<vmem>>) attributes {dimension_semantics = [#tpu.dimension_semantics<parallel>, #tpu.dimension_semantics<parallel>], iteration_bounds = array<i64: 1, 1>, scalar_prefetch = 0 : i64, scratch_operands = 0 : i64, tpu.core_type = #tpu.core_type<tc>, window_params = [{transform_indices = @transform_0, window_bounds = array<i64: 32, 16>}, {transform_indices = @transform_1, window_bounds = array<i64: 16, 128>}, {transform_indices = @transform_2, window_bounds = array<i64: 1, 128>}, {transform_indices = @transform_3, window_bounds = array<i64: 32, 128>}, {transform_indices = @transform_4, window_bounds = array<i64: 32, 128>}]} {
    %c0 = arith.constant 0 : index
    %c0_0 = arith.constant 0 : index
    %0 = vector.load %arg2[%c0, %c0_0] : memref<32x16xbf16, #tpu.memory_space<vmem>>, vector<32x16xbf16>
    %c0_1 = arith.constant 0 : index
    %c0_2 = arith.constant 0 : index
    %1 = vector.load %arg3[%c0_1, %c0_2] : memref<16x128xbf16, #tpu.memory_space<vmem>>, vector<16x128xbf16>
    %cst = arith.constant dense<0.000000e+00> : vector<32x128xf32>
    %2 = tpu.matmul %0, %1, %cst {dimension_numbers = #tpu.dot_dimension_numbers<[1], [0], [0], [1], [0, 0, 1, 1], [], []>} : vector<32x16xbf16>, vector<16x128xbf16>, vector<32x128xf32> -> vector<32x128xf32>
    %c0_3 = arith.constant 0 : index
    %c0_4 = arith.constant 0 : index
    %3 = vector.load %arg4[%c0_3, %c0_4] : memref<1x128xf32, #tpu.memory_space<vmem>>, vector<1x128xf32>
    %4 = vector.broadcast %3 : vector<1x128xf32> to vector<32x128xf32>
    %5 = arith.addf %2, %4 : vector<32x128xf32>
    %c0_5 = arith.constant 0 : index
    %c0_6 = arith.constant 0 : index
    %6 = vector.load %arg5[%c0_5, %c0_6] : memref<32x128xf32, #tpu.memory_space<vmem>>, vector<32x128xf32>
    %7 = arith.addf %5, %6 : vector<32x128xf32>
    %cst_7 = arith.constant 0.000000e+00 : f32
    %8 = vector.broadcast %cst_7 : f32 to vector<32x128xf32>
    %9 = arith.maximumf %7, %8 : vector<32x128xf32>
    %c0_8 = arith.constant 0 : index
    %c0_9 = arith.constant 0 : index
    %10 = vector.load %arg6[%c0_8, %c0_9] : memref<32x128xf32, #tpu.memory_space<vmem>>, vector<32x128xf32>
    tpu.vector_store %arg6[%c0_8, %c0_9], %9 {strides = array<i32>} : memref<32x128xf32, #tpu.memory_space<vmem>>, vector<32x128xf32>,
    return
  }
  func.func @transform_0(%arg0: i32, %arg1: i32) -> (i32, i32) {
    %c0_i32 = arith.constant 0 : i32
    %c0_i32_0 = arith.constant 0 : i32
    return %arg0, %c0_i32 : i32, i32
  }
  func.func @transform_1(%arg0: i32, %arg1: i32) -> (i32, i32) {
    %c0_i32 = arith.constant 0 : i32
    %c0_i32_0 = arith.constant 0 : i32
    return %c0_i32, %arg1 : i32, i32
  }
  func.func @transform_2(%arg0: i32, %arg1: i32) -> (i32, i32) {
    %c0_i32 = arith.constant 0 : i32
    %c0_i32_0 = arith.constant 0 : i32
    return %c0_i32, %arg1 : i32, i32
  }
  func.func @transform_3(%arg0: i32, %arg1: i32) -> (i32, i32) {
    %c0_i32 = arith.constant 0 : i32
    return %arg0, %arg1 : i32, i32
  }
  func.func @transform_4(%arg0: i32, %arg1: i32) -> (i32, i32) {
    %c0_i32 = arith.constant 0 : i32
    return %arg0, %arg1 : i32, i32
  }
}

module attributes {stable_mosaic.version = 11 : i64} {
  func.func @_mm_bias_relu_kernel(%arg0: i32, %arg1: i32, %arg2: memref<32x64xbf16, #tpu.memory_space<vmem>>, %arg3: memref<64x128xbf16, #tpu.memory_space<vmem>>, %arg4: memref<1x128xf32, #tpu.memory_space<vmem>>, %arg5: memref<32x128xf32, #tpu.memory_space<vmem>>) attributes {dimension_semantics = [#tpu.dimension_semantics<parallel>, #tpu.dimension_semantics<parallel>], iteration_bounds = array<i64: 1, 1>, scalar_prefetch = 0 : i64, scratch_operands = 0 : i64, tpu.core_type = #tpu.core_type<tc>, window_params = [{transform_indices = @transform_0, window_bounds = array<i64: 32, 64>}, {transform_indices = @transform_1, window_bounds = array<i64: 64, 128>}, {transform_indices = @transform_2, window_bounds = array<i64: 1, 128>}, {transform_indices = @transform_3, window_bounds = array<i64: 32, 128>}]} {
    %c0 = arith.constant 0 : index
    %c0_0 = arith.constant 0 : index
    %0 = vector.load %arg2[%c0, %c0_0] : memref<32x64xbf16, #tpu.memory_space<vmem>>, vector<32x64xbf16>
    %c0_1 = arith.constant 0 : index
    %c0_2 = arith.constant 0 : index
    %1 = vector.load %arg3[%c0_1, %c0_2] : memref<64x128xbf16, #tpu.memory_space<vmem>>, vector<64x128xbf16>
    %cst = arith.constant dense<0.000000e+00> : vector<32x128xf32>
    %2 = tpu.matmul %0, %1, %cst {dimension_numbers = #tpu.dot_dimension_numbers<[1], [0], [0], [1], [0, 0, 1, 1], [], []>} : vector<32x64xbf16>, vector<64x128xbf16>, vector<32x128xf32> -> vector<32x128xf32>
    %c0_3 = arith.constant 0 : index
    %c0_4 = arith.constant 0 : index
    %3 = vector.load %arg4[%c0_3, %c0_4] : memref<1x128xf32, #tpu.memory_space<vmem>>, vector<1x128xf32>
    %4 = vector.broadcast %3 : vector<1x128xf32> to vector<32x128xf32>
    %5 = arith.addf %2, %4 : vector<32x128xf32>
    %cst_5 = arith.constant 0.000000e+00 : f32
    %6 = vector.broadcast %cst_5 : f32 to vector<32x128xf32>
    %7 = arith.maximumf %5, %6 : vector<32x128xf32>
    %c0_6 = arith.constant 0 : index
    %c0_7 = arith.constant 0 : index
    %8 = vector.load %arg5[%c0_6, %c0_7] : memref<32x128xf32, #tpu.memory_space<vmem>>, vector<32x128xf32>
    tpu.vector_store %arg5[%c0_6, %c0_7], %7 {strides = array<i32>} : memref<32x128xf32, #tpu.memory_space<vmem>>, vector<32x128xf32>,
    return
  }
  func.func @transform_0(%arg0: i32, %arg1: i32) -> (i32, i32) {
    %c0_i32 = arith.constant 0 : i32
    %c0_i32_0 = arith.constant 0 : i32
    return %arg0, %c0_i32 : i32, i32
  }
  func.func @transform_1(%arg0: i32, %arg1: i32) -> (i32, i32) {
    %c0_i32 = arith.constant 0 : i32
    %c0_i32_0 = arith.constant 0 : i32
    return %c0_i32, %arg1 : i32, i32
  }
  func.func @transform_2(%arg0: i32, %arg1: i32) -> (i32, i32) {
    %c0_i32 = arith.constant 0 : i32
    %c0_i32_0 = arith.constant 0 : i32
    return %c0_i32, %arg1 : i32, i32
  }
  func.func @transform_3(%arg0: i32, %arg1: i32) -> (i32, i32) {
    %c0_i32 = arith.constant 0 : i32
    return %arg0, %arg1 : i32, i32
  }
}

module attributes {stable_mosaic.version = 11 : i64} {
  func.func @_mm_bias_relu_kernel(%arg0: i32, %arg1: i32, %arg2: memref<16x288xbf16, #tpu.memory_space<vmem>>, %arg3: memref<288x128xbf16, #tpu.memory_space<vmem>>, %arg4: memref<1x128xf32, #tpu.memory_space<vmem>>, %arg5: memref<16x128xf32, #tpu.memory_space<vmem>>) attributes {dimension_semantics = [#tpu.dimension_semantics<parallel>, #tpu.dimension_semantics<parallel>], iteration_bounds = array<i64: 1, 1>, scalar_prefetch = 0 : i64, scratch_operands = 0 : i64, tpu.core_type = #tpu.core_type<tc>, window_params = [{transform_indices = @transform_0, window_bounds = array<i64: 16, 288>}, {transform_indices = @transform_1, window_bounds = array<i64: 288, 128>}, {transform_indices = @transform_2, window_bounds = array<i64: 1, 128>}, {transform_indices = @transform_3, window_bounds = array<i64: 16, 128>}]} {
    %c0 = arith.constant 0 : index
    %c0_0 = arith.constant 0 : index
    %0 = vector.load %arg2[%c0, %c0_0] : memref<16x288xbf16, #tpu.memory_space<vmem>>, vector<16x288xbf16>
    %c0_1 = arith.constant 0 : index
    %c0_2 = arith.constant 0 : index
    %1 = vector.load %arg3[%c0_1, %c0_2] : memref<288x128xbf16, #tpu.memory_space<vmem>>, vector<288x128xbf16>
    %cst = arith.constant dense<0.000000e+00> : vector<16x128xf32>
    %2 = tpu.matmul %0, %1, %cst {dimension_numbers = #tpu.dot_dimension_numbers<[1], [0], [0], [1], [0, 0, 1, 1], [], []>} : vector<16x288xbf16>, vector<288x128xbf16>, vector<16x128xf32> -> vector<16x128xf32>
    %c0_3 = arith.constant 0 : index
    %c0_4 = arith.constant 0 : index
    %3 = vector.load %arg4[%c0_3, %c0_4] : memref<1x128xf32, #tpu.memory_space<vmem>>, vector<1x128xf32>
    %4 = vector.broadcast %3 : vector<1x128xf32> to vector<16x128xf32>
    %5 = arith.addf %2, %4 : vector<16x128xf32>
    %cst_5 = arith.constant 0.000000e+00 : f32
    %6 = vector.broadcast %cst_5 : f32 to vector<16x128xf32>
    %7 = arith.maximumf %5, %6 : vector<16x128xf32>
    %c0_6 = arith.constant 0 : index
    %c0_7 = arith.constant 0 : index
    %8 = vector.load %arg5[%c0_6, %c0_7] : memref<16x128xf32, #tpu.memory_space<vmem>>, vector<16x128xf32>
    tpu.vector_store %arg5[%c0_6, %c0_7], %7 {strides = array<i32>} : memref<16x128xf32, #tpu.memory_space<vmem>>, vector<16x128xf32>,
    return
  }
  func.func @transform_0(%arg0: i32, %arg1: i32) -> (i32, i32) {
    %c0_i32 = arith.constant 0 : i32
    %c0_i32_0 = arith.constant 0 : i32
    return %arg0, %c0_i32 : i32, i32
  }
  func.func @transform_1(%arg0: i32, %arg1: i32) -> (i32, i32) {
    %c0_i32 = arith.constant 0 : i32
    %c0_i32_0 = arith.constant 0 : i32
    return %c0_i32, %arg1 : i32, i32
  }
  func.func @transform_2(%arg0: i32, %arg1: i32) -> (i32, i32) {
    %c0_i32 = arith.constant 0 : i32
    %c0_i32_0 = arith.constant 0 : i32
    return %c0_i32, %arg1 : i32, i32
  }
  func.func @transform_3(%arg0: i32, %arg1: i32) -> (i32, i32) {
    %c0_i32 = arith.constant 0 : i32
    return %arg0, %arg1 : i32, i32
  }
}

module attributes {stable_mosaic.version = 11 : i64} {
  func.func @_mm_bias_add_relu_kernel(%arg0: i32, %arg1: i32, %arg2: memref<16x32xbf16, #tpu.memory_space<vmem>>, %arg3: memref<32x128xbf16, #tpu.memory_space<vmem>>, %arg4: memref<1x128xf32, #tpu.memory_space<vmem>>, %arg5: memref<16x128xf32, #tpu.memory_space<vmem>>, %arg6: memref<16x128xf32, #tpu.memory_space<vmem>>) attributes {dimension_semantics = [#tpu.dimension_semantics<parallel>, #tpu.dimension_semantics<parallel>], iteration_bounds = array<i64: 1, 1>, scalar_prefetch = 0 : i64, scratch_operands = 0 : i64, tpu.core_type = #tpu.core_type<tc>, window_params = [{transform_indices = @transform_0, window_bounds = array<i64: 16, 32>}, {transform_indices = @transform_1, window_bounds = array<i64: 32, 128>}, {transform_indices = @transform_2, window_bounds = array<i64: 1, 128>}, {transform_indices = @transform_3, window_bounds = array<i64: 16, 128>}, {transform_indices = @transform_4, window_bounds = array<i64: 16, 128>}]} {
    %c0 = arith.constant 0 : index
    %c0_0 = arith.constant 0 : index
    %0 = vector.load %arg2[%c0, %c0_0] : memref<16x32xbf16, #tpu.memory_space<vmem>>, vector<16x32xbf16>
    %c0_1 = arith.constant 0 : index
    %c0_2 = arith.constant 0 : index
    %1 = vector.load %arg3[%c0_1, %c0_2] : memref<32x128xbf16, #tpu.memory_space<vmem>>, vector<32x128xbf16>
    %cst = arith.constant dense<0.000000e+00> : vector<16x128xf32>
    %2 = tpu.matmul %0, %1, %cst {dimension_numbers = #tpu.dot_dimension_numbers<[1], [0], [0], [1], [0, 0, 1, 1], [], []>} : vector<16x32xbf16>, vector<32x128xbf16>, vector<16x128xf32> -> vector<16x128xf32>
    %c0_3 = arith.constant 0 : index
    %c0_4 = arith.constant 0 : index
    %3 = vector.load %arg4[%c0_3, %c0_4] : memref<1x128xf32, #tpu.memory_space<vmem>>, vector<1x128xf32>
    %4 = vector.broadcast %3 : vector<1x128xf32> to vector<16x128xf32>
    %5 = arith.addf %2, %4 : vector<16x128xf32>
    %c0_5 = arith.constant 0 : index
    %c0_6 = arith.constant 0 : index
    %6 = vector.load %arg5[%c0_5, %c0_6] : memref<16x128xf32, #tpu.memory_space<vmem>>, vector<16x128xf32>
    %7 = arith.addf %5, %6 : vector<16x128xf32>
    %cst_7 = arith.constant 0.000000e+00 : f32
    %8 = vector.broadcast %cst_7 : f32 to vector<16x128xf32>
    %9 = arith.maximumf %7, %8 : vector<16x128xf32>
    %c0_8 = arith.constant 0 : index
    %c0_9 = arith.constant 0 : index
    %10 = vector.load %arg6[%c0_8, %c0_9] : memref<16x128xf32, #tpu.memory_space<vmem>>, vector<16x128xf32>
    tpu.vector_store %arg6[%c0_8, %c0_9], %9 {strides = array<i32>} : memref<16x128xf32, #tpu.memory_space<vmem>>, vector<16x128xf32>,
    return
  }
  func.func @transform_0(%arg0: i32, %arg1: i32) -> (i32, i32) {
    %c0_i32 = arith.constant 0 : i32
    %c0_i32_0 = arith.constant 0 : i32
    return %arg0, %c0_i32 : i32, i32
  }
  func.func @transform_1(%arg0: i32, %arg1: i32) -> (i32, i32) {
    %c0_i32 = arith.constant 0 : i32
    %c0_i32_0 = arith.constant 0 : i32
    return %c0_i32, %arg1 : i32, i32
  }
  func.func @transform_2(%arg0: i32, %arg1: i32) -> (i32, i32) {
    %c0_i32 = arith.constant 0 : i32
    %c0_i32_0 = arith.constant 0 : i32
    return %c0_i32, %arg1 : i32, i32
  }
  func.func @transform_3(%arg0: i32, %arg1: i32) -> (i32, i32) {
    %c0_i32 = arith.constant 0 : i32
    return %arg0, %arg1 : i32, i32
  }
  func.func @transform_4(%arg0: i32, %arg1: i32) -> (i32, i32) {
    %c0_i32 = arith.constant 0 : i32
    return %arg0, %arg1 : i32, i32
  }
}

module attributes {stable_mosaic.version = 11 : i64} {
  func.func @_mm_bias_kernel(%arg0: i32, %arg1: i32, %arg2: memref<16x64xbf16, #tpu.memory_space<vmem>>, %arg3: memref<64x128xbf16, #tpu.memory_space<vmem>>, %arg4: memref<1x128xf32, #tpu.memory_space<vmem>>, %arg5: memref<16x128xf32, #tpu.memory_space<vmem>>) attributes {dimension_semantics = [#tpu.dimension_semantics<parallel>, #tpu.dimension_semantics<parallel>], iteration_bounds = array<i64: 1, 1>, scalar_prefetch = 0 : i64, scratch_operands = 0 : i64, tpu.core_type = #tpu.core_type<tc>, window_params = [{transform_indices = @transform_0, window_bounds = array<i64: 16, 64>}, {transform_indices = @transform_1, window_bounds = array<i64: 64, 128>}, {transform_indices = @transform_2, window_bounds = array<i64: 1, 128>}, {transform_indices = @transform_3, window_bounds = array<i64: 16, 128>}]} {
    %c0 = arith.constant 0 : index
    %c0_0 = arith.constant 0 : index
    %0 = vector.load %arg2[%c0, %c0_0] : memref<16x64xbf16, #tpu.memory_space<vmem>>, vector<16x64xbf16>
    %c0_1 = arith.constant 0 : index
    %c0_2 = arith.constant 0 : index
    %1 = vector.load %arg3[%c0_1, %c0_2] : memref<64x128xbf16, #tpu.memory_space<vmem>>, vector<64x128xbf16>
    %cst = arith.constant dense<0.000000e+00> : vector<16x128xf32>
    %2 = tpu.matmul %0, %1, %cst {dimension_numbers = #tpu.dot_dimension_numbers<[1], [0], [0], [1], [0, 0, 1, 1], [], []>} : vector<16x64xbf16>, vector<64x128xbf16>, vector<16x128xf32> -> vector<16x128xf32>
    %c0_3 = arith.constant 0 : index
    %c0_4 = arith.constant 0 : index
    %3 = vector.load %arg4[%c0_3, %c0_4] : memref<1x128xf32, #tpu.memory_space<vmem>>, vector<1x128xf32>
    %4 = vector.broadcast %3 : vector<1x128xf32> to vector<16x128xf32>
    %5 = arith.addf %2, %4 : vector<16x128xf32>
    %c0_5 = arith.constant 0 : index
    %c0_6 = arith.constant 0 : index
    %6 = vector.load %arg5[%c0_5, %c0_6] : memref<16x128xf32, #tpu.memory_space<vmem>>, vector<16x128xf32>
    tpu.vector_store %arg5[%c0_5, %c0_6], %5 {strides = array<i32>} : memref<16x128xf32, #tpu.memory_space<vmem>>, vector<16x128xf32>,
    return
  }
  func.func @transform_0(%arg0: i32, %arg1: i32) -> (i32, i32) {
    %c0_i32 = arith.constant 0 : i32
    %c0_i32_0 = arith.constant 0 : i32
    return %arg0, %c0_i32 : i32, i32
  }
  func.func @transform_1(%arg0: i32, %arg1: i32) -> (i32, i32) {
    %c0_i32 = arith.constant 0 : i32
    %c0_i32_0 = arith.constant 0 : i32
    return %c0_i32, %arg1 : i32, i32
  }
  func.func @transform_2(%arg0: i32, %arg1: i32) -> (i32, i32) {
    %c0_i32 = arith.constant 0 : i32
    %c0_i32_0 = arith.constant 0 : i32
    return %c0_i32, %arg1 : i32, i32
  }
  func.func @transform_3(%arg0: i32, %arg1: i32) -> (i32, i32) {
    %c0_i32 = arith.constant 0 : i32
    return %arg0, %arg1 : i32, i32
  }
}

module attributes {stable_mosaic.version = 11 : i64} {
  func.func @_mm_bias_relu_kernel(%arg0: i32, %arg1: i32, %arg2: memref<16x128xbf16, #tpu.memory_space<vmem>>, %arg3: memref<128x128xbf16, #tpu.memory_space<vmem>>, %arg4: memref<1x128xf32, #tpu.memory_space<vmem>>, %arg5: memref<16x128xf32, #tpu.memory_space<vmem>>) attributes {dimension_semantics = [#tpu.dimension_semantics<parallel>, #tpu.dimension_semantics<parallel>], iteration_bounds = array<i64: 1, 1>, scalar_prefetch = 0 : i64, scratch_operands = 0 : i64, tpu.core_type = #tpu.core_type<tc>, window_params = [{transform_indices = @transform_0, window_bounds = array<i64: 16, 128>}, {transform_indices = @transform_1, window_bounds = array<i64: 128, 128>}, {transform_indices = @transform_2, window_bounds = array<i64: 1, 128>}, {transform_indices = @transform_3, window_bounds = array<i64: 16, 128>}]} {
    %c0 = arith.constant 0 : index
    %c0_0 = arith.constant 0 : index
    %0 = vector.load %arg2[%c0, %c0_0] : memref<16x128xbf16, #tpu.memory_space<vmem>>, vector<16x128xbf16>
    %c0_1 = arith.constant 0 : index
    %c0_2 = arith.constant 0 : index
    %1 = vector.load %arg3[%c0_1, %c0_2] : memref<128x128xbf16, #tpu.memory_space<vmem>>, vector<128x128xbf16>
    %cst = arith.constant dense<0.000000e+00> : vector<16x128xf32>
    %2 = tpu.matmul %0, %1, %cst {dimension_numbers = #tpu.dot_dimension_numbers<[1], [0], [0], [1], [0, 0, 1, 1], [], []>} : vector<16x128xbf16>, vector<128x128xbf16>, vector<16x128xf32> -> vector<16x128xf32>
    %c0_3 = arith.constant 0 : index
    %c0_4 = arith.constant 0 : index
    %3 = vector.load %arg4[%c0_3, %c0_4] : memref<1x128xf32, #tpu.memory_space<vmem>>, vector<1x128xf32>
    %4 = vector.broadcast %3 : vector<1x128xf32> to vector<16x128xf32>
    %5 = arith.addf %2, %4 : vector<16x128xf32>
    %cst_5 = arith.constant 0.000000e+00 : f32
    %6 = vector.broadcast %cst_5 : f32 to vector<16x128xf32>
    %7 = arith.maximumf %5, %6 : vector<16x128xf32>
    %c0_6 = arith.constant 0 : index
    %c0_7 = arith.constant 0 : index
    %8 = vector.load %arg5[%c0_6, %c0_7] : memref<16x128xf32, #tpu.memory_space<vmem>>, vector<16x128xf32>
    tpu.vector_store %arg5[%c0_6, %c0_7], %7 {strides = array<i32>} : memref<16x128xf32, #tpu.memory_space<vmem>>, vector<16x128xf32>,
    return
  }
  func.func @transform_0(%arg0: i32, %arg1: i32) -> (i32, i32) {
    %c0_i32 = arith.constant 0 : i32
    %c0_i32_0 = arith.constant 0 : i32
    return %arg0, %c0_i32 : i32, i32
  }
  func.func @transform_1(%arg0: i32, %arg1: i32) -> (i32, i32) {
    %c0_i32 = arith.constant 0 : i32
    %c0_i32_0 = arith.constant 0 : i32
    return %c0_i32, %arg1 : i32, i32
  }
  func.func @transform_2(%arg0: i32, %arg1: i32) -> (i32, i32) {
    %c0_i32 = arith.constant 0 : i32
    %c0_i32_0 = arith.constant 0 : i32
    return %c0_i32, %arg1 : i32, i32
  }
  func.func @transform_3(%arg0: i32, %arg1: i32) -> (i32, i32) {
    %c0_i32 = arith.constant 0 : i32
    return %arg0, %arg1 : i32, i32
  }
}

module attributes {stable_mosaic.version = 11 : i64} {
  func.func @_mm_bias_kernel(%arg0: i32, %arg1: i32, %arg2: memref<16x128xbf16, #tpu.memory_space<vmem>>, %arg3: memref<128x256xbf16, #tpu.memory_space<vmem>>, %arg4: memref<1x256xf32, #tpu.memory_space<vmem>>, %arg5: memref<16x256xf32, #tpu.memory_space<vmem>>) attributes {dimension_semantics = [#tpu.dimension_semantics<parallel>, #tpu.dimension_semantics<parallel>], iteration_bounds = array<i64: 1, 1>, scalar_prefetch = 0 : i64, scratch_operands = 0 : i64, tpu.core_type = #tpu.core_type<tc>, window_params = [{transform_indices = @transform_0, window_bounds = array<i64: 16, 128>}, {transform_indices = @transform_1, window_bounds = array<i64: 128, 256>}, {transform_indices = @transform_2, window_bounds = array<i64: 1, 256>}, {transform_indices = @transform_3, window_bounds = array<i64: 16, 256>}]} {
    %c0 = arith.constant 0 : index
    %c0_0 = arith.constant 0 : index
    %0 = vector.load %arg2[%c0, %c0_0] : memref<16x128xbf16, #tpu.memory_space<vmem>>, vector<16x128xbf16>
    %c0_1 = arith.constant 0 : index
    %c0_2 = arith.constant 0 : index
    %1 = vector.load %arg3[%c0_1, %c0_2] : memref<128x256xbf16, #tpu.memory_space<vmem>>, vector<128x256xbf16>
    %cst = arith.constant dense<0.000000e+00> : vector<16x256xf32>
    %2 = tpu.matmul %0, %1, %cst {dimension_numbers = #tpu.dot_dimension_numbers<[1], [0], [0], [1], [0, 0, 1, 1], [], []>} : vector<16x128xbf16>, vector<128x256xbf16>, vector<16x256xf32> -> vector<16x256xf32>
    %c0_3 = arith.constant 0 : index
    %c0_4 = arith.constant 0 : index
    %3 = vector.load %arg4[%c0_3, %c0_4] : memref<1x256xf32, #tpu.memory_space<vmem>>, vector<1x256xf32>
    %4 = vector.broadcast %3 : vector<1x256xf32> to vector<16x256xf32>
    %5 = arith.addf %2, %4 : vector<16x256xf32>
    %c0_5 = arith.constant 0 : index
    %c0_6 = arith.constant 0 : index
    %6 = vector.load %arg5[%c0_5, %c0_6] : memref<16x256xf32, #tpu.memory_space<vmem>>, vector<16x256xf32>
    tpu.vector_store %arg5[%c0_5, %c0_6], %5 {strides = array<i32>} : memref<16x256xf32, #tpu.memory_space<vmem>>, vector<16x256xf32>,
    return
  }
  func.func @transform_0(%arg0: i32, %arg1: i32) -> (i32, i32) {
    %c0_i32 = arith.constant 0 : i32
    %c0_i32_0 = arith.constant 0 : i32
    return %arg0, %c0_i32 : i32, i32
  }
  func.func @transform_1(%arg0: i32, %arg1: i32) -> (i32, i32) {
    %c0_i32 = arith.constant 0 : i32
    %c0_i32_0 = arith.constant 0 : i32
    return %c0_i32, %arg1 : i32, i32
  }
  func.func @transform_2(%arg0: i32, %arg1: i32) -> (i32, i32) {
    %c0_i32 = arith.constant 0 : i32
    %c0_i32_0 = arith.constant 0 : i32
    return %c0_i32, %arg1 : i32, i32
  }
  func.func @transform_3(%arg0: i32, %arg1: i32) -> (i32, i32) {
    %c0_i32 = arith.constant 0 : i32
    return %arg0, %arg1 : i32, i32
  }
}

module attributes {stable_mosaic.version = 11 : i64} {
  func.func @_mm_bias_relu_kernel(%arg0: i32, %arg1: i32, %arg2: memref<16x576xbf16, #tpu.memory_space<vmem>>, %arg3: memref<576x128xbf16, #tpu.memory_space<vmem>>, %arg4: memref<1x128xf32, #tpu.memory_space<vmem>>, %arg5: memref<16x128xf32, #tpu.memory_space<vmem>>) attributes {dimension_semantics = [#tpu.dimension_semantics<parallel>, #tpu.dimension_semantics<parallel>], iteration_bounds = array<i64: 1, 1>, scalar_prefetch = 0 : i64, scratch_operands = 0 : i64, tpu.core_type = #tpu.core_type<tc>, window_params = [{transform_indices = @transform_0, window_bounds = array<i64: 16, 576>}, {transform_indices = @transform_1, window_bounds = array<i64: 576, 128>}, {transform_indices = @transform_2, window_bounds = array<i64: 1, 128>}, {transform_indices = @transform_3, window_bounds = array<i64: 16, 128>}]} {
    %c0 = arith.constant 0 : index
    %c0_0 = arith.constant 0 : index
    %0 = vector.load %arg2[%c0, %c0_0] : memref<16x576xbf16, #tpu.memory_space<vmem>>, vector<16x576xbf16>
    %c0_1 = arith.constant 0 : index
    %c0_2 = arith.constant 0 : index
    %1 = vector.load %arg3[%c0_1, %c0_2] : memref<576x128xbf16, #tpu.memory_space<vmem>>, vector<576x128xbf16>
    %cst = arith.constant dense<0.000000e+00> : vector<16x128xf32>
    %2 = tpu.matmul %0, %1, %cst {dimension_numbers = #tpu.dot_dimension_numbers<[1], [0], [0], [1], [0, 0, 1, 1], [], []>} : vector<16x576xbf16>, vector<576x128xbf16>, vector<16x128xf32> -> vector<16x128xf32>
    %c0_3 = arith.constant 0 : index
    %c0_4 = arith.constant 0 : index
    %3 = vector.load %arg4[%c0_3, %c0_4] : memref<1x128xf32, #tpu.memory_space<vmem>>, vector<1x128xf32>
    %4 = vector.broadcast %3 : vector<1x128xf32> to vector<16x128xf32>
    %5 = arith.addf %2, %4 : vector<16x128xf32>
    %cst_5 = arith.constant 0.000000e+00 : f32
    %6 = vector.broadcast %cst_5 : f32 to vector<16x128xf32>
    %7 = arith.maximumf %5, %6 : vector<16x128xf32>
    %c0_6 = arith.constant 0 : index
    %c0_7 = arith.constant 0 : index
    %8 = vector.load %arg5[%c0_6, %c0_7] : memref<16x128xf32, #tpu.memory_space<vmem>>, vector<16x128xf32>
    tpu.vector_store %arg5[%c0_6, %c0_7], %7 {strides = array<i32>} : memref<16x128xf32, #tpu.memory_space<vmem>>, vector<16x128xf32>,
    return
  }
  func.func @transform_0(%arg0: i32, %arg1: i32) -> (i32, i32) {
    %c0_i32 = arith.constant 0 : i32
    %c0_i32_0 = arith.constant 0 : i32
    return %arg0, %c0_i32 : i32, i32
  }
  func.func @transform_1(%arg0: i32, %arg1: i32) -> (i32, i32) {
    %c0_i32 = arith.constant 0 : i32
    %c0_i32_0 = arith.constant 0 : i32
    return %c0_i32, %arg1 : i32, i32
  }
  func.func @transform_2(%arg0: i32, %arg1: i32) -> (i32, i32) {
    %c0_i32 = arith.constant 0 : i32
    %c0_i32_0 = arith.constant 0 : i32
    return %c0_i32, %arg1 : i32, i32
  }
  func.func @transform_3(%arg0: i32, %arg1: i32) -> (i32, i32) {
    %c0_i32 = arith.constant 0 : i32
    return %arg0, %arg1 : i32, i32
  }
}

module attributes {stable_mosaic.version = 11 : i64} {
  func.func @_mm_bias_add_relu_kernel(%arg0: i32, %arg1: i32, %arg2: memref<16x64xbf16, #tpu.memory_space<vmem>>, %arg3: memref<64x256xbf16, #tpu.memory_space<vmem>>, %arg4: memref<1x256xf32, #tpu.memory_space<vmem>>, %arg5: memref<16x256xf32, #tpu.memory_space<vmem>>, %arg6: memref<16x256xf32, #tpu.memory_space<vmem>>) attributes {dimension_semantics = [#tpu.dimension_semantics<parallel>, #tpu.dimension_semantics<parallel>], iteration_bounds = array<i64: 1, 1>, scalar_prefetch = 0 : i64, scratch_operands = 0 : i64, tpu.core_type = #tpu.core_type<tc>, window_params = [{transform_indices = @transform_0, window_bounds = array<i64: 16, 64>}, {transform_indices = @transform_1, window_bounds = array<i64: 64, 256>}, {transform_indices = @transform_2, window_bounds = array<i64: 1, 256>}, {transform_indices = @transform_3, window_bounds = array<i64: 16, 256>}, {transform_indices = @transform_4, window_bounds = array<i64: 16, 256>}]} {
    %c0 = arith.constant 0 : index
    %c0_0 = arith.constant 0 : index
    %0 = vector.load %arg2[%c0, %c0_0] : memref<16x64xbf16, #tpu.memory_space<vmem>>, vector<16x64xbf16>
    %c0_1 = arith.constant 0 : index
    %c0_2 = arith.constant 0 : index
    %1 = vector.load %arg3[%c0_1, %c0_2] : memref<64x256xbf16, #tpu.memory_space<vmem>>, vector<64x256xbf16>
    %cst = arith.constant dense<0.000000e+00> : vector<16x256xf32>
    %2 = tpu.matmul %0, %1, %cst {dimension_numbers = #tpu.dot_dimension_numbers<[1], [0], [0], [1], [0, 0, 1, 1], [], []>} : vector<16x64xbf16>, vector<64x256xbf16>, vector<16x256xf32> -> vector<16x256xf32>
    %c0_3 = arith.constant 0 : index
    %c0_4 = arith.constant 0 : index
    %3 = vector.load %arg4[%c0_3, %c0_4] : memref<1x256xf32, #tpu.memory_space<vmem>>, vector<1x256xf32>
    %4 = vector.broadcast %3 : vector<1x256xf32> to vector<16x256xf32>
    %5 = arith.addf %2, %4 : vector<16x256xf32>
    %c0_5 = arith.constant 0 : index
    %c0_6 = arith.constant 0 : index
    %6 = vector.load %arg5[%c0_5, %c0_6] : memref<16x256xf32, #tpu.memory_space<vmem>>, vector<16x256xf32>
    %7 = arith.addf %5, %6 : vector<16x256xf32>
    %cst_7 = arith.constant 0.000000e+00 : f32
    %8 = vector.broadcast %cst_7 : f32 to vector<16x256xf32>
    %9 = arith.maximumf %7, %8 : vector<16x256xf32>
    %c0_8 = arith.constant 0 : index
    %c0_9 = arith.constant 0 : index
    %10 = vector.load %arg6[%c0_8, %c0_9] : memref<16x256xf32, #tpu.memory_space<vmem>>, vector<16x256xf32>
    tpu.vector_store %arg6[%c0_8, %c0_9], %9 {strides = array<i32>} : memref<16x256xf32, #tpu.memory_space<vmem>>, vector<16x256xf32>,
    return
  }
  func.func @transform_0(%arg0: i32, %arg1: i32) -> (i32, i32) {
    %c0_i32 = arith.constant 0 : i32
    %c0_i32_0 = arith.constant 0 : i32
    return %arg0, %c0_i32 : i32, i32
  }
  func.func @transform_1(%arg0: i32, %arg1: i32) -> (i32, i32) {
    %c0_i32 = arith.constant 0 : i32
    %c0_i32_0 = arith.constant 0 : i32
    return %c0_i32, %arg1 : i32, i32
  }
  func.func @transform_2(%arg0: i32, %arg1: i32) -> (i32, i32) {
    %c0_i32 = arith.constant 0 : i32
    %c0_i32_0 = arith.constant 0 : i32
    return %c0_i32, %arg1 : i32, i32
  }
  func.func @transform_3(%arg0: i32, %arg1: i32) -> (i32, i32) {
    %c0_i32 = arith.constant 0 : i32
    return %arg0, %arg1 : i32, i32
  }
  func.func @transform_4(%arg0: i32, %arg1: i32) -> (i32, i32) {
    %c0_i32 = arith.constant 0 : i32
    return %arg0, %arg1 : i32, i32
  }
}

module attributes {stable_mosaic.version = 11 : i64} {
  func.func @_mm_bias_relu_kernel(%arg0: i32, %arg1: i32, %arg2: memref<16x256xbf16, #tpu.memory_space<vmem>>, %arg3: memref<256x128xbf16, #tpu.memory_space<vmem>>, %arg4: memref<1x128xf32, #tpu.memory_space<vmem>>, %arg5: memref<16x128xf32, #tpu.memory_space<vmem>>) attributes {dimension_semantics = [#tpu.dimension_semantics<parallel>, #tpu.dimension_semantics<parallel>], iteration_bounds = array<i64: 1, 1>, scalar_prefetch = 0 : i64, scratch_operands = 0 : i64, tpu.core_type = #tpu.core_type<tc>, window_params = [{transform_indices = @transform_0, window_bounds = array<i64: 16, 256>}, {transform_indices = @transform_1, window_bounds = array<i64: 256, 128>}, {transform_indices = @transform_2, window_bounds = array<i64: 1, 128>}, {transform_indices = @transform_3, window_bounds = array<i64: 16, 128>}]} {
    %c0 = arith.constant 0 : index
    %c0_0 = arith.constant 0 : index
    %0 = vector.load %arg2[%c0, %c0_0] : memref<16x256xbf16, #tpu.memory_space<vmem>>, vector<16x256xbf16>
    %c0_1 = arith.constant 0 : index
    %c0_2 = arith.constant 0 : index
    %1 = vector.load %arg3[%c0_1, %c0_2] : memref<256x128xbf16, #tpu.memory_space<vmem>>, vector<256x128xbf16>
    %cst = arith.constant dense<0.000000e+00> : vector<16x128xf32>
    %2 = tpu.matmul %0, %1, %cst {dimension_numbers = #tpu.dot_dimension_numbers<[1], [0], [0], [1], [0, 0, 1, 1], [], []>} : vector<16x256xbf16>, vector<256x128xbf16>, vector<16x128xf32> -> vector<16x128xf32>
    %c0_3 = arith.constant 0 : index
    %c0_4 = arith.constant 0 : index
    %3 = vector.load %arg4[%c0_3, %c0_4] : memref<1x128xf32, #tpu.memory_space<vmem>>, vector<1x128xf32>
    %4 = vector.broadcast %3 : vector<1x128xf32> to vector<16x128xf32>
    %5 = arith.addf %2, %4 : vector<16x128xf32>
    %cst_5 = arith.constant 0.000000e+00 : f32
    %6 = vector.broadcast %cst_5 : f32 to vector<16x128xf32>
    %7 = arith.maximumf %5, %6 : vector<16x128xf32>
    %c0_6 = arith.constant 0 : index
    %c0_7 = arith.constant 0 : index
    %8 = vector.load %arg5[%c0_6, %c0_7] : memref<16x128xf32, #tpu.memory_space<vmem>>, vector<16x128xf32>
    tpu.vector_store %arg5[%c0_6, %c0_7], %7 {strides = array<i32>} : memref<16x128xf32, #tpu.memory_space<vmem>>, vector<16x128xf32>,
    return
  }
  func.func @transform_0(%arg0: i32, %arg1: i32) -> (i32, i32) {
    %c0_i32 = arith.constant 0 : i32
    %c0_i32_0 = arith.constant 0 : i32
    return %arg0, %c0_i32 : i32, i32
  }
  func.func @transform_1(%arg0: i32, %arg1: i32) -> (i32, i32) {
    %c0_i32 = arith.constant 0 : i32
    %c0_i32_0 = arith.constant 0 : i32
    return %c0_i32, %arg1 : i32, i32
  }
  func.func @transform_2(%arg0: i32, %arg1: i32) -> (i32, i32) {
    %c0_i32 = arith.constant 0 : i32
    %c0_i32_0 = arith.constant 0 : i32
    return %c0_i32, %arg1 : i32, i32
  }
  func.func @transform_3(%arg0: i32, %arg1: i32) -> (i32, i32) {
    %c0_i32 = arith.constant 0 : i32
    return %arg0, %arg1 : i32, i32
  }
}

module attributes {stable_mosaic.version = 11 : i64} {
  func.func @_avgpool_kernel(%arg0: memref<1x2x256xf32, #tpu.memory_space<vmem>>, %arg1: memref<2x256xf32, #tpu.memory_space<vmem>>) attributes {dimension_semantics = [], scalar_prefetch = 0 : i64, scratch_operands = 0 : i64, tpu.core_type = #tpu.core_type<tc>} {
    %c0 = arith.constant 0 : index
    %c0_0 = arith.constant 0 : index
    %c0_1 = arith.constant 0 : index
    %0 = vector.load %arg0[%c0, %c0_0, %c0_1] : memref<1x2x256xf32, #tpu.memory_space<vmem>>, vector<1x2x256xf32>
    %cst = arith.constant dense<0.000000e+00> : vector<2x256xf32>
    %1 = vector.multi_reduction <add>, %0, %cst [0] : vector<1x2x256xf32> to vector<2x256xf32>
    %cst_2 = arith.constant 1.000000e+00 : f32
    %2 = vector.broadcast %cst_2 : f32 to vector<2x256xf32>
    %3 = arith.divf %1, %2 : vector<2x256xf32>
    %c0_3 = arith.constant 0 : index
    %c0_4 = arith.constant 0 : index
    %4 = vector.load %arg1[%c0_3, %c0_4] : memref<2x256xf32, #tpu.memory_space<vmem>>, vector<2x256xf32>
    tpu.vector_store %arg1[%c0_3, %c0_4], %3 {strides = array<i32>} : memref<2x256xf32, #tpu.memory_space<vmem>>, vector<2x256xf32>,
    return
  }
}

module attributes {stable_mosaic.version = 11 : i64} {
  func.func @_mm_bias_kernel(%arg0: i32, %arg1: i32, %arg2: memref<16x256xbf16, #tpu.memory_space<vmem>>, %arg3: memref<256x128xbf16, #tpu.memory_space<vmem>>, %arg4: memref<1x128xf32, #tpu.memory_space<vmem>>, %arg5: memref<16x128xf32, #tpu.memory_space<vmem>>) attributes {dimension_semantics = [#tpu.dimension_semantics<parallel>, #tpu.dimension_semantics<parallel>], iteration_bounds = array<i64: 1, 1>, scalar_prefetch = 0 : i64, scratch_operands = 0 : i64, tpu.core_type = #tpu.core_type<tc>, window_params = [{transform_indices = @transform_0, window_bounds = array<i64: 16, 256>}, {transform_indices = @transform_1, window_bounds = array<i64: 256, 128>}, {transform_indices = @transform_2, window_bounds = array<i64: 1, 128>}, {transform_indices = @transform_3, window_bounds = array<i64: 16, 128>}]} {
    %c0 = arith.constant 0 : index
    %c0_0 = arith.constant 0 : index
    %0 = vector.load %arg2[%c0, %c0_0] : memref<16x256xbf16, #tpu.memory_space<vmem>>, vector<16x256xbf16>
    %c0_1 = arith.constant 0 : index
    %c0_2 = arith.constant 0 : index
    %1 = vector.load %arg3[%c0_1, %c0_2] : memref<256x128xbf16, #tpu.memory_space<vmem>>, vector<256x128xbf16>
    %cst = arith.constant dense<0.000000e+00> : vector<16x128xf32>
    %2 = tpu.matmul %0, %1, %cst {dimension_numbers = #tpu.dot_dimension_numbers<[1], [0], [0], [1], [0, 0, 1, 1], [], []>} : vector<16x256xbf16>, vector<256x128xbf16>, vector<16x128xf32> -> vector<16x128xf32>
    %c0_3 = arith.constant 0 : index
    %c0_4 = arith.constant 0 : index
    %3 = vector.load %arg4[%c0_3, %c0_4] : memref<1x128xf32, #tpu.memory_space<vmem>>, vector<1x128xf32>
    %4 = vector.broadcast %3 : vector<1x128xf32> to vector<16x128xf32>
    %5 = arith.addf %2, %4 : vector<16x128xf32>
    %c0_5 = arith.constant 0 : index
    %c0_6 = arith.constant 0 : index
    %6 = vector.load %arg5[%c0_5, %c0_6] : memref<16x128xf32, #tpu.memory_space<vmem>>, vector<16x128xf32>
    tpu.vector_store %arg5[%c0_5, %c0_6], %5 {strides = array<i32>} : memref<16x128xf32, #tpu.memory_space<vmem>>, vector<16x128xf32>,
    return
  }
  func.func @transform_0(%arg0: i32, %arg1: i32) -> (i32, i32) {
    %c0_i32 = arith.constant 0 : i32
    %c0_i32_0 = arith.constant 0 : i32
    return %arg0, %c0_i32 : i32, i32
  }
  func.func @transform_1(%arg0: i32, %arg1: i32) -> (i32, i32) {
    %c0_i32 = arith.constant 0 : i32
    %c0_i32_0 = arith.constant 0 : i32
    return %c0_i32, %arg1 : i32, i32
  }
  func.func @transform_2(%arg0: i32, %arg1: i32) -> (i32, i32) {
    %c0_i32 = arith.constant 0 : i32
    %c0_i32_0 = arith.constant 0 : i32
    return %c0_i32, %arg1 : i32, i32
  }
  func.func @transform_3(%arg0: i32, %arg1: i32) -> (i32, i32) {
    %c0_i32 = arith.constant 0 : i32
    return %arg0, %arg1 : i32, i32
  }
}

</mosaic_0001>

<bundles_post_ra>
// kernel: resnet_forward.20
= control target key start
LH: loop header
LB: loop body
LE: loop exit
PB: predicated region body
PF: predicated region fallthrough
CT: control target
= control target key end

     0   :  { %s1095_s12 = smov 0   ;;  %s1097_s13 = smov 0   ;;  %s1286_s0 = inlined_call_operand.vmem [shape: bf16[512,147], index: 0, kind: input, shape index: {}]   ;;  %s1287_s1 = inlined_call_operand.vmem [shape: bf16[147,128], index: 1, kind: input, shape index: {}]   ;;  %s1288_s2 = inlined_call_operand.vmem [shape: f32[1,128], index: 2, kind: input, shape index: {}]   ;;  %s1289_s3 = inlined_call_operand.vmem [shape: f32[512,128], index: 3, kind: output, shape index: {}]  }
   0x1   :  { %s1099_s14 = smov 0  }
   0x2 LB: > { %s25_s15 = sadd.s32 1, %s1067_s13  ;;  %p877_p0 = scmp.ge.s32.totalorder %s1071_s14, 1  ;;  %s1071_s14 = sphi %s1099_s14, %s13_s14   ;;  %s1067_s13 = sphi %s1097_s13, %s1291_s13   ;;  %s1063_s12 = sphi %s1095_s12, %s1290_s12  }
   0x3   : > { %p27_p1 = scmp.ge.s32.totalorder %s25_s15, 2  ;;  %p170_p2 = scmp.lt.s32.totalorder %s1071_s14, 3 }
   0x5   : > { %s1293_s15 = smov (%p27_p1, %s25_s15), 0  ;;  %p171_p3 = pnand %p877_p0, %p170_p2 }
   0x6   : > { %v991_v0 = vld [vmem:[%s1287_s1] sm:$0xff] (!%p171_p3)   ;;  %v1073_v1 = vmov (!%p171_p3), 0   ;;  %v992_v2 = vld [vmem:[%s1287_s1 + $0x8] sm:$0xff] (!%p171_p3)   ;;  %v993_v3 = vld [vmem:[%s1287_s1 + $0x10] sm:$0xff] (!%p171_p3)   ;;  %s878_s22 = sshll.u32 (!%p171_p3), %s1063_s12, 5  ;;  %vm488_vm0 = vcmask (!%p171_p3), 154624  }
   0x7   : > { %174 = sbr.rel (%p171_p3) target bundleno = 322 (0x142), region = 32  ;;  %544 = vmatprep.subr.bf16.mxu0 (!%p171_p3), %v1073_v1  ;;  %945 = vmatprep.subr.bf16.mxu1 (!%p171_p3), %v1073_v1  ;;  %p206_p4 = scmp.lt.s32.totalorder (!%p171_p3), %s878_s22, 63  ;;  %v994_v4 = vld [vmem:[%s1287_s1 + $0x18] sm:$0xff] (!%p171_p3)   ;;  %v995_v5 = vld [vmem:[%s1287_s1 + $0x20] sm:$0xff] (!%p171_p3)   ;;  %v996_v8 = vld [vmem:[%s1287_s1 + $0x28] sm:$0xff] (!%p171_p3)   ;;  %vm537_vm1 = vcmask (!%p171_p3), 1040384  }
   0x8   : > { %545 = vmatpush1.bf16.msra.mxu0 (!%p171_p3), %v991_v0  ;;  %955 = vmatpush1.bf16.msra.mxu1 (!%p171_p3), %v991_v0  ;;  %v997_v9 = vld [vmem:[%s1287_s1 + $0x30] sm:$0xff] (!%p171_p3)   ;;  %v998_v10 = vld [vmem:[%s1287_s1 + $0x38] sm:$0xff] (!%p171_p3)   ;;  %vm538_vm2 = vcmask (!%p171_p3), 1041408   ;;  %v1074_v11 = vmov (!%p171_p3), 65535   ;;  %v999_v13 = vld [vmem:[%s1287_s1 + $0x40] sm:$0xff] (!%p171_p3)  }
   0x9   : > { %546 = vmatprep.subr.bf16.mxu0 (!%p171_p3), %v1073_v1  ;;  %946 = vmatprep.subr.bf16.mxu1 (!%p171_p3), %v1073_v1  ;;  %v539_v12 = vsel (!%p171_p3), %vm537_vm1, 4294967295, %v1074_v11  ;;  %v1000_v14 = vld [vmem:[%s1287_s1 + $0x48] ss:$0 sps:$4 sm:$0x33] (!%p171_p3)   ;;  %v1204_v47 = vld [vmem:[%s1288_s2] ss:$0 sm:$0xff] (!%p171_p3) }
   0xa   : > { %v540_v15 = vsel (!%p171_p3), %vm538_vm2, %v539_v12, 0 }
   0xb   : > { %v542_v16 = vand.u32 (!%p171_p3), %v1000_v14, %v540_v15 }
   0xc   : > { %547 = vmatpush1.bf16.msra.mxu0 (!%p171_p3), %v992_v2  ;;  %956 = vmatpush1.bf16.msra.mxu1 (!%p171_p3), %v992_v2 }
   0xd   : > { %548 = vmatprep.subr.bf16.mxu0 (!%p171_p3), %v1073_v1  ;;  %947 = vmatprep.subr.bf16.mxu1 (!%p171_p3), %v1073_v1 }
   0xe   : > { %s1295_s22 = smov (!%p206_p4, %s878_s22), 63 }
   0xf   : > { %s944_s25 = sshll.u32 %s1295_s22, 3 }
  0x10   : > { %549 = vmatpush1.bf16.msra.mxu0 %v993_v3  ;;  %957 = vmatpush1.bf16.msra.mxu1 %v993_v3  ;;  %s1133_s28 = scalar_lea.vmem %s1286_s0, %s944_s25  ;;  %s1213_s21 = scalar_lea.vmem %s1289_s3, %s944_s25 }
  0x11   : > { %550 = vmatprep.subr.bf16.mxu0 %v1073_v1  ;;  %948 = vmatprep.subr.bf16.mxu1 %v1073_v1  ;;  %v1003_v6 = vld [vmem:[%s1133_s28 + $0x4] ss:$8 sps:$4 sm:$0xff]   ;;  %v1001_v17 = vld [vmem:[%s1133_s28] ss:$8 sps:$4 sm:$0xff]   ;;  %v1007_v19 = vld [vmem:[%s1133_s28 + $0x14] ss:$8 sps:$4 sm:$0xff]  }
  0x12   : > { %v1006_v7 = vld [vmem:[%s1133_s28 + $0x84] ss:$8 sps:$4 sm:$0xff]   ;;  %926 = vmatprep.mubr.msk.bf16.mxu0 %vm488_vm0, %v1003_v6  ;;  %v1004_v18 = vld [vmem:[%s1133_s28 + $0x80] ss:$8 sps:$4 sm:$0xff]   ;;  %v1009_v20 = vld [vmem:[%s1133_s28 + $0x94] ss:$8 sps:$4 sm:$0xff]  }
  0x13   : > { %934 = vmatprep.mubr.msk.bf16.mxu1 %vm488_vm0, %v1006_v7  ;;  %v1011_v21 = vld [vmem:[%s1133_s28 + $0x10] ss:$8 sps:$4 sm:$0xff]   ;;  %v1013_v23 = vld [vmem:[%s1133_s28 + $0x24] ss:$8 sps:$4 sm:$0xff]   ;;  %v1017_v25 = vld [vmem:[%s1133_s28 + $0x20] ss:$8 sps:$4 sm:$0xff]  }
  0x14   : > { %551 = vmatpush1.bf16.msra.mxu0 %v994_v4  ;;  %958 = vmatpush1.bf16.msra.mxu1 %v994_v4  ;;  %v1012_v22 = vld [vmem:[%s1133_s28 + $0x90] ss:$8 sps:$4 sm:$0xff]   ;;  %v1015_v24 = vld [vmem:[%s1133_s28 + $0xa4] ss:$8 sps:$4 sm:$0xff]   ;;  %v1018_v26 = vld [vmem:[%s1133_s28 + $0xa0] ss:$8 sps:$4 sm:$0xff]  }
  0x15   : > { %552 = vmatprep.subr.bf16.mxu0 %v1073_v1  ;;  %949 = vmatprep.subr.bf16.mxu1 %v1073_v1  ;;  %v1019_v27 = vld [vmem:[%s1133_s28 + $0x34] ss:$8 sps:$4 sm:$0xff]   ;;  %v1023_v29 = vld [vmem:[%s1133_s28 + $0x30] ss:$8 sps:$4 sm:$0xff]   ;;  %v1025_v31 = vld [vmem:[%s1133_s28 + $0x44] ss:$8 sps:$4 sm:$0xff]  }
  0x16   : > { %v1021_v28 = vld [vmem:[%s1133_s28 + $0xb4] ss:$8 sps:$4 sm:$0xff]   ;;  %v1024_v30 = vld [vmem:[%s1133_s28 + $0xb0] ss:$8 sps:$4 sm:$0xff]   ;;  %v1027_v32 = vld [vmem:[%s1133_s28 + $0xc4] ss:$8 sps:$4 sm:$0xff]  }
  0x17   : > { %v1029_v33 = vld [vmem:[%s1133_s28 + $0x40] ss:$8 sps:$4 sm:$0xff]   ;;  %v1031_v35 = vld [vmem:[%s1133_s28 + $0x54] ss:$8 sps:$4 sm:$0xff]   ;;  %v1035_v37 = vld [vmem:[%s1133_s28 + $0x50] ss:$8 sps:$4 sm:$0xff]  }
  0x18   : > { %553 = vmatpush1.bf16.msra.mxu0 %v995_v5  ;;  %959 = vmatpush1.bf16.msra.mxu1 %v995_v5  ;;  %v1030_v34 = vld [vmem:[%s1133_s28 + $0xc0] ss:$8 sps:$4 sm:$0xff]   ;;  %v1033_v36 = vld [vmem:[%s1133_s28 + $0xd4] ss:$8 sps:$4 sm:$0xff]   ;;  %v1036_v38 = vld [vmem:[%s1133_s28 + $0xd0] ss:$8 sps:$4 sm:$0xff]  }
  0x19   : > { %554 = vmatprep.subr.bf16.mxu0 %v1073_v1  ;;  %950 = vmatprep.subr.bf16.mxu1 %v1073_v1  ;;  %v1037_v39 = vld [vmem:[%s1133_s28 + $0x64] ss:$8 sps:$4 sm:$0xff]   ;;  %v1041_v41 = vld [vmem:[%s1133_s28 + $0x60] ss:$8 sps:$4 sm:$0xff]   ;;  %v1043_v43 = vld [vmem:[%s1133_s28 + $0x74] ss:$8 sps:$4 sm:$0xff]  }
  0x1a   : > { %v1039_v40 = vld [vmem:[%s1133_s28 + $0xe4] ss:$8 sps:$4 sm:$0xff]   ;;  %v1042_v42 = vld [vmem:[%s1133_s28 + $0xe0] ss:$8 sps:$4 sm:$0xff]   ;;  %v1045_v44 = vld [vmem:[%s1133_s28 + $0xf4] ss:$8 sps:$4 sm:$0xff]  }
  0x1b   : > { %v1047_v45 = vld [vmem:[%s1133_s28 + $0x70] ss:$8 sps:$4 sm:$0xff]  }
  0x1c   : > { %555 = vmatpush1.bf16.msra.mxu0 %v996_v8  ;;  %960 = vmatpush1.bf16.msra.mxu1 %v996_v8  ;;  %v1048_v46 = vld [vmem:[%s1133_s28 + $0xf0] ss:$8 sps:$4 sm:$0xff]  }
  0x1d   : > { %556 = vmatprep.subr.bf16.mxu0 %v1073_v1  ;;  %951 = vmatprep.subr.bf16.mxu1 %v1073_v1 }
  0x20   : > { %557 = vmatpush1.bf16.msra.mxu0 %v997_v9  ;;  %961 = vmatpush1.bf16.msra.mxu1 %v997_v9 }
  0x21   : > { %558 = vmatprep.subr.bf16.mxu0 %v1073_v1  ;;  %952 = vmatprep.subr.bf16.mxu1 %v1073_v1 }
  0x24   : > { %559 = vmatpush1.bf16.msra.mxu0 %v998_v10  ;;  %962 = vmatpush1.bf16.msra.mxu1 %v998_v10 }
  0x25   : > { %560 = vmatprep.subr.bf16.mxu0 %v1073_v1  ;;  %953 = vmatprep.subr.bf16.mxu1 %v1073_v1 }
  0x28   : > { %561 = vmatpush1.bf16.msra.mxu0 %v999_v13  ;;  %963 = vmatpush1.bf16.msra.mxu1 %v999_v13 }
  0x29   : > { %562 = vmatprep.subr.bf16.mxu0 %v1073_v1  ;;  %954 = vmatprep.subr.bf16.mxu1 %v1073_v1 }
  0x2c   : > { %563 = vmatpush1.bf16.msra.mxu0 %v542_v16  ;;  %964 = vmatpush1.bf16.msra.mxu1 %v542_v16 }
  0x2f   : > { %577 = vmatmul.mubr.bf16.vlgmr.msra.gmra.mrb[0].mxu0 %v1001_v17  ;;  %641 = vmatmul.mubr.bf16.vlgmr.msra.gmra.mrb[0].mxu1 %v1004_v18 }
  0x30   : > { %927 = vmatprep.mubr.msk.bf16.mxu0 %vm488_vm0, %v1007_v19  ;;  %935 = vmatprep.mubr.msk.bf16.mxu1 %vm488_vm0, %v1009_v20 }
  0x37   : > { %585 = vmatmul.mubr.bf16.gmra.mrb[4].mxu0 %v1011_v21  ;;  %649 = vmatmul.mubr.bf16.gmra.mrb[4].mxu1 %v1012_v22 }
  0x38   : > { %928 = vmatprep.mubr.msk.bf16.mxu0 %vm488_vm0, %v1013_v23  ;;  %936 = vmatprep.mubr.msk.bf16.mxu1 %vm488_vm0, %v1015_v24 }
  0x3f   : > { %593 = vmatmul.mubr.bf16.gmra.mrb[8].mxu0 %v1017_v25  ;;  %657 = vmatmul.mubr.bf16.gmra.mrb[8].mxu1 %v1018_v26 }
  0x40   : > { %929 = vmatprep.mubr.msk.bf16.mxu0 %vm488_vm0, %v1019_v27  ;;  %937 = vmatprep.mubr.msk.bf16.mxu1 %vm488_vm0, %v1021_v28 }
  0x47   : > { %601 = vmatmul.mubr.bf16.gmra.mrb[12].mxu0 %v1023_v29  ;;  %665 = vmatmul.mubr.bf16.gmra.mrb[12].mxu1 %v1024_v30 }
  0x48   : > { %930 = vmatprep.mubr.msk.bf16.mxu0 %vm488_vm0, %v1025_v31  ;;  %938 = vmatprep.mubr.msk.bf16.mxu1 %vm488_vm0, %v1027_v32 }
  0x4f   : > { %609 = vmatmul.mubr.bf16.gmra.mrb[16].mxu0 %v1029_v33  ;;  %673 = vmatmul.mubr.bf16.gmra.mrb[16].mxu1 %v1030_v34 }
  0x50   : > { %931 = vmatprep.mubr.msk.bf16.mxu0 %vm488_vm0, %v1031_v35  ;;  %939 = vmatprep.mubr.msk.bf16.mxu1 %vm488_vm0, %v1033_v36 }
  0x57   : > { %617 = vmatmul.mubr.bf16.gmra.mrb[20].mxu0 %v1035_v37  ;;  %681 = vmatmul.mubr.bf16.gmra.mrb[20].mxu1 %v1036_v38 }
  0x58   : > { %932 = vmatprep.mubr.msk.bf16.mxu0 %vm488_vm0, %v1037_v39  ;;  %940 = vmatprep.mubr.msk.bf16.mxu1 %vm488_vm0, %v1039_v40 }
  0x5f   : > { %625 = vmatmul.mubr.bf16.gmra.mrb[24].mxu0 %v1041_v41  ;;  %689 = vmatmul.mubr.bf16.gmra.mrb[24].mxu1 %v1042_v42 }
  0x60   : > { %933 = vmatprep.mubr.msk.bf16.mxu0 %vm488_vm0, %v1043_v43  ;;  %941 = vmatprep.mubr.msk.bf16.mxu1 %vm488_vm0, %v1045_v44 }
  0x67   : > { %633 = vmatmul.mubr.bf16.gmra.mrb[28].mxu0 %v1047_v45  ;;  %697 = vmatmul.mubr.bf16.gmra.mrb[28].mxu1 %v1048_v46 }
 0x102   : > { %v578_v48 = vpop.f32.mrb[0].mxu0  ;;  %v642_v49 = vpop.f32.mrb[0].mxu1 }
 0x103   : > { %v579_v50 = vadd.f32 %v1204_v47, %v578_v48  ;;  %v643_v51 = vadd.f32 %v1204_v47, %v642_v49  ;;  %v580_v52 = vpop.f32.mrb[1].mxu0  ;;  %v644_v53 = vpop.f32.mrb[1].mxu1 }
 0x104   : > { %v581_v54 = vpop.f32.mrb[2].mxu0  ;;  %v645_v55 = vpop.f32.mrb[2].mxu1 }
 0x105   : > { %v705_v56 = vmax.f32 %v579_v50, 0.0  ;;  %v721_v57 = vmax.f32 %v643_v51, 0.0  ;;  %v582_v58 = vadd.f32 %v1204_v47, %v581_v54  ;;  %v646_v59 = vadd.f32 %v1204_v47, %v645_v55  ;;  %v583_v60 = vpop.f32.mrb[3].mxu0  ;;  %v647_v61 = vpop.f32.mrb[3].mxu1 }
 0x107   : > { %737 = vst [vmem:[%s1213_s21] sm:$0xff] %v705_v56  ;;  %753 = vst [vmem:[%s1213_s21 + $0x80] sm:$0xff] %v721_v57  ;;  %v706_v62 = vmax.f32 %v582_v58, 0.0  ;;  %v722_v63 = vmax.f32 %v646_v59, 0.0 }
 0x109   : > { %738 = vst [vmem:[%s1213_s21 + $0x8] sm:$0xff] %v706_v62  ;;  %754 = vst [vmem:[%s1213_s21 + $0x88] sm:$0xff] %v722_v63 }
 0x10a   : > { %v586_v0 = vpop.f32.mrb[4].mxu0  ;;  %v650_v1 = vpop.f32.mrb[4].mxu1 }
 0x10b   : > { %v587_v2 = vadd.f32 %v1204_v47, %v586_v0  ;;  %v651_v3 = vadd.f32 %v1204_v47, %v650_v1  ;;  %v588_v4 = vpop.f32.mrb[5].mxu0  ;;  %v652_v5 = vpop.f32.mrb[5].mxu1 }
 0x10c   : > { %v589_v6 = vpop.f32.mrb[6].mxu0  ;;  %v653_v7 = vpop.f32.mrb[6].mxu1 }
 0x10d   : > { %v707_v8 = vmax.f32 %v587_v2, 0.0  ;;  %v723_v9 = vmax.f32 %v651_v3, 0.0  ;;  %v590_v10 = vadd.f32 %v1204_v47, %v589_v6  ;;  %v654_v11 = vadd.f32 %v1204_v47, %v653_v7  ;;  %v591_v12 = vpop.f32.mrb[7].mxu0  ;;  %v655_v13 = vpop.f32.mrb[7].mxu1 }
 0x10f   : > { %739 = vst [vmem:[%s1213_s21 + $0x10] sm:$0xff] %v707_v8  ;;  %755 = vst [vmem:[%s1213_s21 + $0x90] sm:$0xff] %v723_v9  ;;  %v708_v14 = vmax.f32 %v590_v10, 0.0  ;;  %v724_v15 = vmax.f32 %v654_v11, 0.0 }
 0x111   : > { %740 = vst [vmem:[%s1213_s21 + $0x18] sm:$0xff] %v708_v14  ;;  %756 = vst [vmem:[%s1213_s21 + $0x98] sm:$0xff] %v724_v15 }
 0x112   : > { %v594_v16 = vpop.f32.mrb[8].mxu0  ;;  %v658_v17 = vpop.f32.mrb[8].mxu1 }
 0x113   : > { %v595_v18 = vadd.f32 %v1204_v47, %v594_v16  ;;  %v659_v19 = vadd.f32 %v1204_v47, %v658_v17  ;;  %v596_v20 = vpop.f32.mrb[9].mxu0  ;;  %v660_v21 = vpop.f32.mrb[9].mxu1 }
 0x114   : > { %v597_v22 = vpop.f32.mrb[10].mxu0  ;;  %v661_v23 = vpop.f32.mrb[10].mxu1 }
 0x115   : > { %v709_v24 = vmax.f32 %v595_v18, 0.0  ;;  %v725_v25 = vmax.f32 %v659_v19, 0.0  ;;  %v598_v26 = vadd.f32 %v1204_v47, %v597_v22  ;;  %v662_v27 = vadd.f32 %v1204_v47, %v661_v23  ;;  %v599_v28 = vpop.f32.mrb[11].mxu0  ;;  %v663_v29 = vpop.f32.mrb[11].mxu1 }
 0x117   : > { %741 = vst [vmem:[%s1213_s21 + $0x20] sm:$0xff] %v709_v24  ;;  %757 = vst [vmem:[%s1213_s21 + $0xa0] sm:$0xff] %v725_v25  ;;  %v710_v30 = vmax.f32 %v598_v26, 0.0  ;;  %v726_v31 = vmax.f32 %v662_v27, 0.0 }
 0x119   : > { %742 = vst [vmem:[%s1213_s21 + $0x28] sm:$0xff] %v710_v30  ;;  %758 = vst [vmem:[%s1213_s21 + $0xa8] sm:$0xff] %v726_v31 }
 0x11a   : > { %v602_v32 = vpop.f32.mrb[12].mxu0  ;;  %v666_v33 = vpop.f32.mrb[12].mxu1 }
 0x11b   : > { %v603_v34 = vadd.f32 %v1204_v47, %v602_v32  ;;  %v667_v35 = vadd.f32 %v1204_v47, %v666_v33  ;;  %v604_v36 = vpop.f32.mrb[13].mxu0  ;;  %v668_v37 = vpop.f32.mrb[13].mxu1 }
 0x11c   : > { %v605_v38 = vpop.f32.mrb[14].mxu0  ;;  %v669_v39 = vpop.f32.mrb[14].mxu1 }
 0x11d   : > { %v711_v40 = vmax.f32 %v603_v34, 0.0  ;;  %v727_v41 = vmax.f32 %v667_v35, 0.0  ;;  %v606_v42 = vadd.f32 %v1204_v47, %v605_v38  ;;  %v670_v43 = vadd.f32 %v1204_v47, %v669_v39  ;;  %v607_v44 = vpop.f32.mrb[15].mxu0  ;;  %v671_v45 = vpop.f32.mrb[15].mxu1 }
 0x11f   : > { %743 = vst [vmem:[%s1213_s21 + $0x30] sm:$0xff] %v711_v40  ;;  %759 = vst [vmem:[%s1213_s21 + $0xb0] sm:$0xff] %v727_v41  ;;  %v712_v46 = vmax.f32 %v606_v42, 0.0  ;;  %v728_v48 = vmax.f32 %v670_v43, 0.0 }
 0x121   : > { %744 = vst [vmem:[%s1213_s21 + $0x38] sm:$0xff] %v712_v46  ;;  %760 = vst [vmem:[%s1213_s21 + $0xb8] sm:$0xff] %v728_v48 }
 0x122   : > { %v610_v49 = vpop.f32.mrb[16].mxu0  ;;  %v674_v50 = vpop.f32.mrb[16].mxu1 }
 0x123   : > { %v611_v51 = vadd.f32 %v1204_v47, %v610_v49  ;;  %v675_v52 = vadd.f32 %v1204_v47, %v674_v50  ;;  %v612_v53 = vpop.f32.mrb[17].mxu0  ;;  %v676_v54 = vpop.f32.mrb[17].mxu1 }
 0x124   : > { %v613_v55 = vpop.f32.mrb[18].mxu0  ;;  %v677_v56 = vpop.f32.mrb[18].mxu1 }
 0x125   : > { %v713_v57 = vmax.f32 %v611_v51, 0.0  ;;  %v729_v58 = vmax.f32 %v675_v52, 0.0  ;;  %v614_v59 = vadd.f32 %v1204_v47, %v613_v55  ;;  %v678_v60 = vadd.f32 %v1204_v47, %v677_v56  ;;  %v615_v61 = vpop.f32.mrb[19].mxu0  ;;  %v679_v62 = vpop.f32.mrb[19].mxu1 }
 0x127   : > { %745 = vst [vmem:[%s1213_s21 + $0x40] sm:$0xff] %v713_v57  ;;  %761 = vst [vmem:[%s1213_s21 + $0xc0] sm:$0xff] %v729_v58  ;;  %v714_v63 = vmax.f32 %v614_v59, 0.0  ;;  %v730_v0 = vmax.f32 %v678_v60, 0.0 }
 0x129   : > { %746 = vst [vmem:[%s1213_s21 + $0x48] sm:$0xff] %v714_v63  ;;  %762 = vst [vmem:[%s1213_s21 + $0xc8] sm:$0xff] %v730_v0 }
 0x12a   : > { %v618_v1 = vpop.f32.mrb[20].mxu0  ;;  %v682_v2 = vpop.f32.mrb[20].mxu1 }
 0x12b   : > { %v619_v3 = vadd.f32 %v1204_v47, %v618_v1  ;;  %v683_v4 = vadd.f32 %v1204_v47, %v682_v2  ;;  %v620_v5 = vpop.f32.mrb[21].mxu0  ;;  %v684_v6 = vpop.f32.mrb[21].mxu1 }
 0x12c   : > { %v621_v7 = vpop.f32.mrb[22].mxu0  ;;  %v685_v8 = vpop.f32.mrb[22].mxu1 }
 0x12d   : > { %v715_v9 = vmax.f32 %v619_v3, 0.0  ;;  %v731_v10 = vmax.f32 %v683_v4, 0.0  ;;  %v622_v11 = vadd.f32 %v1204_v47, %v621_v7  ;;  %v686_v12 = vadd.f32 %v1204_v47, %v685_v8  ;;  %v623_v13 = vpop.f32.mrb[23].mxu0  ;;  %v687_v14 = vpop.f32.mrb[23].mxu1 }
 0x12f   : > { %747 = vst [vmem:[%s1213_s21 + $0x50] sm:$0xff] %v715_v9  ;;  %763 = vst [vmem:[%s1213_s21 + $0xd0] sm:$0xff] %v731_v10  ;;  %v716_v15 = vmax.f32 %v622_v11, 0.0  ;;  %v732_v16 = vmax.f32 %v686_v12, 0.0 }
 0x131   : > { %748 = vst [vmem:[%s1213_s21 + $0x58] sm:$0xff] %v716_v15  ;;  %764 = vst [vmem:[%s1213_s21 + $0xd8] sm:$0xff] %v732_v16 }
 0x132   : > { %v626_v17 = vpop.f32.mrb[24].mxu0  ;;  %v690_v18 = vpop.f32.mrb[24].mxu1 }
 0x133   : > { %v627_v19 = vadd.f32 %v1204_v47, %v626_v17  ;;  %v691_v20 = vadd.f32 %v1204_v47, %v690_v18  ;;  %v628_v21 = vpop.f32.mrb[25].mxu0  ;;  %v692_v22 = vpop.f32.mrb[25].mxu1 }
 0x134   : > { %v629_v23 = vpop.f32.mrb[26].mxu0  ;;  %v693_v24 = vpop.f32.mrb[26].mxu1 }
 0x135   : > { %v717_v25 = vmax.f32 %v627_v19, 0.0  ;;  %v733_v26 = vmax.f32 %v691_v20, 0.0  ;;  %v630_v27 = vadd.f32 %v1204_v47, %v629_v23  ;;  %v694_v28 = vadd.f32 %v1204_v47, %v693_v24  ;;  %v631_v29 = vpop.f32.mrb[27].mxu0  ;;  %v695_v30 = vpop.f32.mrb[27].mxu1 }
 0x137   : > { %749 = vst [vmem:[%s1213_s21 + $0x60] sm:$0xff] %v717_v25  ;;  %765 = vst [vmem:[%s1213_s21 + $0xe0] sm:$0xff] %v733_v26  ;;  %v718_v31 = vmax.f32 %v630_v27, 0.0  ;;  %v734_v32 = vmax.f32 %v694_v28, 0.0 }
 0x139   : > { %750 = vst [vmem:[%s1213_s21 + $0x68] sm:$0xff] %v718_v31  ;;  %766 = vst [vmem:[%s1213_s21 + $0xe8] sm:$0xff] %v734_v32 }
 0x13a   : > { %v634_v33 = vpop.f32.mrb[28].mxu0  ;;  %v698_v34 = vpop.f32.mrb[28].mxu1 }
 0x13b   : > { %v635_v35 = vadd.f32 %v1204_v47, %v634_v33  ;;  %v699_v36 = vadd.f32 %v1204_v47, %v698_v34  ;;  %v636_v37 = vpop.f32.mrb[29].mxu0  ;;  %v700_v38 = vpop.f32.mrb[29].mxu1 }
 0x13c   : > { %v637_v39 = vpop.f32.mrb[30].mxu0  ;;  %v701_v40 = vpop.f32.mrb[30].mxu1 }
 0x13d   : > { %v719_v41 = vmax.f32 %v635_v35, 0.0  ;;  %v735_v42 = vmax.f32 %v699_v36, 0.0  ;;  %v638_v43 = vadd.f32 %v1204_v47, %v637_v39  ;;  %v702_v44 = vadd.f32 %v1204_v47, %v701_v40  ;;  %v639_v45 = vpop.f32.mrb[31].mxu0  ;;  %v703_v46 = vpop.f32.mrb[31].mxu1 }
 0x13f   : > { %751 = vst [vmem:[%s1213_s21 + $0x70] sm:$0xff] %v719_v41  ;;  %767 = vst [vmem:[%s1213_s21 + $0xf0] sm:$0xff] %v735_v42  ;;  %v720_v48 = vmax.f32 %v638_v43, 0.0  ;;  %v736_v49 = vmax.f32 %v702_v44, 0.0 }
 0x141   : > { %752 = vst [vmem:[%s1213_s21 + $0x78] sm:$0xff] %v720_v48  ;;  %768 = vst [vmem:[%s1213_s21 + $0xf8] sm:$0xff] %v736_v49 }
 0x142 PF: > { %s13_s14 = sadd.s32 1, %s1071_s14   ;;  %s1290_s12 = smov %s1067_s13 }
 0x143   : > { %p10_p5 = scmp.ge.s32.totalorder %s13_s14, 4   ;;  %s1291_s13 = smov %s1293_s15 }
 0x145   :  { %12 = sbr.rel (!%p10_p5) target bundleno = 2 (0x2), region = 68 }

// kernel: resnet_forward.22
= control target key start
LH: loop header
LB: loop body
LE: loop exit
PB: predicated region body
PF: predicated region fallthrough
CT: control target
= control target key end

     0   :  { %vm104_vm0 = vcmask 1043456   ;;  %vm79_vm1 = vcmask 64512   ;;  %s403_s1 = inlined_call_operand.vmem [shape: bf16[8,128], index: 1, kind: input, shape index: {}]   ;;  %s404_s0 = inlined_call_operand.vmem [shape: bf16[128,8], index: 0, kind: input, shape index: {}]   ;;  %s405_s2 = inlined_call_operand.vmem [shape: f32[1,128], index: 2, kind: input, shape index: {}]   ;;  %s406_s3 = inlined_call_operand.vmem [shape: f32[128,128], index: 3, kind: output, shape index: {}]  }
   0x1   :  { %v31_v0 = vld [vmem:[%s403_s1] sm:$0xf]  ;;  %v291_v4 = vld [vmem:[%s404_s0 + $0x8] sm:$0xff]   ;;  %v293_v6 = vld [vmem:[%s404_s0 + $0x10] sm:$0xff]  }
   0x2   :  { %287 = vmatprep.subr.msk.bf16.mxu0 %vm104_vm0, %v31_v0  ;;  %288 = vmatprep.subr.msk.bf16.mxu1 %vm104_vm0, %v31_v0  ;;  %v106_v1 = vsel %vm104_vm0, %v31_v0, 0  ;;  %v289_v2 = vld [vmem:[%s404_s0] sm:$0xff]   ;;  %v292_v5 = vld [vmem:[%s404_s0 + $0x28] sm:$0xff]   ;;  %v294_v7 = vld [vmem:[%s404_s0 + $0x30] sm:$0xff]  }
   0x3   :  { %268 = vmatpush3.bf16.msra.mxu0 %v106_v1  ;;  %286 = vmatpush3.bf16.msra.mxu1 %v106_v1  ;;  %v290_v3 = vld [vmem:[%s404_s0 + $0x20] sm:$0xff]   ;;  %v295_v8 = vld [vmem:[%s404_s0 + $0x18] sm:$0xff]  }
   0x4   :  { %269 = vmatprep.mubr.msk.bf16.mxu0 %vm79_vm1, %v289_v2  ;;  %277 = vmatprep.mubr.msk.bf16.mxu1 %vm79_vm1, %v290_v3  ;;  %v296_v9 = vld [vmem:[%s404_s0 + $0x38] sm:$0xff]   ;;  %v241_v10 = vld [vmem:[%s405_s2] ss:$0 sm:$0xff] }
   0x6   :  { %270 = vmatmul.mubr.msk.bf16.vlgmr.msra.gmra.mrb[0].mxu0 %vm79_vm1, %v291_v4  ;;  %278 = vmatmul.mubr.msk.bf16.vlgmr.msra.gmra.mrb[0].mxu1 %vm79_vm1, %v292_v5 }
   0x7   :  { %273 = vmatprep.mubr.msk.bf16.mxu0 %vm79_vm1, %v293_v6  ;;  %281 = vmatprep.mubr.msk.bf16.mxu1 %vm79_vm1, %v294_v7 }
   0xe   :  { %274 = vmatmul.mubr.msk.bf16.gmra.mrb[4].mxu0 %vm79_vm1, %v295_v8  ;;  %282 = vmatmul.mubr.msk.bf16.gmra.mrb[4].mxu1 %vm79_vm1, %v296_v9 }
  0xd9   :  { %v271_v11 = vpop.f32.mrb[0].mxu0  ;;  %v279_v13 = vpop.f32.mrb[0].mxu1 }
  0xda   :  { %v151_v12 = vadd.f32 %v271_v11, %v241_v10  ;;  %v142_v14 = vpop.f32.mrb[1].mxu0  ;;  %v183_v15 = vadd.f32 %v279_v13, %v241_v10  ;;  %v174_v17 = vpop.f32.mrb[1].mxu1 }
  0xdb   :  { %v143_v16 = vadd.f32 %v241_v10, %v142_v14  ;;  %v272_v18 = vpop.f32.mrb[2].mxu0  ;;  %v175_v20 = vadd.f32 %v241_v10, %v174_v17  ;;  %v280_v22 = vpop.f32.mrb[2].mxu1 }
  0xdc   :  { %v207_v19 = vmax.f32 %v151_v12, 0.0  ;;  %v154_v21 = vadd.f32 %v272_v18, %v241_v10  ;;  %v145_v23 = vpop.f32.mrb[3].mxu0  ;;  %v215_v24 = vmax.f32 %v183_v15, 0.0  ;;  %v186_v26 = vadd.f32 %v280_v22, %v241_v10  ;;  %v177_v28 = vpop.f32.mrb[3].mxu1 }
  0xdd   :  { %v205_v25 = vmax.f32 %v143_v16, 0.0  ;;  %v146_v27 = vadd.f32 %v241_v10, %v145_v23  ;;  %v213_v29 = vmax.f32 %v175_v20, 0.0  ;;  %v178_v31 = vadd.f32 %v241_v10, %v177_v28 }
  0xde   :  { %223 = vst [vmem:[%s406_s3 + $0x10] sm:$0xff] %v207_v19  ;;  %v208_v30 = vmax.f32 %v154_v21, 0.0  ;;  %231 = vst [vmem:[%s406_s3 + $0x50] sm:$0xff] %v215_v24  ;;  %v216_v32 = vmax.f32 %v186_v26, 0.0 }
  0xdf   :  { %221 = vst [vmem:[%s406_s3] sm:$0xff] %v205_v25  ;;  %v206_v33 = vmax.f32 %v146_v27, 0.0  ;;  %229 = vst [vmem:[%s406_s3 + $0x40] sm:$0xff] %v213_v29  ;;  %v214_v34 = vmax.f32 %v178_v31, 0.0 }
  0xe0   :  { %224 = vst [vmem:[%s406_s3 + $0x18] sm:$0xff] %v208_v30  ;;  %232 = vst [vmem:[%s406_s3 + $0x58] sm:$0xff] %v216_v32 }
  0xe1   :  { %222 = vst [vmem:[%s406_s3 + $0x8] sm:$0xff] %v206_v33  ;;  %v275_v35 = vpop.f32.mrb[4].mxu0  ;;  %230 = vst [vmem:[%s406_s3 + $0x48] sm:$0xff] %v214_v34  ;;  %v283_v37 = vpop.f32.mrb[4].mxu1 }
  0xe2   :  { %v167_v36 = vadd.f32 %v275_v35, %v241_v10  ;;  %v158_v38 = vpop.f32.mrb[5].mxu0  ;;  %v199_v39 = vadd.f32 %v283_v37, %v241_v10  ;;  %v190_v41 = vpop.f32.mrb[5].mxu1 }
  0xe3   :  { %v159_v40 = vadd.f32 %v241_v10, %v158_v38  ;;  %v276_v42 = vpop.f32.mrb[6].mxu0  ;;  %v191_v44 = vadd.f32 %v241_v10, %v190_v41  ;;  %v284_v46 = vpop.f32.mrb[6].mxu1 }
  0xe4   :  { %v211_v43 = vmax.f32 %v167_v36, 0.0  ;;  %v170_v45 = vadd.f32 %v276_v42, %v241_v10  ;;  %v161_v47 = vpop.f32.mrb[7].mxu0  ;;  %v219_v48 = vmax.f32 %v199_v39, 0.0  ;;  %v202_v50 = vadd.f32 %v284_v46, %v241_v10  ;;  %v193_v52 = vpop.f32.mrb[7].mxu1 }
  0xe5   :  { %v209_v49 = vmax.f32 %v159_v40, 0.0  ;;  %v162_v51 = vadd.f32 %v241_v10, %v161_v47  ;;  %v217_v53 = vmax.f32 %v191_v44, 0.0  ;;  %v194_v55 = vadd.f32 %v241_v10, %v193_v52 }
  0xe6   :  { %227 = vst [vmem:[%s406_s3 + $0x30] sm:$0xff] %v211_v43  ;;  %v212_v54 = vmax.f32 %v170_v45, 0.0  ;;  %235 = vst [vmem:[%s406_s3 + $0x70] sm:$0xff] %v219_v48  ;;  %v220_v56 = vmax.f32 %v202_v50, 0.0 }
  0xe7   :  { %225 = vst [vmem:[%s406_s3 + $0x20] sm:$0xff] %v209_v49  ;;  %v210_v57 = vmax.f32 %v162_v51, 0.0  ;;  %233 = vst [vmem:[%s406_s3 + $0x60] sm:$0xff] %v217_v53  ;;  %v218_v58 = vmax.f32 %v194_v55, 0.0 }
  0xe8   :  { %228 = vst [vmem:[%s406_s3 + $0x38] sm:$0xff] %v212_v54  ;;  %236 = vst [vmem:[%s406_s3 + $0x78] sm:$0xff] %v220_v56 }
  0xe9   :  { %226 = vst [vmem:[%s406_s3 + $0x28] sm:$0xff] %v210_v57  ;;  %234 = vst [vmem:[%s406_s3 + $0x68] sm:$0xff] %v218_v58 }

// kernel: resnet_forward.21
= control target key start
LH: loop header
LB: loop body
LE: loop exit
PB: predicated region body
PF: predicated region fallthrough
CT: control target
= control target key end

     0   :  { %vm152_vm0 = vcmask 64512   ;;  %s1095_s0 = inlined_call_operand.vmem [shape: f32[9,128,8], index: 0, kind: input, shape index: {}]   ;;  %s1096_s1 = inlined_call_operand.vmem [shape: f32[128,8], index: 1, kind: output, shape index: {}]  }
   0x1   :  { %v8_v0 = vld [vmem:[%s1095_s0] sm:$0xff]  ;;  %v9_v13 = vld [vmem:[%s1095_s0 + $0x8] sm:$0xff]  ;;  %v10_v32 = vld [vmem:[%s1095_s0 + $0x10] sm:$0xff] }
   0x2   :  { %v24_v1 = vld [vmem:[%s1095_s0 + $0x80] sm:$0xff]  ;;  %v153_v5 = vsel %vm152_vm0, %v8_v0, -inf  ;;  %v25_v14 = vld [vmem:[%s1095_s0 + $0x88] sm:$0xff]  ;;  %v170_v19 = vsel %vm152_vm0, %v9_v13, -inf  ;;  %v26_v33 = vld [vmem:[%s1095_s0 + $0x90] sm:$0xff]  ;;  %v187_v38 = vsel %vm152_vm0, %v10_v32, -inf }
   0x3   :  { %v40_v2 = vld [vmem:[%s1095_s0 + $0x100] sm:$0xff]  ;;  %v154_v6 = vsel %vm152_vm0, %v24_v1, -inf  ;;  %v41_v15 = vld [vmem:[%s1095_s0 + $0x108] sm:$0xff]  ;;  %v171_v20 = vsel %vm152_vm0, %v25_v14, -inf  ;;  %v42_v34 = vld [vmem:[%s1095_s0 + $0x110] sm:$0xff]  ;;  %v188_v39 = vsel %vm152_vm0, %v26_v33, -inf }
   0x4   :  { %v56_v3 = vld [vmem:[%s1095_s0 + $0x180] sm:$0xff]  ;;  %v156_v7 = vsel %vm152_vm0, %v40_v2, -inf  ;;  %v155_v11 = vmax.f32 %v153_v5, %v154_v6  ;;  %v57_v18 = vld [vmem:[%s1095_s0 + $0x188] sm:$0xff]  ;;  %v173_v21 = vsel %vm152_vm0, %v41_v15, -inf  ;;  %v172_v27 = vmax.f32 %v170_v19, %v171_v20  ;;  %v58_v37 = vld [vmem:[%s1095_s0 + $0x190] sm:$0xff] }
   0x5   :  { %v72_v4 = vld [vmem:[%s1095_s0 + $0x200] sm:$0xff]  ;;  %v158_v12 = vsel %vm152_vm0, %v56_v3, -inf  ;;  %v73_v24 = vld [vmem:[%s1095_s0 + $0x208] sm:$0xff]  ;;  %v175_v31 = vsel %vm152_vm0, %v57_v18, -inf  ;;  %v190_v40 = vsel %vm152_vm0, %v42_v34, -inf  ;;  %v74_v45 = vld [vmem:[%s1095_s0 + $0x210] sm:$0xff]  ;;  %v189_v46 = vmax.f32 %v187_v38, %v188_v39 }
   0x6   :  { %v88_v8 = vld [vmem:[%s1095_s0 + $0x280] sm:$0xff]  ;;  %v157_v17 = vmax.f32 %v155_v11, %v156_v7  ;;  %v160_v22 = vsel %vm152_vm0, %v72_v4, -inf  ;;  %v89_v25 = vld [vmem:[%s1095_s0 + $0x288] sm:$0xff]  ;;  %v174_v36 = vmax.f32 %v172_v27, %v173_v21  ;;  %v177_v44 = vsel %vm152_vm0, %v73_v24, -inf  ;;  %v11_v51 = vld [vmem:[%s1095_s0 + $0x18] sm:$0xff] }
   0x7   :  { %v104_v9 = vld [vmem:[%s1095_s0 + $0x300] sm:$0xff]  ;;  %v162_v23 = vsel %vm152_vm0, %v88_v8, -inf  ;;  %v105_v26 = vld [vmem:[%s1095_s0 + $0x308] sm:$0xff]  ;;  %v179_v48 = vsel %vm152_vm0, %v89_v25, -inf  ;;  %v192_v50 = vsel %vm152_vm0, %v58_v37, -inf  ;;  %v27_v52 = vld [vmem:[%s1095_s0 + $0x98] sm:$0xff]  ;;  %v191_v58 = vmax.f32 %v189_v46, %v190_v40 }
   0x8   :  { %v120_v10 = vld [vmem:[%s1095_s0 + $0x380] sm:$0xff]  ;;  %v159_v28 = vmax.f32 %v157_v17, %v158_v12  ;;  %v164_v29 = vsel %vm152_vm0, %v104_v9, -inf  ;;  %v121_v35 = vld [vmem:[%s1095_s0 + $0x388] sm:$0xff]  ;;  %v176_v47 = vmax.f32 %v174_v36, %v175_v31  ;;  %v181_v49 = vsel %vm152_vm0, %v105_v26, -inf  ;;  %v43_v53 = vld [vmem:[%s1095_s0 + $0x118] sm:$0xff] }
   0x9   :  { %v136_v16 = vld [vmem:[%s1095_s0 + $0x400] sm:$0xff]  ;;  %v166_v30 = vsel %vm152_vm0, %v120_v10, -inf  ;;  %v137_v43 = vld [vmem:[%s1095_s0 + $0x408] sm:$0xff]  ;;  %v183_v55 = vsel %vm152_vm0, %v121_v35, -inf  ;;  %v90_v56 = vld [vmem:[%s1095_s0 + $0x290] sm:$0xff]  ;;  %v204_v60 = vsel %vm152_vm0, %v11_v51, -inf  ;;  %v193_v4 = vmax.f32 %v191_v58, %v192_v50 }
   0xa   :  { %v161_v41 = vmax.f32 %v159_v28, %v160_v22  ;;  %v168_v42 = vsel %vm152_vm0, %v136_v16, -inf  ;;  %v106_v57 = vld [vmem:[%s1095_s0 + $0x310] sm:$0xff]  ;;  %v59_v59 = vld [vmem:[%s1095_s0 + $0x198] sm:$0xff]  ;;  %v178_v61 = vmax.f32 %v176_v47, %v177_v44  ;;  %v194_v62 = vsel %vm152_vm0, %v74_v45, -inf  ;;  %v12_v6 = vld [vmem:[%s1095_s0 + $0x20] sm:$0xff] }
   0xb   :  { %v75_v63 = vld [vmem:[%s1095_s0 + $0x218] sm:$0xff]  ;;  %v205_v0 = vsel %vm152_vm0, %v27_v52, -inf  ;;  %v207_v1 = vsel %vm152_vm0, %v43_v53, -inf  ;;  %v185_v3 = vsel %vm152_vm0, %v137_v43, -inf  ;;  %v28_v7 = vld [vmem:[%s1095_s0 + $0xa0] sm:$0xff]  ;;  %v196_v10 = vsel %vm152_vm0, %v90_v56, -inf }
   0xc   :  { %v163_v54 = vmax.f32 %v161_v41, %v162_v23  ;;  %v206_v5 = vmax.f32 %v204_v60, %v205_v0  ;;  %v44_v8 = vld [vmem:[%s1095_s0 + $0x120] sm:$0xff]  ;;  %v180_v9 = vmax.f32 %v178_v61, %v179_v48  ;;  %v198_v11 = vsel %vm152_vm0, %v106_v57, -inf  ;;  %v122_v14 = vld [vmem:[%s1095_s0 + $0x390] sm:$0xff]  ;;  %v91_v16 = vld [vmem:[%s1095_s0 + $0x298] sm:$0xff] }
   0xd   :  { %v209_v12 = vsel %vm152_vm0, %v59_v59, -inf  ;;  %v195_v15 = vmax.f32 %v193_v4, %v194_v62  ;;  %v211_v18 = vsel %vm152_vm0, %v75_v63, -inf  ;;  %v60_v19 = vld [vmem:[%s1095_s0 + $0x1a0] sm:$0xff]  ;;  %v138_v21 = vld [vmem:[%s1095_s0 + $0x410] sm:$0xff]  ;;  %v221_v22 = vsel %vm152_vm0, %v12_v6, -inf  ;;  %v107_v27 = vld [vmem:[%s1095_s0 + $0x318] sm:$0xff] }
   0xe   :  { %v165_v2 = vmax.f32 %v163_v54, %v164_v29  ;;  %v208_v17 = vmax.f32 %v206_v5, %v207_v1  ;;  %v182_v20 = vmax.f32 %v180_v9, %v181_v49  ;;  %v222_v23 = vsel %vm152_vm0, %v28_v7, -inf  ;;  %v76_v29 = vld [vmem:[%s1095_s0 + $0x220] sm:$0xff]  ;;  %v13_v31 = vld [vmem:[%s1095_s0 + $0x28] sm:$0xff]  ;;  %v123_v39 = vld [vmem:[%s1095_s0 + $0x398] sm:$0xff] }
   0xf   :  { %v224_v24 = vsel %vm152_vm0, %v44_v8, -inf  ;;  %v197_v26 = vmax.f32 %v195_v15, %v196_v10  ;;  %v200_v33 = vsel %vm152_vm0, %v122_v14, -inf  ;;  %v213_v34 = vsel %vm152_vm0, %v91_v16, -inf  ;;  %v29_v36 = vld [vmem:[%s1095_s0 + $0xa8] sm:$0xff]  ;;  %v92_v41 = vld [vmem:[%s1095_s0 + $0x2a0] sm:$0xff]  ;;  %v139_v50 = vld [vmem:[%s1095_s0 + $0x418] sm:$0xff] }
  0x10   :  { %v167_v13 = vmax.f32 %v165_v2, %v166_v30  ;;  %v210_v28 = vmax.f32 %v208_v17, %v209_v12  ;;  %v223_v30 = vmax.f32 %v221_v22, %v222_v23  ;;  %v184_v32 = vmax.f32 %v182_v20, %v183_v55  ;;  %v45_v43 = vld [vmem:[%s1095_s0 + $0x128] sm:$0xff]  ;;  %v108_v52 = vld [vmem:[%s1095_s0 + $0x320] sm:$0xff]  ;;  %v14_v60 = vld [vmem:[%s1095_s0 + $0x30] sm:$0xff] }
  0x11   :  { %v226_v35 = vsel %vm152_vm0, %v60_v19, -inf  ;;  %v199_v37 = vmax.f32 %v197_v26, %v198_v11  ;;  %v202_v38 = vsel %vm152_vm0, %v138_v21, -inf  ;;  %v215_v45 = vsel %vm152_vm0, %v107_v27, -inf  ;;  %v61_v47 = vld [vmem:[%s1095_s0 + $0x1a8] sm:$0xff]  ;;  %v30_v61 = vld [vmem:[%s1095_s0 + $0xb0] sm:$0xff]  ;;  %v124_v0 = vld [vmem:[%s1095_s0 + $0x3a0] sm:$0xff] }
  0x12   :  { %v169_v25 = vmax.f32 %v167_v13, %v168_v42  ;;  %v212_v40 = vmax.f32 %v210_v28, %v211_v18  ;;  %v225_v42 = vmax.f32 %v223_v30, %v224_v24  ;;  %v186_v44 = vmax.f32 %v184_v32, %v185_v3  ;;  %v77_v54 = vld [vmem:[%s1095_s0 + $0x228] sm:$0xff]  ;;  %v46_v3 = vld [vmem:[%s1095_s0 + $0x130] sm:$0xff]  ;;  %v140_v11 = vld [vmem:[%s1095_s0 + $0x420] sm:$0xff] }
  0x13   :  { %v228_v46 = vsel %vm152_vm0, %v76_v29, -inf  ;;  %v238_v48 = vsel %vm152_vm0, %v13_v31, -inf  ;;  %v201_v49 = vmax.f32 %v199_v37, %v200_v33  ;;  %v239_v55 = vsel %vm152_vm0, %v29_v36, -inf  ;;  %v93_v6 = vld [vmem:[%s1095_s0 + $0x2a8] sm:$0xff]  ;;  %v62_v9 = vld [vmem:[%s1095_s0 + $0x1b0] sm:$0xff]  ;;  %v15_v21 = vld [vmem:[%s1095_s0 + $0x38] sm:$0xff] }
  0x14   :  { %425 = vst.msk [vmem:[%s1096_s1] sm:$0xff] %vm152_vm0, %v169_v25  ;;  %v214_v51 = vmax.f32 %v212_v40, %v213_v34  ;;  %v227_v53 = vmax.f32 %v225_v42, %v226_v35  ;;  %426 = vst.msk [vmem:[%s1096_s1 + $0x8] sm:$0xff] %vm152_vm0, %v186_v44  ;;  %v217_v56 = vsel %vm152_vm0, %v123_v39, -inf  ;;  %v230_v57 = vsel %vm152_vm0, %v92_v41, -inf  ;;  %v109_v13 = vld [vmem:[%s1095_s0 + $0x328] sm:$0xff]  ;;  %v78_v18 = vld [vmem:[%s1095_s0 + $0x230] sm:$0xff] }
  0x15   :  { %v240_v58 = vmax.f32 %v238_v48, %v239_v55  ;;  %v241_v59 = vsel %vm152_vm0, %v45_v43, -inf  ;;  %v203_v62 = vmax.f32 %v201_v49, %v202_v38  ;;  %v243_v2 = vsel %vm152_vm0, %v61_v47, -inf  ;;  %v31_v22 = vld [vmem:[%s1095_s0 + $0xb8] sm:$0xff]  ;;  %v125_v29 = vld [vmem:[%s1095_s0 + $0x3a8] sm:$0xff]  ;;  %v94_v32 = vld [vmem:[%s1095_s0 + $0x2b0] sm:$0xff] }
  0x16   :  { %v216_v63 = vmax.f32 %v214_v51, %v215_v45  ;;  %v229_v1 = vmax.f32 %v227_v53, %v228_v46  ;;  %v219_v4 = vsel %vm152_vm0, %v139_v50, -inf  ;;  %v232_v5 = vsel %vm152_vm0, %v108_v52, -inf  ;;  %v47_v27 = vld [vmem:[%s1095_s0 + $0x138] sm:$0xff]  ;;  %v141_v36 = vld [vmem:[%s1095_s0 + $0x428] sm:$0xff]  ;;  %v110_v37 = vld [vmem:[%s1095_s0 + $0x330] sm:$0xff] }
  0x17   :  { %v242_v7 = vmax.f32 %v240_v58, %v241_v59  ;;  %v245_v8 = vsel %vm152_vm0, %v77_v54, -inf  ;;  %427 = vst.msk [vmem:[%s1096_s1 + $0x10] sm:$0xff] %vm152_vm0, %v203_v62  ;;  %v255_v14 = vsel %vm152_vm0, %v14_v60, -inf  ;;  %v256_v15 = vsel %vm152_vm0, %v30_v61, -inf  ;;  %v63_v34 = vld [vmem:[%s1095_s0 + $0x1b8] sm:$0xff]  ;;  %v16_v46 = vld [vmem:[%s1095_s0 + $0x40] sm:$0xff] }
  0x18   :  { %v218_v10 = vmax.f32 %v216_v63, %v217_v56  ;;  %v231_v12 = vmax.f32 %v229_v1, %v230_v57  ;;  %v234_v16 = vsel %vm152_vm0, %v124_v0, -inf  ;;  %v257_v19 = vmax.f32 %v255_v14, %v256_v15  ;;  %v79_v43 = vld [vmem:[%s1095_s0 + $0x238] sm:$0xff]  ;;  %v32_v47 = vld [vmem:[%s1095_s0 + $0xc0] sm:$0xff]  ;;  %v126_v50 = vld [vmem:[%s1095_s0 + $0x3b0] sm:$0xff] }
  0x19   :  { %v244_v17 = vmax.f32 %v242_v7, %v243_v2  ;;  %v258_v20 = vsel %vm152_vm0, %v46_v3, -inf  ;;  %v247_v25 = vsel %vm152_vm0, %v93_v6, -inf  ;;  %v260_v26 = vsel %vm152_vm0, %v62_v9, -inf  ;;  %v95_v56 = vld [vmem:[%s1095_s0 + $0x2b8] sm:$0xff]  ;;  %v48_v58 = vld [vmem:[%s1095_s0 + $0x140] sm:$0xff]  ;;  %v142_v60 = vld [vmem:[%s1095_s0 + $0x430] sm:$0xff] }
  0x1a   :  { %v220_v23 = vmax.f32 %v218_v10, %v219_v4  ;;  %v233_v24 = vmax.f32 %v231_v12, %v232_v5  ;;  %v236_v28 = vsel %vm152_vm0, %v140_v11, -inf  ;;  %v249_v31 = vsel %vm152_vm0, %v109_v13, -inf  ;;  %v64_v59 = vld [vmem:[%s1095_s0 + $0x1c0] sm:$0xff]  ;;  %v111_v3 = vld [vmem:[%s1095_s0 + $0x338] sm:$0xff]  ;;  %v17_v7 = vld [vmem:[%s1095_s0 + $0x48] sm:$0xff] }
  0x1b   :  { %v246_v30 = vmax.f32 %v244_v17, %v245_v8  ;;  %v259_v33 = vmax.f32 %v257_v19, %v258_v20  ;;  %v262_v38 = vsel %vm152_vm0, %v78_v18, -inf  ;;  %v272_v39 = vsel %vm152_vm0, %v15_v21, -inf  ;;  %v80_v5 = vld [vmem:[%s1095_s0 + $0x240] sm:$0xff]  ;;  %v33_v12 = vld [vmem:[%s1095_s0 + $0xc8] sm:$0xff]  ;;  %v127_v15 = vld [vmem:[%s1095_s0 + $0x3b8] sm:$0xff] }
  0x1c   :  { %428 = vst.msk [vmem:[%s1096_s1 + $0x18] sm:$0xff] %vm152_vm0, %v220_v23  ;;  %v235_v35 = vmax.f32 %v233_v24, %v234_v16  ;;  %v273_v40 = vsel %vm152_vm0, %v31_v22, -inf  ;;  %v275_v45 = vsel %vm152_vm0, %v47_v27, -inf  ;;  %v251_v49 = vsel %vm152_vm0, %v125_v29, -inf  ;;  %v96_v17 = vld [vmem:[%s1095_s0 + $0x2c0] sm:$0xff]  ;;  %v49_v19 = vld [vmem:[%s1095_s0 + $0x148] sm:$0xff] }
  0x1d   :  { %v248_v41 = vmax.f32 %v246_v30, %v247_v25  ;;  %v261_v42 = vmax.f32 %v259_v33, %v260_v26  ;;  %v274_v44 = vmax.f32 %v272_v39, %v273_v40  ;;  %v264_v51 = vsel %vm152_vm0, %v94_v32, -inf  ;;  %v65_v23 = vld [vmem:[%s1095_s0 + $0x1c8] sm:$0xff]  ;;  %v143_v26 = vld [vmem:[%s1095_s0 + $0x438] sm:$0xff]  ;;  %v128_v40 = vld [vmem:[%s1095_s0 + $0x3c0] sm:$0xff] }
  0x1e   :  { %v237_v48 = vmax.f32 %v235_v35, %v236_v28  ;;  %v277_v52 = vsel %vm152_vm0, %v63_v34, -inf  ;;  %v253_v54 = vsel %vm152_vm0, %v141_v36, -inf  ;;  %v266_v61 = vsel %vm152_vm0, %v110_v37, -inf  ;;  %v112_v28 = vld [vmem:[%s1095_s0 + $0x340] sm:$0xff]  ;;  %v81_v30 = vld [vmem:[%s1095_s0 + $0x248] sm:$0xff]  ;;  %v18_v36 = vld [vmem:[%s1095_s0 + $0x50] sm:$0xff] }
  0x1f   :  { %v250_v53 = vmax.f32 %v248_v41, %v249_v31  ;;  %v263_v55 = vmax.f32 %v261_v42, %v262_v38  ;;  %v276_v57 = vmax.f32 %v274_v44, %v275_v45  ;;  %v279_v62 = vsel %vm152_vm0, %v79_v43, -inf  ;;  %v34_v37 = vld [vmem:[%s1095_s0 + $0xd0] sm:$0xff] }
  0x20   :  { %429 = vst.msk [vmem:[%s1096_s1 + $0x20] sm:$0xff] %vm152_vm0, %v237_v48  ;;  %v289_v63 = vsel %vm152_vm0, %v16_v46, -inf  ;;  %v290_v0 = vsel %vm152_vm0, %v32_v47, -inf  ;;  %v268_v8 = vsel %vm152_vm0, %v126_v50, -inf  ;;  %v281_v9 = vsel %vm152_vm0, %v95_v56, -inf  ;;  %v50_v43 = vld [vmem:[%s1095_s0 + $0x150] sm:$0xff] }
  0x21   :  { %v252_v1 = vmax.f32 %v250_v53, %v251_v49  ;;  %v265_v2 = vmax.f32 %v263_v55, %v264_v51  ;;  %v278_v4 = vmax.f32 %v276_v57, %v277_v52  ;;  %v291_v6 = vmax.f32 %v289_v63, %v290_v0  ;;  %v97_v46 = vld [vmem:[%s1095_s0 + $0x2c8] sm:$0xff]  ;;  %v66_v49 = vld [vmem:[%s1095_s0 + $0x1d0] sm:$0xff]  ;;  %v144_v51 = vld [vmem:[%s1095_s0 + $0x440] sm:$0xff] }
  0x22   :  { %v292_v10 = vsel %vm152_vm0, %v48_v58, -inf  ;;  %v294_v11 = vsel %vm152_vm0, %v64_v59, -inf  ;;  %v270_v20 = vsel %vm152_vm0, %v142_v60, -inf  ;;  %v283_v21 = vsel %vm152_vm0, %v111_v3, -inf  ;;  %v113_v53 = vld [vmem:[%s1095_s0 + $0x348] sm:$0xff]  ;;  %v82_v58 = vld [vmem:[%s1095_s0 + $0x250] sm:$0xff] }
  0x23   :  { %v254_v13 = vmax.f32 %v252_v1, %v253_v54  ;;  %v267_v14 = vmax.f32 %v265_v2, %v266_v61  ;;  %v280_v16 = vmax.f32 %v278_v4, %v279_v62  ;;  %v293_v18 = vmax.f32 %v291_v6, %v292_v10  ;;  %v19_v61 = vld [vmem:[%s1095_s0 + $0x58] sm:$0xff] }
  0x24   :  { %v296_v22 = vsel %vm152_vm0, %v80_v5, -inf  ;;  %v306_v24 = vsel %vm152_vm0, %v17_v7, -inf  ;;  %v307_v31 = vsel %vm152_vm0, %v33_v12, -inf  ;;  %v285_v32 = vsel %vm152_vm0, %v127_v15, -inf  ;;  %v35_v62 = vld [vmem:[%s1095_s0 + $0xd8] sm:$0xff]  ;;  %v129_v5 = vld [vmem:[%s1095_s0 + $0x3c8] sm:$0xff] }
  0x25   :  { %430 = vst.msk [vmem:[%s1096_s1 + $0x28] sm:$0xff] %vm152_vm0, %v254_v13  ;;  %v269_v25 = vmax.f32 %v267_v14, %v268_v8  ;;  %v282_v27 = vmax.f32 %v280_v16, %v281_v9  ;;  %v295_v29 = vmax.f32 %v293_v18, %v294_v11  ;;  %v298_v33 = vsel %vm152_vm0, %v96_v17, -inf  ;;  %v51_v3 = vld [vmem:[%s1095_s0 + $0x158] sm:$0xff]  ;;  %v98_v8 = vld [vmem:[%s1095_s0 + $0x2d0] sm:$0xff]  ;;  %v145_v12 = vld [vmem:[%s1095_s0 + $0x448] sm:$0xff] }
  0x26   :  { %v308_v34 = vmax.f32 %v306_v24, %v307_v31  ;;  %v309_v35 = vsel %vm152_vm0, %v49_v19, -inf  ;;  %v311_v42 = vsel %vm152_vm0, %v65_v23, -inf  ;;  %v287_v44 = vsel %vm152_vm0, %v143_v26, -inf  ;;  %v67_v10 = vld [vmem:[%s1095_s0 + $0x1d8] sm:$0xff]  ;;  %v114_v13 = vld [vmem:[%s1095_s0 + $0x350] sm:$0xff]  ;;  %v36_v23 = vld [vmem:[%s1095_s0 + $0xe0] sm:$0xff] }
  0x27   :  { %v271_v38 = vmax.f32 %v269_v25, %v270_v20  ;;  %v284_v39 = vmax.f32 %v282_v27, %v283_v21  ;;  %v297_v41 = vmax.f32 %v295_v29, %v296_v22  ;;  %v300_v45 = vsel %vm152_vm0, %v112_v28, -inf  ;;  %v83_v19 = vld [vmem:[%s1095_s0 + $0x258] sm:$0xff]  ;;  %v20_v22 = vld [vmem:[%s1095_s0 + $0x60] sm:$0xff]  ;;  %v130_v26 = vld [vmem:[%s1095_s0 + $0x3d0] sm:$0xff] }
  0x28   :  { %v310_v47 = vmax.f32 %v308_v34, %v309_v35  ;;  %v313_v48 = vsel %vm152_vm0, %v81_v30, -inf  ;;  %v323_v54 = vsel %vm152_vm0, %v18_v36, -inf  ;;  %v324_v55 = vsel %vm152_vm0, %v34_v37, -inf  ;;  %v52_v34 = vld [vmem:[%s1095_s0 + $0x160] sm:$0xff]  ;;  %v146_v36 = vld [vmem:[%s1095_s0 + $0x450] sm:$0xff] }
  0x29   :  { %431 = vst.msk [vmem:[%s1096_s1 + $0x30] sm:$0xff] %vm152_vm0, %v271_v38  ;;  %v286_v50 = vmax.f32 %v284_v39, %v285_v32  ;;  %v299_v52 = vmax.f32 %v297_v41, %v298_v33  ;;  %v302_v56 = vsel %vm152_vm0, %v128_v40, -inf  ;;  %v325_v59 = vmax.f32 %v323_v54, %v324_v55  ;;  %v99_v32 = vld [vmem:[%s1095_s0 + $0x2d8] sm:$0xff]  ;;  %v68_v35 = vld [vmem:[%s1095_s0 + $0x1e0] sm:$0xff] }
  0x2a   :  { %v312_v57 = vmax.f32 %v310_v47, %v311_v42  ;;  %v326_v60 = vsel %vm152_vm0, %v50_v43, -inf  ;;  %v315_v1 = vsel %vm152_vm0, %v97_v46, -inf  ;;  %v328_v2 = vsel %vm152_vm0, %v66_v49, -inf  ;;  %v115_v43 = vld [vmem:[%s1095_s0 + $0x358] sm:$0xff]  ;;  %v21_v47 = vld [vmem:[%s1095_s0 + $0x68] sm:$0xff] }
  0x2b   :  { %v288_v63 = vmax.f32 %v286_v50, %v287_v44  ;;  %v301_v0 = vmax.f32 %v299_v52, %v300_v45  ;;  %v304_v4 = vsel %vm152_vm0, %v144_v51, -inf  ;;  %v317_v7 = vsel %vm152_vm0, %v113_v53, -inf  ;;  %v84_v45 = vld [vmem:[%s1095_s0 + $0x260] sm:$0xff]  ;;  %v37_v52 = vld [vmem:[%s1095_s0 + $0xe8] sm:$0xff]  ;;  %v131_v55 = vld [vmem:[%s1095_s0 + $0x3d8] sm:$0xff] }
  0x2c   :  { %v314_v6 = vmax.f32 %v312_v57, %v313_v48  ;;  %v327_v9 = vmax.f32 %v325_v59, %v326_v60  ;;  %v330_v14 = vsel %vm152_vm0, %v82_v58, -inf  ;;  %v340_v15 = vsel %vm152_vm0, %v19_v61, -inf  ;;  %v100_v57 = vld [vmem:[%s1095_s0 + $0x2e0] sm:$0xff]  ;;  %v53_v59 = vld [vmem:[%s1095_s0 + $0x168] sm:$0xff] }
  0x2d   :  { %432 = vst.msk [vmem:[%s1096_s1 + $0x38] sm:$0xff] %vm152_vm0, %v288_v63  ;;  %v303_v11 = vmax.f32 %v301_v0, %v302_v56  ;;  %v341_v16 = vsel %vm152_vm0, %v35_v62, -inf  ;;  %v343_v21 = vsel %vm152_vm0, %v51_v3, -inf  ;;  %v319_v25 = vsel %vm152_vm0, %v129_v5, -inf  ;;  %v69_v63 = vld [vmem:[%s1095_s0 + $0x1e8] sm:$0xff] }
  0x2e   :  { %v316_v17 = vmax.f32 %v314_v6, %v315_v1  ;;  %v329_v18 = vmax.f32 %v327_v9, %v328_v2  ;;  %v342_v20 = vmax.f32 %v340_v15, %v341_v16  ;;  %v332_v27 = vsel %vm152_vm0, %v98_v8, -inf  ;;  %v147_v2 = vld [vmem:[%s1095_s0 + $0x458] sm:$0xff]  ;;  %v85_v6 = vld [vmem:[%s1095_s0 + $0x268] sm:$0xff]  ;;  %v132_v16 = vld [vmem:[%s1095_s0 + $0x3e0] sm:$0xff] }
  0x2f   :  { %v305_v24 = vmax.f32 %v303_v11, %v304_v4  ;;  %v345_v28 = vsel %vm152_vm0, %v67_v10, -inf  ;;  %v321_v30 = vsel %vm152_vm0, %v145_v12, -inf  ;;  %v334_v37 = vsel %vm152_vm0, %v114_v13, -inf  ;;  %v116_v4 = vld [vmem:[%s1095_s0 + $0x360] sm:$0xff]  ;;  %v22_v12 = vld [vmem:[%s1095_s0 + $0x70] sm:$0xff] }
  0x30   :  { %v318_v29 = vmax.f32 %v316_v17, %v317_v7  ;;  %v331_v31 = vmax.f32 %v329_v18, %v330_v14  ;;  %v344_v33 = vmax.f32 %v342_v20, %v343_v21  ;;  %v347_v38 = vsel %vm152_vm0, %v83_v19, -inf  ;;  %v38_v13 = vld [vmem:[%s1095_s0 + $0xf0] sm:$0xff] }
  0x31   :  { %433 = vst.msk [vmem:[%s1096_s1 + $0x40] sm:$0xff] %vm152_vm0, %v305_v24  ;;  %v357_v39 = vsel %vm152_vm0, %v20_v22, -inf  ;;  %v358_v40 = vsel %vm152_vm0, %v36_v23, -inf  ;;  %v336_v48 = vsel %vm152_vm0, %v130_v26, -inf  ;;  %v349_v49 = vsel %vm152_vm0, %v99_v32, -inf  ;;  %v54_v19 = vld [vmem:[%s1095_s0 + $0x170] sm:$0xff] }
  0x32   :  { %v320_v41 = vmax.f32 %v318_v29, %v319_v25  ;;  %v333_v42 = vmax.f32 %v331_v31, %v332_v27  ;;  %v346_v44 = vmax.f32 %v344_v33, %v345_v28  ;;  %v359_v46 = vmax.f32 %v357_v39, %v358_v40  ;;  %v101_v22 = vld [vmem:[%s1095_s0 + $0x2e8] sm:$0xff]  ;;  %v70_v25 = vld [vmem:[%s1095_s0 + $0x1f0] sm:$0xff]  ;;  %v148_v27 = vld [vmem:[%s1095_s0 + $0x460] sm:$0xff] }
  0x33   :  { %v360_v50 = vsel %vm152_vm0, %v52_v34, -inf  ;;  %v362_v51 = vsel %vm152_vm0, %v68_v35, -inf  ;;  %v338_v60 = vsel %vm152_vm0, %v146_v36, -inf  ;;  %v351_v61 = vsel %vm152_vm0, %v115_v43, -inf  ;;  %v117_v29 = vld [vmem:[%s1095_s0 + $0x368] sm:$0xff]  ;;  %v86_v34 = vld [vmem:[%s1095_s0 + $0x270] sm:$0xff] }
  0x34   :  { %v322_v53 = vmax.f32 %v320_v41, %v321_v30  ;;  %v335_v54 = vmax.f32 %v333_v42, %v334_v37  ;;  %v348_v56 = vmax.f32 %v346_v44, %v347_v38  ;;  %v361_v58 = vmax.f32 %v359_v46, %v360_v50  ;;  %v23_v37 = vld [vmem:[%s1095_s0 + $0x78] sm:$0xff] }
  0x35   :  { %v364_v62 = vsel %vm152_vm0, %v84_v45, -inf  ;;  %v374_v0 = vsel %vm152_vm0, %v21_v47, -inf  ;;  %v375_v7 = vsel %vm152_vm0, %v37_v52, -inf  ;;  %v353_v8 = vsel %vm152_vm0, %v131_v55, -inf  ;;  %v39_v38 = vld [vmem:[%s1095_s0 + $0xf8] sm:$0xff]  ;;  %v133_v45 = vld [vmem:[%s1095_s0 + $0x3e8] sm:$0xff] }
  0x36   :  { %434 = vst.msk [vmem:[%s1096_s1 + $0x48] sm:$0xff] %vm152_vm0, %v322_v53  ;;  %v337_v1 = vmax.f32 %v335_v54, %v336_v48  ;;  %v350_v3 = vmax.f32 %v348_v56, %v349_v49  ;;  %v363_v5 = vmax.f32 %v361_v58, %v362_v51  ;;  %v366_v9 = vsel %vm152_vm0, %v100_v57, -inf  ;;  %v55_v43 = vld [vmem:[%s1095_s0 + $0x178] sm:$0xff]  ;;  %v102_v48 = vld [vmem:[%s1095_s0 + $0x2f0] sm:$0xff]  ;;  %v149_v55 = vld [vmem:[%s1095_s0 + $0x468] sm:$0xff] }
  0x37   :  { %v376_v10 = vmax.f32 %v374_v0, %v375_v7  ;;  %v377_v11 = vsel %vm152_vm0, %v53_v59, -inf  ;;  %v379_v18 = vsel %vm152_vm0, %v69_v63, -inf  ;;  %v355_v20 = vsel %vm152_vm0, %v147_v2, -inf  ;;  %v71_v50 = vld [vmem:[%s1095_s0 + $0x1f8] sm:$0xff]  ;;  %v118_v57 = vld [vmem:[%s1095_s0 + $0x370] sm:$0xff] }
  0x38   :  { %v339_v14 = vmax.f32 %v337_v1, %v338_v60  ;;  %v352_v15 = vmax.f32 %v350_v3, %v351_v61  ;;  %v365_v17 = vmax.f32 %v363_v5, %v364_v62  ;;  %v368_v21 = vsel %vm152_vm0, %v116_v4, -inf  ;;  %v87_v59 = vld [vmem:[%s1095_s0 + $0x278] sm:$0xff]  ;;  %v134_v3 = vld [vmem:[%s1095_s0 + $0x3f0] sm:$0xff] }
  0x39   :  { %v378_v23 = vmax.f32 %v376_v10, %v377_v11  ;;  %v381_v24 = vsel %vm152_vm0, %v85_v6, -inf  ;;  %v391_v30 = vsel %vm152_vm0, %v22_v12, -inf  ;;  %v392_v31 = vsel %vm152_vm0, %v38_v13, -inf  ;;  %v103_v5 = vld [vmem:[%s1095_s0 + $0x2f8] sm:$0xff]  ;;  %v150_v11 = vld [vmem:[%s1095_s0 + $0x470] sm:$0xff] }
  0x3a   :  { %435 = vst.msk [vmem:[%s1096_s1 + $0x50] sm:$0xff] %vm152_vm0, %v339_v14  ;;  %v354_v26 = vmax.f32 %v352_v15, %v353_v8  ;;  %v367_v28 = vmax.f32 %v365_v17, %v366_v9  ;;  %v370_v32 = vsel %vm152_vm0, %v132_v16, -inf  ;;  %v393_v35 = vmax.f32 %v391_v30, %v392_v31  ;;  %v119_v13 = vld [vmem:[%s1095_s0 + $0x378] sm:$0xff] }
  0x3b   :  { %v380_v33 = vmax.f32 %v378_v23, %v379_v18  ;;  %v394_v36 = vsel %vm152_vm0, %v54_v19, -inf  ;;  %v383_v41 = vsel %vm152_vm0, %v101_v22, -inf  ;;  %v396_v42 = vsel %vm152_vm0, %v70_v25, -inf  ;;  %v135_v19 = vld [vmem:[%s1095_s0 + $0x3f8] sm:$0xff] }
  0x3c   :  { %v356_v39 = vmax.f32 %v354_v26, %v355_v20  ;;  %v369_v40 = vmax.f32 %v367_v28, %v368_v21  ;;  %v372_v44 = vsel %vm152_vm0, %v148_v27, -inf  ;;  %v385_v47 = vsel %vm152_vm0, %v117_v29, -inf }
  0x3d   :  { %v382_v46 = vmax.f32 %v380_v33, %v381_v24  ;;  %v395_v49 = vmax.f32 %v393_v35, %v394_v36  ;;  %v398_v52 = vsel %vm152_vm0, %v86_v34, -inf  ;;  %v408_v53 = vsel %vm152_vm0, %v23_v37, -inf  ;;  %v151_v24 = vld [vmem:[%s1095_s0 + $0x478] sm:$0xff] }
  0x3e   :  { %436 = vst.msk [vmem:[%s1096_s1 + $0x58] sm:$0xff] %vm152_vm0, %v356_v39  ;;  %v371_v51 = vmax.f32 %v369_v40, %v370_v32  ;;  %v409_v54 = vsel %vm152_vm0, %v39_v38, -inf  ;;  %v411_v61 = vsel %vm152_vm0, %v55_v43, -inf  ;;  %v387_v63 = vsel %vm152_vm0, %v133_v45, -inf }
  0x3f   :  { %v384_v56 = vmax.f32 %v382_v46, %v383_v41  ;;  %v397_v58 = vmax.f32 %v395_v49, %v396_v42  ;;  %v410_v60 = vmax.f32 %v408_v53, %v409_v54  ;;  %v400_v0 = vsel %vm152_vm0, %v102_v48, -inf }
  0x40   :  { %v373_v62 = vmax.f32 %v371_v51, %v372_v44  ;;  %v413_v1 = vsel %vm152_vm0, %v71_v50, -inf  ;;  %v389_v7 = vsel %vm152_vm0, %v149_v55, -inf  ;;  %v402_v8 = vsel %vm152_vm0, %v118_v57, -inf }
  0x41   :  { %v386_v2 = vmax.f32 %v384_v56, %v385_v47  ;;  %v399_v4 = vmax.f32 %v397_v58, %v398_v52  ;;  %v412_v6 = vmax.f32 %v410_v60, %v411_v61  ;;  %v415_v9 = vsel %vm152_vm0, %v87_v59, -inf }
  0x42   :  { %437 = vst.msk [vmem:[%s1096_s1 + $0x60] sm:$0xff] %vm152_vm0, %v373_v62  ;;  %v404_v15 = vsel %vm152_vm0, %v134_v3, -inf  ;;  %v417_v16 = vsel %vm152_vm0, %v103_v5, -inf  ;;  %v406_v21 = vsel %vm152_vm0, %v150_v11, -inf  ;;  %v419_v22 = vsel %vm152_vm0, %v119_v13, -inf }
  0x43   :  { %v388_v10 = vmax.f32 %v386_v2, %v387_v63  ;;  %v401_v12 = vmax.f32 %v399_v4, %v400_v0  ;;  %v414_v14 = vmax.f32 %v412_v6, %v413_v1  ;;  %v421_v26 = vsel %vm152_vm0, %v135_v19, -inf }
  0x44   :  { %v423_v29 = vsel %vm152_vm0, %v151_v24, -inf }
  0x45   :  { %v390_v17 = vmax.f32 %v388_v10, %v389_v7  ;;  %v403_v18 = vmax.f32 %v401_v12, %v402_v8  ;;  %v416_v20 = vmax.f32 %v414_v14, %v415_v9 }
  0x47   :  { %438 = vst.msk [vmem:[%s1096_s1 + $0x68] sm:$0xff] %vm152_vm0, %v390_v17  ;;  %v405_v23 = vmax.f32 %v403_v18, %v404_v15  ;;  %v418_v25 = vmax.f32 %v416_v20, %v417_v16 }
  0x49   :  { %v407_v27 = vmax.f32 %v405_v23, %v406_v21  ;;  %v420_v28 = vmax.f32 %v418_v25, %v419_v22 }
  0x4b   :  { %439 = vst.msk [vmem:[%s1096_s1 + $0x70] sm:$0xff] %vm152_vm0, %v407_v27  ;;  %v422_v30 = vmax.f32 %v420_v28, %v421_v26 }
  0x4d   :  { %v424_v31 = vmax.f32 %v422_v30, %v423_v29 }
  0x4f   :  { %440 = vst.msk [vmem:[%s1096_s1 + $0x78] sm:$0xff] %vm152_vm0, %v424_v31 }

// kernel: resnet_forward.23
= control target key start
LH: loop header
LB: loop body
LE: loop exit
PB: predicated region body
PF: predicated region fallthrough
CT: control target
= control target key end

     0   :  { %vm114_vm0 = vcmask 588800   ;;  %vm139_vm1 = vcmask 1043456   ;;  %s480_s1 = inlined_call_operand.vmem [shape: bf16[72,128], index: 1, kind: input, shape index: {}]   ;;  %s481_s0 = inlined_call_operand.vmem [shape: bf16[128,72], index: 0, kind: input, shape index: {}]   ;;  %s482_s2 = inlined_call_operand.vmem [shape: f32[1,128], index: 2, kind: input, shape index: {}]   ;;  %s483_s3 = inlined_call_operand.vmem [shape: f32[128,128], index: 3, kind: output, shape index: {}]  }
   0x1   :  { %v349_v0 = vld [vmem:[%s480_s1] sm:$0xff]   ;;  %v350_v1 = vld [vmem:[%s480_s1 + $0x8] sm:$0xff]   ;;  %v351_v2 = vld [vmem:[%s480_s1 + $0x10] sm:$0xff]  }
   0x2   :  { %311 = vmatprep.subr.bf16.mxu0 %v349_v0  ;;  %337 = vmatprep.subr.bf16.mxu1 %v349_v0  ;;  %v354_v3 = vld [vmem:[%s481_s0] sm:$0xff]   ;;  %v352_v5 = vld [vmem:[%s480_s1 + $0x18] sm:$0xff]   ;;  %v356_v8 = vld [vmem:[%s481_s0 + $0x8] sm:$0xff]  }
   0x3   :  { %312 = vmatpush3.bf16.msra.mxu0 %v349_v0  ;;  %342 = vmatpush3.bf16.msra.mxu1 %v349_v0  ;;  %v355_v4 = vld [vmem:[%s481_s0 + $0x20] sm:$0xff]   ;;  %v357_v9 = vld [vmem:[%s481_s0 + $0x28] sm:$0xff]   ;;  %v358_v10 = vld [vmem:[%s481_s0 + $0x10] sm:$0xff]  }
   0x4   :  { %313 = vmatprep.subr.bf16.mxu0 %v350_v1  ;;  %338 = vmatprep.subr.bf16.mxu1 %v350_v1  ;;  %v353_v6 = vld [vmem:[%s480_s1 + $0x20] ss:$0 sps:$4 sm:$0xff]   ;;  %v359_v11 = vld [vmem:[%s481_s0 + $0x30] sm:$0xff]   ;;  %v360_v12 = vld [vmem:[%s481_s0 + $0x18] sm:$0xff]  }
   0x5   :  { %321 = vmatprep.mubr.msk.bf16.mxu0 %vm114_vm0, %v354_v3  ;;  %329 = vmatprep.mubr.msk.bf16.mxu1 %vm114_vm0, %v355_v4  ;;  %v141_v7 = vsel %vm139_vm1, %v353_v6, 0  ;;  %v361_v13 = vld [vmem:[%s481_s0 + $0x38] sm:$0xff]   ;;  %v276_v14 = vld [vmem:[%s482_s2] ss:$0 sm:$0xff] }
   0x7   :  { %314 = vmatpush3.bf16.msra.mxu0 %v350_v1  ;;  %343 = vmatpush3.bf16.msra.mxu1 %v350_v1 }
   0x8   :  { %315 = vmatprep.subr.bf16.mxu0 %v351_v2  ;;  %339 = vmatprep.subr.bf16.mxu1 %v351_v2 }
   0xb   :  { %316 = vmatpush3.bf16.msra.mxu0 %v351_v2  ;;  %344 = vmatpush3.bf16.msra.mxu1 %v351_v2 }
   0xc   :  { %317 = vmatprep.subr.bf16.mxu0 %v352_v5  ;;  %340 = vmatprep.subr.bf16.mxu1 %v352_v5 }
   0xf   :  { %318 = vmatpush3.bf16.msra.mxu0 %v352_v5  ;;  %345 = vmatpush3.bf16.msra.mxu1 %v352_v5 }
  0x10   :  { %347 = vmatprep.subr.msk.bf16.mxu0 %vm139_vm1, %v353_v6  ;;  %348 = vmatprep.subr.msk.bf16.mxu1 %vm139_vm1, %v353_v6 }
  0x13   :  { %320 = vmatpush3.bf16.msra.mxu0 %v141_v7  ;;  %346 = vmatpush3.bf16.msra.mxu1 %v141_v7 }
  0x16   :  { %322 = vmatmul.mubr.msk.bf16.vlgmr.msra.gmra.mrb[0].mxu0 %vm114_vm0, %v356_v8  ;;  %330 = vmatmul.mubr.msk.bf16.vlgmr.msra.gmra.mrb[0].mxu1 %vm114_vm0, %v357_v9 }
  0x17   :  { %325 = vmatprep.mubr.msk.bf16.mxu0 %vm114_vm0, %v358_v10  ;;  %333 = vmatprep.mubr.msk.bf16.mxu1 %vm114_vm0, %v359_v11 }
  0x1e   :  { %326 = vmatmul.mubr.msk.bf16.gmra.mrb[4].mxu0 %vm114_vm0, %v360_v12  ;;  %334 = vmatmul.mubr.msk.bf16.gmra.mrb[4].mxu1 %vm114_vm0, %v361_v13 }
  0xe9   :  { %v323_v15 = vpop.f32.mrb[0].mxu0  ;;  %v331_v16 = vpop.f32.mrb[0].mxu1 }
  0xea   :  { %v186_v17 = vadd.f32 %v323_v15, %v276_v14  ;;  %v218_v18 = vadd.f32 %v331_v16, %v276_v14  ;;  %v177_v19 = vpop.f32.mrb[1].mxu0  ;;  %v209_v20 = vpop.f32.mrb[1].mxu1 }
  0xeb   :  { %v178_v21 = vadd.f32 %v276_v14, %v177_v19  ;;  %v210_v22 = vadd.f32 %v276_v14, %v209_v20  ;;  %v324_v23 = vpop.f32.mrb[2].mxu0  ;;  %v332_v24 = vpop.f32.mrb[2].mxu1 }
  0xec   :  { %v242_v25 = vmax.f32 %v186_v17, 0.0  ;;  %v250_v26 = vmax.f32 %v218_v18, 0.0  ;;  %v189_v27 = vadd.f32 %v324_v23, %v276_v14  ;;  %v221_v28 = vadd.f32 %v332_v24, %v276_v14  ;;  %v180_v29 = vpop.f32.mrb[3].mxu0  ;;  %v212_v30 = vpop.f32.mrb[3].mxu1 }
  0xed   :  { %v240_v31 = vmax.f32 %v178_v21, 0.0  ;;  %v248_v32 = vmax.f32 %v210_v22, 0.0  ;;  %v181_v33 = vadd.f32 %v276_v14, %v180_v29  ;;  %v213_v34 = vadd.f32 %v276_v14, %v212_v30 }
  0xee   :  { %258 = vst [vmem:[%s483_s3 + $0x10] sm:$0xff] %v242_v25  ;;  %266 = vst [vmem:[%s483_s3 + $0x50] sm:$0xff] %v250_v26  ;;  %v243_v35 = vmax.f32 %v189_v27, 0.0  ;;  %v251_v36 = vmax.f32 %v221_v28, 0.0 }
  0xef   :  { %256 = vst [vmem:[%s483_s3] sm:$0xff] %v240_v31  ;;  %264 = vst [vmem:[%s483_s3 + $0x40] sm:$0xff] %v248_v32  ;;  %v241_v37 = vmax.f32 %v181_v33, 0.0  ;;  %v249_v38 = vmax.f32 %v213_v34, 0.0 }
  0xf0   :  { %259 = vst [vmem:[%s483_s3 + $0x18] sm:$0xff] %v243_v35  ;;  %267 = vst [vmem:[%s483_s3 + $0x58] sm:$0xff] %v251_v36 }
  0xf1   :  { %257 = vst [vmem:[%s483_s3 + $0x8] sm:$0xff] %v241_v37  ;;  %265 = vst [vmem:[%s483_s3 + $0x48] sm:$0xff] %v249_v38  ;;  %v327_v39 = vpop.f32.mrb[4].mxu0  ;;  %v335_v40 = vpop.f32.mrb[4].mxu1 }
  0xf2   :  { %v202_v41 = vadd.f32 %v327_v39, %v276_v14  ;;  %v234_v42 = vadd.f32 %v335_v40, %v276_v14  ;;  %v193_v43 = vpop.f32.mrb[5].mxu0  ;;  %v225_v44 = vpop.f32.mrb[5].mxu1 }
  0xf3   :  { %v194_v45 = vadd.f32 %v276_v14, %v193_v43  ;;  %v226_v46 = vadd.f32 %v276_v14, %v225_v44  ;;  %v328_v47 = vpop.f32.mrb[6].mxu0  ;;  %v336_v48 = vpop.f32.mrb[6].mxu1 }
  0xf4   :  { %v246_v49 = vmax.f32 %v202_v41, 0.0  ;;  %v254_v50 = vmax.f32 %v234_v42, 0.0  ;;  %v205_v51 = vadd.f32 %v328_v47, %v276_v14  ;;  %v237_v52 = vadd.f32 %v336_v48, %v276_v14  ;;  %v196_v53 = vpop.f32.mrb[7].mxu0  ;;  %v228_v54 = vpop.f32.mrb[7].mxu1 }
  0xf5   :  { %v244_v55 = vmax.f32 %v194_v45, 0.0  ;;  %v252_v56 = vmax.f32 %v226_v46, 0.0  ;;  %v197_v57 = vadd.f32 %v276_v14, %v196_v53  ;;  %v229_v58 = vadd.f32 %v276_v14, %v228_v54 }
  0xf6   :  { %262 = vst [vmem:[%s483_s3 + $0x30] sm:$0xff] %v246_v49  ;;  %270 = vst [vmem:[%s483_s3 + $0x70] sm:$0xff] %v254_v50  ;;  %v247_v59 = vmax.f32 %v205_v51, 0.0  ;;  %v255_v60 = vmax.f32 %v237_v52, 0.0 }
  0xf7   :  { %260 = vst [vmem:[%s483_s3 + $0x20] sm:$0xff] %v244_v55  ;;  %268 = vst [vmem:[%s483_s3 + $0x60] sm:$0xff] %v252_v56  ;;  %v245_v61 = vmax.f32 %v197_v57, 0.0  ;;  %v253_v62 = vmax.f32 %v229_v58, 0.0 }
  0xf8   :  { %263 = vst [vmem:[%s483_s3 + $0x38] sm:$0xff] %v247_v59  ;;  %271 = vst [vmem:[%s483_s3 + $0x78] sm:$0xff] %v255_v60 }
  0xf9   :  { %261 = vst [vmem:[%s483_s3 + $0x28] sm:$0xff] %v245_v61  ;;  %269 = vst [vmem:[%s483_s3 + $0x68] sm:$0xff] %v253_v62 }

// kernel: resnet_forward.24
= control target key start
LH: loop header
LB: loop body
LE: loop exit
PB: predicated region body
PF: predicated region fallthrough
CT: control target
= control target key end

     0   :  { %vm104_vm0 = vcmask 1043456   ;;  %vm79_vm1 = vcmask 64512   ;;  %s387_s1 = inlined_call_operand.vmem [shape: bf16[8,128], index: 1, kind: input, shape index: {}]   ;;  %s388_s0 = inlined_call_operand.vmem [shape: bf16[128,8], index: 0, kind: input, shape index: {}]   ;;  %s389_s2 = inlined_call_operand.vmem [shape: f32[1,128], index: 2, kind: input, shape index: {}]   ;;  %s390_s3 = inlined_call_operand.vmem [shape: f32[128,128], index: 3, kind: output, shape index: {}]  }
   0x1   :  { %v31_v0 = vld [vmem:[%s387_s1] sm:$0xf]  ;;  %v275_v4 = vld [vmem:[%s388_s0 + $0x8] sm:$0xff]   ;;  %v277_v6 = vld [vmem:[%s388_s0 + $0x10] sm:$0xff]  }
   0x2   :  { %271 = vmatprep.subr.msk.bf16.mxu0 %vm104_vm0, %v31_v0  ;;  %272 = vmatprep.subr.msk.bf16.mxu1 %vm104_vm0, %v31_v0  ;;  %v106_v1 = vsel %vm104_vm0, %v31_v0, 0  ;;  %v273_v2 = vld [vmem:[%s388_s0] sm:$0xff]   ;;  %v276_v5 = vld [vmem:[%s388_s0 + $0x28] sm:$0xff]   ;;  %v278_v7 = vld [vmem:[%s388_s0 + $0x30] sm:$0xff]  }
   0x3   :  { %252 = vmatpush3.bf16.msra.mxu0 %v106_v1  ;;  %270 = vmatpush3.bf16.msra.mxu1 %v106_v1  ;;  %v274_v3 = vld [vmem:[%s388_s0 + $0x20] sm:$0xff]   ;;  %v279_v8 = vld [vmem:[%s388_s0 + $0x18] sm:$0xff]  }
   0x4   :  { %253 = vmatprep.mubr.msk.bf16.mxu0 %vm79_vm1, %v273_v2  ;;  %261 = vmatprep.mubr.msk.bf16.mxu1 %vm79_vm1, %v274_v3  ;;  %v280_v9 = vld [vmem:[%s388_s0 + $0x38] sm:$0xff]   ;;  %v225_v10 = vld [vmem:[%s389_s2] ss:$0 sm:$0xff] }
   0x6   :  { %254 = vmatmul.mubr.msk.bf16.vlgmr.msra.gmra.mrb[0].mxu0 %vm79_vm1, %v275_v4  ;;  %262 = vmatmul.mubr.msk.bf16.vlgmr.msra.gmra.mrb[0].mxu1 %vm79_vm1, %v276_v5 }
   0x7   :  { %257 = vmatprep.mubr.msk.bf16.mxu0 %vm79_vm1, %v277_v6  ;;  %265 = vmatprep.mubr.msk.bf16.mxu1 %vm79_vm1, %v278_v7 }
   0xe   :  { %258 = vmatmul.mubr.msk.bf16.gmra.mrb[4].mxu0 %vm79_vm1, %v279_v8  ;;  %266 = vmatmul.mubr.msk.bf16.gmra.mrb[4].mxu1 %vm79_vm1, %v280_v9 }
  0xd9   :  { %v255_v11 = vpop.f32.mrb[0].mxu0  ;;  %v263_v13 = vpop.f32.mrb[0].mxu1 }
  0xda   :  { %v151_v12 = vadd.f32 %v255_v11, %v225_v10  ;;  %v142_v14 = vpop.f32.mrb[1].mxu0  ;;  %v183_v15 = vadd.f32 %v263_v13, %v225_v10  ;;  %v174_v17 = vpop.f32.mrb[1].mxu1 }
  0xdb   :  { %v143_v16 = vadd.f32 %v225_v10, %v142_v14  ;;  %v256_v18 = vpop.f32.mrb[2].mxu0  ;;  %v175_v19 = vadd.f32 %v225_v10, %v174_v17  ;;  %v264_v21 = vpop.f32.mrb[2].mxu1 }
  0xdc   :  { %207 = vst [vmem:[%s390_s3 + $0x10] sm:$0xff] %v151_v12  ;;  %v154_v20 = vadd.f32 %v256_v18, %v225_v10  ;;  %v145_v22 = vpop.f32.mrb[3].mxu0  ;;  %215 = vst [vmem:[%s390_s3 + $0x50] sm:$0xff] %v183_v15  ;;  %v186_v23 = vadd.f32 %v264_v21, %v225_v10  ;;  %v177_v25 = vpop.f32.mrb[3].mxu1 }
  0xdd   :  { %205 = vst [vmem:[%s390_s3] sm:$0xff] %v143_v16  ;;  %v146_v24 = vadd.f32 %v225_v10, %v145_v22  ;;  %213 = vst [vmem:[%s390_s3 + $0x40] sm:$0xff] %v175_v19  ;;  %v178_v26 = vadd.f32 %v225_v10, %v177_v25 }
  0xde   :  { %208 = vst [vmem:[%s390_s3 + $0x18] sm:$0xff] %v154_v20  ;;  %216 = vst [vmem:[%s390_s3 + $0x58] sm:$0xff] %v186_v23 }
  0xdf   :  { %206 = vst [vmem:[%s390_s3 + $0x8] sm:$0xff] %v146_v24  ;;  %214 = vst [vmem:[%s390_s3 + $0x48] sm:$0xff] %v178_v26 }
  0xe1   :  { %v259_v27 = vpop.f32.mrb[4].mxu0  ;;  %v267_v29 = vpop.f32.mrb[4].mxu1 }
  0xe2   :  { %v167_v28 = vadd.f32 %v259_v27, %v225_v10  ;;  %v158_v30 = vpop.f32.mrb[5].mxu0  ;;  %v199_v31 = vadd.f32 %v267_v29, %v225_v10  ;;  %v190_v33 = vpop.f32.mrb[5].mxu1 }
  0xe3   :  { %v159_v32 = vadd.f32 %v225_v10, %v158_v30  ;;  %v260_v34 = vpop.f32.mrb[6].mxu0  ;;  %v191_v35 = vadd.f32 %v225_v10, %v190_v33  ;;  %v268_v37 = vpop.f32.mrb[6].mxu1 }
  0xe4   :  { %211 = vst [vmem:[%s390_s3 + $0x30] sm:$0xff] %v167_v28  ;;  %v170_v36 = vadd.f32 %v260_v34, %v225_v10  ;;  %v161_v38 = vpop.f32.mrb[7].mxu0  ;;  %219 = vst [vmem:[%s390_s3 + $0x70] sm:$0xff] %v199_v31  ;;  %v202_v39 = vadd.f32 %v268_v37, %v225_v10  ;;  %v193_v41 = vpop.f32.mrb[7].mxu1 }
  0xe5   :  { %209 = vst [vmem:[%s390_s3 + $0x20] sm:$0xff] %v159_v32  ;;  %v162_v40 = vadd.f32 %v225_v10, %v161_v38  ;;  %217 = vst [vmem:[%s390_s3 + $0x60] sm:$0xff] %v191_v35  ;;  %v194_v42 = vadd.f32 %v225_v10, %v193_v41 }
  0xe6   :  { %212 = vst [vmem:[%s390_s3 + $0x38] sm:$0xff] %v170_v36  ;;  %220 = vst [vmem:[%s390_s3 + $0x78] sm:$0xff] %v202_v39 }
  0xe7   :  { %210 = vst [vmem:[%s390_s3 + $0x28] sm:$0xff] %v162_v40  ;;  %218 = vst [vmem:[%s390_s3 + $0x68] sm:$0xff] %v194_v42 }

// kernel: resnet_forward.25
= control target key start
LH: loop header
LB: loop body
LE: loop exit
PB: predicated region body
PF: predicated region fallthrough
CT: control target
= control target key end

     0   :  { %vm107_vm0 = vcmask 1043456   ;;  %vm82_vm1 = vcmask 64512   ;;  %s509_s1 = inlined_call_operand.vmem [shape: bf16[8,128], index: 1, kind: input, shape index: {}]   ;;  %s510_s0 = inlined_call_operand.vmem [shape: bf16[128,8], index: 0, kind: input, shape index: {}]   ;;  %s511_s2 = inlined_call_operand.vmem [shape: f32[1,128], index: 2, kind: input, shape index: {}]   ;;  %s512_s3 = inlined_call_operand.vmem [shape: f32[128,128], index: 3, kind: input, shape index: {}]   ;;  %s513_s4 = inlined_call_operand.vmem [shape: f32[128,128], index: 4, kind: output, shape index: {}]  }
   0x1   :  { %v34_v0 = vld [vmem:[%s509_s1] sm:$0xf]  ;;  %v326_v4 = vld [vmem:[%s510_s0 + $0x8] sm:$0xff]   ;;  %v328_v6 = vld [vmem:[%s510_s0 + $0x10] sm:$0xff]  }
   0x2   :  { %322 = vmatprep.subr.msk.bf16.mxu0 %vm107_vm0, %v34_v0  ;;  %323 = vmatprep.subr.msk.bf16.mxu1 %vm107_vm0, %v34_v0  ;;  %v109_v1 = vsel %vm107_vm0, %v34_v0, 0  ;;  %v324_v2 = vld [vmem:[%s510_s0] sm:$0xff]   ;;  %v327_v5 = vld [vmem:[%s510_s0 + $0x28] sm:$0xff]   ;;  %v329_v7 = vld [vmem:[%s510_s0 + $0x30] sm:$0xff]  }
   0x3   :  { %303 = vmatpush3.bf16.msra.mxu0 %v109_v1  ;;  %321 = vmatpush3.bf16.msra.mxu1 %v109_v1  ;;  %v325_v3 = vld [vmem:[%s510_s0 + $0x20] sm:$0xff]   ;;  %v330_v8 = vld [vmem:[%s510_s0 + $0x18] sm:$0xff]   ;;  %v210_v12 = vld [vmem:[%s512_s3 + $0x10] sm:$0xff] }
   0x4   :  { %304 = vmatprep.mubr.msk.bf16.mxu0 %vm82_vm1, %v324_v2  ;;  %312 = vmatprep.mubr.msk.bf16.mxu1 %vm82_vm1, %v325_v3  ;;  %v331_v9 = vld [vmem:[%s510_s0 + $0x38] sm:$0xff]   ;;  %v395_v10 = vld [vmem:[%s511_s2] ss:$0 sm:$0xff]  ;;  %v218_v15 = vld [vmem:[%s512_s3 + $0x50] sm:$0xff] }
   0x5   :  { %v208_v17 = vld [vmem:[%s512_s3] sm:$0xff]  ;;  %v211_v23 = vld [vmem:[%s512_s3 + $0x18] sm:$0xff]  ;;  %v209_v30 = vld [vmem:[%s512_s3 + $0x8] sm:$0xff] }
   0x6   :  { %305 = vmatmul.mubr.msk.bf16.vlgmr.msra.gmra.mrb[0].mxu0 %vm82_vm1, %v326_v4  ;;  %313 = vmatmul.mubr.msk.bf16.vlgmr.msra.gmra.mrb[0].mxu1 %vm82_vm1, %v327_v5  ;;  %v216_v21 = vld [vmem:[%s512_s3 + $0x40] sm:$0xff]  ;;  %v219_v28 = vld [vmem:[%s512_s3 + $0x58] sm:$0xff]  ;;  %v217_v36 = vld [vmem:[%s512_s3 + $0x48] sm:$0xff] }
   0x7   :  { %308 = vmatprep.mubr.msk.bf16.mxu0 %vm82_vm1, %v328_v6  ;;  %316 = vmatprep.mubr.msk.bf16.mxu1 %vm82_vm1, %v329_v7  ;;  %v214_v51 = vld [vmem:[%s512_s3 + $0x30] sm:$0xff]  ;;  %v212_v57 = vld [vmem:[%s512_s3 + $0x20] sm:$0xff]  ;;  %v215_v63 = vld [vmem:[%s512_s3 + $0x38] sm:$0xff] }
   0x8   :  { %v222_v55 = vld [vmem:[%s512_s3 + $0x70] sm:$0xff]  ;;  %v220_v61 = vld [vmem:[%s512_s3 + $0x60] sm:$0xff]  ;;  %v223_v4 = vld [vmem:[%s512_s3 + $0x78] sm:$0xff] }
   0x9   :  { %v213_v6 = vld [vmem:[%s512_s3 + $0x28] sm:$0xff] }
   0xe   :  { %309 = vmatmul.mubr.msk.bf16.gmra.mrb[4].mxu0 %vm82_vm1, %v330_v8  ;;  %317 = vmatmul.mubr.msk.bf16.gmra.mrb[4].mxu1 %vm82_vm1, %v331_v9 }
  0xd9   :  { %v306_v11 = vpop.f32.mrb[0].mxu0  ;;  %v314_v14 = vpop.f32.mrb[0].mxu1 }
  0xda   :  { %v154_v13 = vadd.f32 %v306_v11, %v395_v10  ;;  %v145_v16 = vpop.f32.mrb[1].mxu0  ;;  %v186_v18 = vadd.f32 %v314_v14, %v395_v10  ;;  %v177_v20 = vpop.f32.mrb[1].mxu1 }
  0xdb   :  { %v146_v19 = vadd.f32 %v395_v10, %v145_v16  ;;  %v307_v22 = vpop.f32.mrb[2].mxu0  ;;  %v178_v25 = vadd.f32 %v395_v10, %v177_v20  ;;  %v315_v27 = vpop.f32.mrb[2].mxu1 }
  0xdc   :  { %v226_v24 = vadd.f32 %v210_v12, %v154_v13  ;;  %v157_v26 = vadd.f32 %v307_v22, %v395_v10  ;;  %v148_v29 = vpop.f32.mrb[3].mxu0  ;;  %v234_v31 = vadd.f32 %v218_v15, %v186_v18  ;;  %v189_v33 = vadd.f32 %v315_v27, %v395_v10  ;;  %v180_v35 = vpop.f32.mrb[3].mxu1  ;;  %v221_v13 = vld [vmem:[%s512_s3 + $0x68] sm:$0xff] }
  0xdd   :  { %v224_v32 = vadd.f32 %v208_v17, %v146_v19  ;;  %v149_v34 = vadd.f32 %v395_v10, %v148_v29  ;;  %v232_v38 = vadd.f32 %v216_v21, %v178_v25  ;;  %v181_v40 = vadd.f32 %v395_v10, %v180_v35 }
  0xde   :  { %v242_v37 = vmax.f32 %v226_v24, 0.0  ;;  %v227_v39 = vadd.f32 %v211_v23, %v157_v26  ;;  %v250_v41 = vmax.f32 %v234_v31, 0.0  ;;  %v235_v43 = vadd.f32 %v219_v28, %v189_v33 }
  0xdf   :  { %v240_v42 = vmax.f32 %v224_v32, 0.0  ;;  %v225_v44 = vadd.f32 %v209_v30, %v149_v34  ;;  %v248_v45 = vmax.f32 %v232_v38, 0.0  ;;  %v233_v47 = vadd.f32 %v217_v36, %v181_v40 }
  0xe0   :  { %258 = vst [vmem:[%s513_s4 + $0x10] sm:$0xff] %v242_v37  ;;  %v243_v46 = vmax.f32 %v227_v39, 0.0  ;;  %266 = vst [vmem:[%s513_s4 + $0x50] sm:$0xff] %v250_v41  ;;  %v251_v48 = vmax.f32 %v235_v43, 0.0 }
  0xe1   :  { %256 = vst [vmem:[%s513_s4] sm:$0xff] %v240_v42  ;;  %v241_v49 = vmax.f32 %v225_v44, 0.0  ;;  %v310_v50 = vpop.f32.mrb[4].mxu0  ;;  %264 = vst [vmem:[%s513_s4 + $0x40] sm:$0xff] %v248_v45  ;;  %v249_v52 = vmax.f32 %v233_v47, 0.0  ;;  %v318_v54 = vpop.f32.mrb[4].mxu1 }
  0xe2   :  { %259 = vst [vmem:[%s513_s4 + $0x18] sm:$0xff] %v243_v46  ;;  %v170_v53 = vadd.f32 %v310_v50, %v395_v10  ;;  %v161_v56 = vpop.f32.mrb[5].mxu0  ;;  %267 = vst [vmem:[%s513_s4 + $0x58] sm:$0xff] %v251_v48  ;;  %v202_v58 = vadd.f32 %v318_v54, %v395_v10  ;;  %v193_v60 = vpop.f32.mrb[5].mxu1 }
  0xe3   :  { %257 = vst [vmem:[%s513_s4 + $0x8] sm:$0xff] %v241_v49  ;;  %v162_v59 = vadd.f32 %v395_v10, %v161_v56  ;;  %v311_v62 = vpop.f32.mrb[6].mxu0  ;;  %265 = vst [vmem:[%s513_s4 + $0x48] sm:$0xff] %v249_v52  ;;  %v194_v1 = vadd.f32 %v395_v10, %v193_v60  ;;  %v319_v3 = vpop.f32.mrb[6].mxu1 }
  0xe4   :  { %v230_v0 = vadd.f32 %v214_v51, %v170_v53  ;;  %v173_v2 = vadd.f32 %v311_v62, %v395_v10  ;;  %v164_v5 = vpop.f32.mrb[7].mxu0  ;;  %v238_v7 = vadd.f32 %v222_v55, %v202_v58  ;;  %v205_v9 = vadd.f32 %v319_v3, %v395_v10  ;;  %v196_v12 = vpop.f32.mrb[7].mxu1 }
  0xe5   :  { %v228_v8 = vadd.f32 %v212_v57, %v162_v59  ;;  %v165_v11 = vadd.f32 %v395_v10, %v164_v5  ;;  %v236_v15 = vadd.f32 %v220_v61, %v194_v1  ;;  %v197_v17 = vadd.f32 %v395_v10, %v196_v12 }
  0xe6   :  { %v246_v14 = vmax.f32 %v230_v0, 0.0  ;;  %v231_v16 = vadd.f32 %v215_v63, %v173_v2  ;;  %v254_v18 = vmax.f32 %v238_v7, 0.0  ;;  %v239_v20 = vadd.f32 %v223_v4, %v205_v9 }
  0xe7   :  { %v244_v19 = vmax.f32 %v228_v8, 0.0  ;;  %v229_v21 = vadd.f32 %v213_v6, %v165_v11  ;;  %v252_v22 = vmax.f32 %v236_v15, 0.0  ;;  %v237_v24 = vadd.f32 %v221_v13, %v197_v17 }
  0xe8   :  { %262 = vst [vmem:[%s513_s4 + $0x30] sm:$0xff] %v246_v14  ;;  %v247_v23 = vmax.f32 %v231_v16, 0.0  ;;  %270 = vst [vmem:[%s513_s4 + $0x70] sm:$0xff] %v254_v18  ;;  %v255_v10 = vmax.f32 %v239_v20, 0.0 }
  0xe9   :  { %260 = vst [vmem:[%s513_s4 + $0x20] sm:$0xff] %v244_v19  ;;  %v245_v25 = vmax.f32 %v229_v21, 0.0  ;;  %268 = vst [vmem:[%s513_s4 + $0x60] sm:$0xff] %v252_v22  ;;  %v253_v26 = vmax.f32 %v237_v24, 0.0 }
  0xea   :  { %263 = vst [vmem:[%s513_s4 + $0x38] sm:$0xff] %v247_v23  ;;  %271 = vst [vmem:[%s513_s4 + $0x78] sm:$0xff] %v255_v10 }
  0xeb   :  { %261 = vst [vmem:[%s513_s4 + $0x28] sm:$0xff] %v245_v25  ;;  %269 = vst [vmem:[%s513_s4 + $0x68] sm:$0xff] %v253_v26 }

// kernel: closed_call.88
= control target key start
LH: loop header
LB: loop body
LE: loop exit
PB: predicated region body
PF: predicated region fallthrough
CT: control target
= control target key end

     0   :  { %vm94_vm0 = vcmask 261120   ;;  %s424_s1 = inlined_call_operand.vmem [shape: bf16[32,128], index: 1, kind: input, shape index: {}]   ;;  %s425_s0 = inlined_call_operand.vmem [shape: bf16[128,32], index: 0, kind: input, shape index: {}]   ;;  %s426_s2 = inlined_call_operand.vmem [shape: f32[1,128], index: 2, kind: input, shape index: {}]   ;;  %s427_s3 = inlined_call_operand.vmem [shape: f32[128,128], index: 3, kind: output, shape index: {}]  }
   0x1   :  { %v305_v0 = vld [vmem:[%s424_s1] sm:$0xff]   ;;  %v306_v1 = vld [vmem:[%s424_s1 + $0x8] sm:$0xff]   ;;  %v311_v6 = vld [vmem:[%s425_s0 + $0x10] sm:$0xff]  }
   0x2   :  { %281 = vmatprep.subr.bf16.mxu0 %v305_v0  ;;  %301 = vmatprep.subr.bf16.mxu1 %v305_v0  ;;  %v307_v2 = vld [vmem:[%s425_s0] sm:$0xff]   ;;  %v309_v4 = vld [vmem:[%s425_s0 + $0x8] sm:$0xff]   ;;  %v312_v7 = vld [vmem:[%s425_s0 + $0x30] sm:$0xff]  }
   0x3   :  { %282 = vmatpush3.bf16.msra.mxu0 %v305_v0  ;;  %303 = vmatpush3.bf16.msra.mxu1 %v305_v0  ;;  %v308_v3 = vld [vmem:[%s425_s0 + $0x20] sm:$0xff]   ;;  %v310_v5 = vld [vmem:[%s425_s0 + $0x28] sm:$0xff]   ;;  %v313_v8 = vld [vmem:[%s425_s0 + $0x18] sm:$0xff]  }
   0x4   :  { %283 = vmatprep.subr.bf16.mxu0 %v306_v1  ;;  %302 = vmatprep.subr.bf16.mxu1 %v306_v1  ;;  %v314_v9 = vld [vmem:[%s425_s0 + $0x38] sm:$0xff]   ;;  %v252_v10 = vld [vmem:[%s426_s2] ss:$0 sm:$0xff] }
   0x5   :  { %285 = vmatprep.mubr.msk.bf16.mxu0 %vm94_vm0, %v307_v2  ;;  %293 = vmatprep.mubr.msk.bf16.mxu1 %vm94_vm0, %v308_v3 }
   0x7   :  { %284 = vmatpush3.bf16.msra.mxu0 %v306_v1  ;;  %304 = vmatpush3.bf16.msra.mxu1 %v306_v1 }
   0xa   :  { %286 = vmatmul.mubr.msk.bf16.vlgmr.msra.gmra.mrb[0].mxu0 %vm94_vm0, %v309_v4  ;;  %294 = vmatmul.mubr.msk.bf16.vlgmr.msra.gmra.mrb[0].mxu1 %vm94_vm0, %v310_v5 }
   0xb   :  { %289 = vmatprep.mubr.msk.bf16.mxu0 %vm94_vm0, %v311_v6  ;;  %297 = vmatprep.mubr.msk.bf16.mxu1 %vm94_vm0, %v312_v7 }
  0x12   :  { %290 = vmatmul.mubr.msk.bf16.gmra.mrb[4].mxu0 %vm94_vm0, %v313_v8  ;;  %298 = vmatmul.mubr.msk.bf16.gmra.mrb[4].mxu1 %vm94_vm0, %v314_v9 }
  0xdd   :  { %v287_v11 = vpop.f32.mrb[0].mxu0  ;;  %v295_v12 = vpop.f32.mrb[0].mxu1 }
  0xde   :  { %v162_v13 = vadd.f32 %v287_v11, %v252_v10  ;;  %v194_v14 = vadd.f32 %v295_v12, %v252_v10  ;;  %v153_v15 = vpop.f32.mrb[1].mxu0  ;;  %v185_v16 = vpop.f32.mrb[1].mxu1 }
  0xdf   :  { %v154_v17 = vadd.f32 %v252_v10, %v153_v15  ;;  %v186_v18 = vadd.f32 %v252_v10, %v185_v16  ;;  %v288_v19 = vpop.f32.mrb[2].mxu0  ;;  %v296_v20 = vpop.f32.mrb[2].mxu1 }
  0xe0   :  { %v218_v21 = vmax.f32 %v162_v13, 0.0  ;;  %v226_v22 = vmax.f32 %v194_v14, 0.0  ;;  %v165_v23 = vadd.f32 %v288_v19, %v252_v10  ;;  %v197_v24 = vadd.f32 %v296_v20, %v252_v10  ;;  %v156_v25 = vpop.f32.mrb[3].mxu0  ;;  %v188_v26 = vpop.f32.mrb[3].mxu1 }
  0xe1   :  { %v216_v27 = vmax.f32 %v154_v17, 0.0  ;;  %v224_v28 = vmax.f32 %v186_v18, 0.0  ;;  %v157_v29 = vadd.f32 %v252_v10, %v156_v25  ;;  %v189_v30 = vadd.f32 %v252_v10, %v188_v26 }
  0xe2   :  { %234 = vst [vmem:[%s427_s3 + $0x10] sm:$0xff] %v218_v21  ;;  %242 = vst [vmem:[%s427_s3 + $0x50] sm:$0xff] %v226_v22  ;;  %v219_v31 = vmax.f32 %v165_v23, 0.0  ;;  %v227_v32 = vmax.f32 %v197_v24, 0.0 }
  0xe3   :  { %232 = vst [vmem:[%s427_s3] sm:$0xff] %v216_v27  ;;  %240 = vst [vmem:[%s427_s3 + $0x40] sm:$0xff] %v224_v28  ;;  %v217_v33 = vmax.f32 %v157_v29, 0.0  ;;  %v225_v34 = vmax.f32 %v189_v30, 0.0 }
  0xe4   :  { %235 = vst [vmem:[%s427_s3 + $0x18] sm:$0xff] %v219_v31  ;;  %243 = vst [vmem:[%s427_s3 + $0x58] sm:$0xff] %v227_v32 }
  0xe5   :  { %233 = vst [vmem:[%s427_s3 + $0x8] sm:$0xff] %v217_v33  ;;  %241 = vst [vmem:[%s427_s3 + $0x48] sm:$0xff] %v225_v34  ;;  %v291_v35 = vpop.f32.mrb[4].mxu0  ;;  %v299_v36 = vpop.f32.mrb[4].mxu1 }
  0xe6   :  { %v178_v37 = vadd.f32 %v291_v35, %v252_v10  ;;  %v210_v38 = vadd.f32 %v299_v36, %v252_v10  ;;  %v169_v39 = vpop.f32.mrb[5].mxu0  ;;  %v201_v40 = vpop.f32.mrb[5].mxu1 }
  0xe7   :  { %v170_v41 = vadd.f32 %v252_v10, %v169_v39  ;;  %v202_v42 = vadd.f32 %v252_v10, %v201_v40  ;;  %v292_v43 = vpop.f32.mrb[6].mxu0  ;;  %v300_v44 = vpop.f32.mrb[6].mxu1 }
  0xe8   :  { %v222_v45 = vmax.f32 %v178_v37, 0.0  ;;  %v230_v46 = vmax.f32 %v210_v38, 0.0  ;;  %v181_v47 = vadd.f32 %v292_v43, %v252_v10  ;;  %v213_v48 = vadd.f32 %v300_v44, %v252_v10  ;;  %v172_v49 = vpop.f32.mrb[7].mxu0  ;;  %v204_v50 = vpop.f32.mrb[7].mxu1 }
  0xe9   :  { %v220_v51 = vmax.f32 %v170_v41, 0.0  ;;  %v228_v52 = vmax.f32 %v202_v42, 0.0  ;;  %v173_v53 = vadd.f32 %v252_v10, %v172_v49  ;;  %v205_v54 = vadd.f32 %v252_v10, %v204_v50 }
  0xea   :  { %238 = vst [vmem:[%s427_s3 + $0x30] sm:$0xff] %v222_v45  ;;  %246 = vst [vmem:[%s427_s3 + $0x70] sm:$0xff] %v230_v46  ;;  %v223_v55 = vmax.f32 %v181_v47, 0.0  ;;  %v231_v56 = vmax.f32 %v213_v48, 0.0 }
  0xeb   :  { %236 = vst [vmem:[%s427_s3 + $0x20] sm:$0xff] %v220_v51  ;;  %244 = vst [vmem:[%s427_s3 + $0x60] sm:$0xff] %v228_v52  ;;  %v221_v57 = vmax.f32 %v173_v53, 0.0  ;;  %v229_v58 = vmax.f32 %v205_v54, 0.0 }
  0xec   :  { %239 = vst [vmem:[%s427_s3 + $0x38] sm:$0xff] %v223_v55  ;;  %247 = vst [vmem:[%s427_s3 + $0x78] sm:$0xff] %v231_v56 }
  0xed   :  { %237 = vst [vmem:[%s427_s3 + $0x28] sm:$0xff] %v221_v57  ;;  %245 = vst [vmem:[%s427_s3 + $0x68] sm:$0xff] %v229_v58 }

// kernel: resnet_forward.27
= control target key start
LH: loop header
LB: loop body
LE: loop exit
PB: predicated region body
PF: predicated region fallthrough
CT: control target
= control target key end

     0   :  { %v234_v0 = vmov 0   ;;  %vm116_vm0 = vcmask 130048   ;;  %s309_s1 = inlined_call_operand.vmem [shape: bf16[144,128], index: 1, kind: input, shape index: {}]   ;;  %s310_s0 = inlined_call_operand.vmem [shape: bf16[32,144], index: 0, kind: input, shape index: {}]   ;;  %s311_s2 = inlined_call_operand.vmem [shape: f32[1,128], index: 2, kind: input, shape index: {}]   ;;  %s312_s3 = inlined_call_operand.vmem [shape: f32[32,128], index: 3, kind: output, shape index: {}]  }
   0x1   :  { %123 = vmatprep.subr.bf16.mxu0 %v234_v0  ;;  %200 = vmatprep.subr.bf16.mxu1 %v234_v0  ;;  %v219_v1 = vld [vmem:[%s309_s1] sm:$0xff]   ;;  %v220_v2 = vld [vmem:[%s309_s1 + $0x8] sm:$0xff]   ;;  %v221_v3 = vld [vmem:[%s309_s1 + $0x10] sm:$0xff]  }
   0x2   :  { %124 = vmatpush1.bf16.msra.mxu0 %v219_v1  ;;  %209 = vmatpush1.bf16.msra.mxu1 %v219_v1  ;;  %v222_v4 = vld [vmem:[%s309_s1 + $0x18] sm:$0xff]   ;;  %v230_v5 = vld [vmem:[%s310_s0 + $0x4] ss:$8 sps:$4 sm:$0xff]   ;;  %v225_v9 = vld [vmem:[%s309_s1 + $0x30] sm:$0xff]  }
   0x3   :  { %125 = vmatprep.subr.bf16.mxu0 %v234_v0  ;;  %201 = vmatprep.subr.bf16.mxu1 %v234_v0  ;;  %v233_v6 = vld [vmem:[%s310_s0 + $0x14] ss:$8 sps:$4 sm:$0xff]   ;;  %v223_v7 = vld [vmem:[%s309_s1 + $0x20] sm:$0xff]   ;;  %v224_v8 = vld [vmem:[%s309_s1 + $0x28] sm:$0xff]  }
   0x4   :  { %198 = vmatprep.mubr.msk.bf16.mxu0 %vm116_vm0, %v230_v5  ;;  %199 = vmatprep.mubr.msk.bf16.mxu1 %vm116_vm0, %v233_v6  ;;  %v226_v10 = vld [vmem:[%s309_s1 + $0x38] sm:$0xff]   ;;  %v227_v11 = vld [vmem:[%s309_s1 + $0x40] sm:$0xff]  }
   0x5   :  { %v228_v12 = vld [vmem:[%s310_s0] ss:$8 sps:$4 sm:$0xff]   ;;  %v231_v13 = vld [vmem:[%s310_s0 + $0x10] ss:$8 sps:$4 sm:$0xff]  }
   0x6   :  { %126 = vmatpush1.bf16.msra.mxu0 %v220_v2  ;;  %210 = vmatpush1.bf16.msra.mxu1 %v220_v2  ;;  %v184_v14 = vld [vmem:[%s311_s2] ss:$0 sm:$0xff] }
   0x7   :  { %127 = vmatprep.subr.bf16.mxu0 %v234_v0  ;;  %202 = vmatprep.subr.bf16.mxu1 %v234_v0 }
   0xa   :  { %128 = vmatpush1.bf16.msra.mxu0 %v221_v3  ;;  %211 = vmatpush1.bf16.msra.mxu1 %v221_v3 }
   0xb   :  { %129 = vmatprep.subr.bf16.mxu0 %v234_v0  ;;  %203 = vmatprep.subr.bf16.mxu1 %v234_v0 }
   0xe   :  { %130 = vmatpush1.bf16.msra.mxu0 %v222_v4  ;;  %212 = vmatpush1.bf16.msra.mxu1 %v222_v4 }
   0xf   :  { %131 = vmatprep.subr.bf16.mxu0 %v234_v0  ;;  %204 = vmatprep.subr.bf16.mxu1 %v234_v0 }
  0x12   :  { %132 = vmatpush1.bf16.msra.mxu0 %v223_v7  ;;  %213 = vmatpush1.bf16.msra.mxu1 %v223_v7 }
  0x13   :  { %133 = vmatprep.subr.bf16.mxu0 %v234_v0  ;;  %205 = vmatprep.subr.bf16.mxu1 %v234_v0 }
  0x16   :  { %134 = vmatpush1.bf16.msra.mxu0 %v224_v8  ;;  %214 = vmatpush1.bf16.msra.mxu1 %v224_v8 }
  0x17   :  { %135 = vmatprep.subr.bf16.mxu0 %v234_v0  ;;  %206 = vmatprep.subr.bf16.mxu1 %v234_v0 }
  0x1a   :  { %136 = vmatpush1.bf16.msra.mxu0 %v225_v9  ;;  %215 = vmatpush1.bf16.msra.mxu1 %v225_v9 }
  0x1b   :  { %137 = vmatprep.subr.bf16.mxu0 %v234_v0  ;;  %207 = vmatprep.subr.bf16.mxu1 %v234_v0 }
  0x1e   :  { %138 = vmatpush1.bf16.msra.mxu0 %v226_v10  ;;  %216 = vmatpush1.bf16.msra.mxu1 %v226_v10 }
  0x1f   :  { %139 = vmatprep.subr.bf16.mxu0 %v234_v0  ;;  %208 = vmatprep.subr.bf16.mxu1 %v234_v0 }
  0x22   :  { %140 = vmatpush1.bf16.msra.mxu0 %v227_v11  ;;  %217 = vmatpush1.bf16.msra.mxu1 %v227_v11 }
  0x25   :  { %156 = vmatmul.mubr.bf16.vlgmr.msra.gmra.mrb[0].mxu0 %v228_v12  ;;  %164 = vmatmul.mubr.bf16.vlgmr.msra.gmra.mrb[0].mxu1 %v231_v13 }
  0xf8   :  { %v157_v15 = vpop.f32.mrb[0].mxu0  ;;  %v165_v16 = vpop.f32.mrb[0].mxu1 }
  0xf9   :  { %v158_v17 = vadd.f32 %v184_v14, %v157_v15  ;;  %v166_v18 = vadd.f32 %v184_v14, %v165_v16  ;;  %v159_v19 = vpop.f32.mrb[1].mxu0  ;;  %v167_v20 = vpop.f32.mrb[1].mxu1 }
  0xfa   :  { %v160_v21 = vpop.f32.mrb[2].mxu0  ;;  %v168_v22 = vpop.f32.mrb[2].mxu1 }
  0xfb   :  { %v172_v23 = vmax.f32 %v158_v17, 0.0  ;;  %v174_v24 = vmax.f32 %v166_v18, 0.0  ;;  %v161_v25 = vadd.f32 %v184_v14, %v160_v21  ;;  %v169_v26 = vadd.f32 %v184_v14, %v168_v22  ;;  %v162_v27 = vpop.f32.mrb[3].mxu0  ;;  %v170_v28 = vpop.f32.mrb[3].mxu1 }
  0xfd   :  { %176 = vst [vmem:[%s312_s3] sm:$0xff] %v172_v23  ;;  %178 = vst [vmem:[%s312_s3 + $0x10] sm:$0xff] %v174_v24  ;;  %v173_v29 = vmax.f32 %v161_v25, 0.0  ;;  %v175_v30 = vmax.f32 %v169_v26, 0.0 }
  0xff   :  { %177 = vst [vmem:[%s312_s3 + $0x8] sm:$0xff] %v173_v29  ;;  %179 = vst [vmem:[%s312_s3 + $0x18] sm:$0xff] %v175_v30 }

// kernel: resnet_forward.28
= control target key start
LH: loop header
LB: loop body
LE: loop exit
PB: predicated region body
PF: predicated region fallthrough
CT: control target
= control target key end

     0   :  { %vm52_vm0 = vcmask 261120   ;;  %s186_s1 = inlined_call_operand.vmem [shape: bf16[32,128], index: 1, kind: input, shape index: {}]   ;;  %s187_s0 = inlined_call_operand.vmem [shape: bf16[32,32], index: 0, kind: input, shape index: {}]   ;;  %s188_s2 = inlined_call_operand.vmem [shape: f32[1,128], index: 2, kind: input, shape index: {}]   ;;  %s189_s3 = inlined_call_operand.vmem [shape: f32[32,128], index: 3, kind: output, shape index: {}]  }
   0x1   :  { %v135_v0 = vld [vmem:[%s186_s1] sm:$0xff]   ;;  %v136_v1 = vld [vmem:[%s186_s1 + $0x8] sm:$0xff]  }
   0x2   :  { %127 = vmatprep.subr.bf16.mxu0 %v135_v0  ;;  %v137_v2 = vld [vmem:[%s187_s0] sm:$0xff]   ;;  %v138_v3 = vld [vmem:[%s187_s0 + $0x8] sm:$0xff]  }
   0x3   :  { %128 = vmatpush3.bf16.msra.mxu0 %v135_v0  ;;  %131 = vmatprep.mubr.msk.bf16.mxu0 %vm52_vm0, %v137_v2  ;;  %v116_v4 = vld [vmem:[%s188_s2] ss:$0 sm:$0xff] }
   0x4   :  { %129 = vmatprep.subr.bf16.mxu0 %v136_v1 }
   0x7   :  { %130 = vmatpush3.bf16.msra.mxu0 %v136_v1 }
   0xa   :  { %132 = vmatmul.mubr.msk.bf16.vlgmr.msra.gmra.mrb[0].mxu0 %vm52_vm0, %v138_v3 }
  0xdd   :  { %v133_v5 = vpop.f32.mrb[0].mxu0 }
  0xde   :  { %v102_v6 = vadd.f32 %v133_v5, %v116_v4  ;;  %v93_v7 = vpop.f32.mrb[1].mxu0 }
  0xdf   :  { %v94_v8 = vadd.f32 %v116_v4, %v93_v7  ;;  %v134_v9 = vpop.f32.mrb[2].mxu0 }
  0xe0   :  { %110 = vst [vmem:[%s189_s3 + $0x10] sm:$0xff] %v102_v6  ;;  %v105_v10 = vadd.f32 %v134_v9, %v116_v4  ;;  %v96_v11 = vpop.f32.mrb[3].mxu0 }
  0xe1   :  { %108 = vst [vmem:[%s189_s3] sm:$0xff] %v94_v8  ;;  %v97_v12 = vadd.f32 %v116_v4, %v96_v11 }
  0xe2   :  { %111 = vst [vmem:[%s189_s3 + $0x18] sm:$0xff] %v105_v10 }
  0xe3   :  { %109 = vst [vmem:[%s189_s3 + $0x8] sm:$0xff] %v97_v12 }

// kernel: resnet_forward.29
= control target key start
LH: loop header
LB: loop body
LE: loop exit
PB: predicated region body
PF: predicated region fallthrough
CT: control target
= control target key end

     0   :  { %vm47_vm0 = vcmask 130048   ;;  %s202_s1 = inlined_call_operand.vmem [shape: bf16[16,128], index: 1, kind: input, shape index: {}]   ;;  %s203_s0 = inlined_call_operand.vmem [shape: bf16[32,16], index: 0, kind: input, shape index: {}]   ;;  %s204_s2 = inlined_call_operand.vmem [shape: f32[1,128], index: 2, kind: input, shape index: {}]   ;;  %s205_s3 = inlined_call_operand.vmem [shape: f32[32,128], index: 3, kind: input, shape index: {}]   ;;  %s206_s4 = inlined_call_operand.vmem [shape: f32[32,128], index: 4, kind: output, shape index: {}]  }
   0x1   :  { %v138_v0 = vld [vmem:[%s202_s1] sm:$0xff]   ;;  %v140_v2 = vld [vmem:[%s203_s0 + $0x8] sm:$0xff]   ;;  %v105_v5 = vld [vmem:[%s205_s3 + $0x10] sm:$0xff] }
   0x2   :  { %v139_v1 = vld [vmem:[%s203_s0] sm:$0xff]   ;;  %132 = vmatprep.subr.bf16.mxu0 %v138_v0  ;;  %v106_v11 = vld [vmem:[%s205_s3 + $0x18] sm:$0xff]  ;;  %v104_v15 = vld [vmem:[%s205_s3 + $0x8] sm:$0xff] }
   0x3   :  { %133 = vmatpush3.bf16.msra.mxu0 %v138_v0  ;;  %134 = vmatprep.mubr.msk.bf16.mxu0 %vm47_vm0, %v139_v1  ;;  %v123_v3 = vld [vmem:[%s204_s2] ss:$0 sm:$0xff] }
   0x4   :  { %v103_v8 = vld [vmem:[%s205_s3] sm:$0xff] }
   0x6   :  { %135 = vmatmul.mubr.msk.bf16.vlgmr.msra.gmra.mrb[0].mxu0 %vm47_vm0, %v140_v2 }
  0xd9   :  { %v136_v4 = vpop.f32.mrb[0].mxu0 }
  0xda   :  { %v97_v6 = vadd.f32 %v136_v4, %v123_v3  ;;  %v88_v7 = vpop.f32.mrb[1].mxu0 }
  0xdb   :  { %v89_v9 = vadd.f32 %v123_v3, %v88_v7  ;;  %v137_v10 = vpop.f32.mrb[2].mxu0 }
  0xdc   :  { %v109_v12 = vadd.f32 %v105_v5, %v97_v6  ;;  %v100_v13 = vadd.f32 %v137_v10, %v123_v3  ;;  %v91_v14 = vpop.f32.mrb[3].mxu0 }
  0xdd   :  { %v107_v16 = vadd.f32 %v103_v8, %v89_v9  ;;  %v92_v17 = vadd.f32 %v123_v3, %v91_v14 }
  0xde   :  { %v113_v18 = vmax.f32 %v109_v12, 0.0  ;;  %v110_v19 = vadd.f32 %v106_v11, %v100_v13 }
  0xdf   :  { %v111_v20 = vmax.f32 %v107_v16, 0.0  ;;  %v108_v21 = vadd.f32 %v104_v15, %v92_v17 }
  0xe0   :  { %117 = vst [vmem:[%s206_s4 + $0x10] sm:$0xff] %v113_v18  ;;  %v114_v22 = vmax.f32 %v110_v19, 0.0 }
  0xe1   :  { %115 = vst [vmem:[%s206_s4] sm:$0xff] %v111_v20  ;;  %v112_v23 = vmax.f32 %v108_v21, 0.0 }
  0xe2   :  { %118 = vst [vmem:[%s206_s4 + $0x18] sm:$0xff] %v114_v22 }
  0xe3   :  { %116 = vst [vmem:[%s206_s4 + $0x8] sm:$0xff] %v112_v23 }

// kernel: closed_call.91
= control target key start
LH: loop header
LB: loop body
LE: loop exit
PB: predicated region body
PF: predicated region fallthrough
CT: control target
= control target key end

     0   :  { %vm68_vm0 = vcmask 523264   ;;  %s222_s1 = inlined_call_operand.vmem [shape: bf16[64,128], index: 1, kind: input, shape index: {}]   ;;  %s223_s0 = inlined_call_operand.vmem [shape: bf16[32,64], index: 0, kind: input, shape index: {}]   ;;  %s224_s2 = inlined_call_operand.vmem [shape: f32[1,128], index: 2, kind: input, shape index: {}]   ;;  %s225_s3 = inlined_call_operand.vmem [shape: f32[32,128], index: 3, kind: output, shape index: {}]  }
   0x1   :  { %v163_v0 = vld [vmem:[%s222_s1] sm:$0xff]   ;;  %v164_v1 = vld [vmem:[%s222_s1 + $0x8] sm:$0xff]   ;;  %v165_v2 = vld [vmem:[%s222_s1 + $0x10] sm:$0xff]  }
   0x2   :  { %151 = vmatprep.subr.bf16.mxu0 %v163_v0  ;;  %v167_v3 = vld [vmem:[%s223_s0] sm:$0xff]   ;;  %v166_v4 = vld [vmem:[%s222_s1 + $0x18] sm:$0xff]   ;;  %v168_v5 = vld [vmem:[%s223_s0 + $0x8] sm:$0xff]  }
   0x3   :  { %152 = vmatpush3.bf16.msra.mxu0 %v163_v0  ;;  %159 = vmatprep.mubr.msk.bf16.mxu0 %vm68_vm0, %v167_v3  ;;  %v136_v6 = vld [vmem:[%s224_s2] ss:$0 sm:$0xff] }
   0x4   :  { %153 = vmatprep.subr.bf16.mxu0 %v164_v1 }
   0x7   :  { %154 = vmatpush3.bf16.msra.mxu0 %v164_v1 }
   0x8   :  { %155 = vmatprep.subr.bf16.mxu0 %v165_v2 }
   0xb   :  { %156 = vmatpush3.bf16.msra.mxu0 %v165_v2 }
   0xc   :  { %157 = vmatprep.subr.bf16.mxu0 %v166_v4 }
   0xf   :  { %158 = vmatpush3.bf16.msra.mxu0 %v166_v4 }
  0x12   :  { %160 = vmatmul.mubr.msk.bf16.vlgmr.msra.gmra.mrb[0].mxu0 %vm68_vm0, %v168_v5 }
  0xe5   :  { %v161_v7 = vpop.f32.mrb[0].mxu0 }
  0xe6   :  { %v118_v8 = vadd.f32 %v161_v7, %v136_v6  ;;  %v109_v9 = vpop.f32.mrb[1].mxu0 }
  0xe7   :  { %v110_v10 = vadd.f32 %v136_v6, %v109_v9  ;;  %v162_v11 = vpop.f32.mrb[2].mxu0 }
  0xe8   :  { %v126_v12 = vmax.f32 %v118_v8, 0.0  ;;  %v121_v13 = vadd.f32 %v162_v11, %v136_v6  ;;  %v112_v14 = vpop.f32.mrb[3].mxu0 }
  0xe9   :  { %v124_v15 = vmax.f32 %v110_v10, 0.0  ;;  %v113_v16 = vadd.f32 %v136_v6, %v112_v14 }
  0xea   :  { %130 = vst [vmem:[%s225_s3 + $0x10] sm:$0xff] %v126_v12  ;;  %v127_v17 = vmax.f32 %v121_v13, 0.0 }
  0xeb   :  { %128 = vst [vmem:[%s225_s3] sm:$0xff] %v124_v15  ;;  %v125_v18 = vmax.f32 %v113_v16, 0.0 }
  0xec   :  { %131 = vst [vmem:[%s225_s3 + $0x18] sm:$0xff] %v127_v17 }
  0xed   :  { %129 = vst [vmem:[%s225_s3 + $0x8] sm:$0xff] %v125_v18 }

// kernel: resnet_forward.31
= control target key start
LH: loop header
LB: loop body
LE: loop exit
PB: predicated region body
PF: predicated region fallthrough
CT: control target
= control target key end

     0   :  { %v359_v1 = vmov 0.0   ;;  %vm360_vm0 = vmmov 0   ;;  %vm185_vm1 = vcmask 261120   ;;  %s453_s1 = inlined_call_operand.vmem [shape: bf16[288,128], index: 1, kind: input, shape index: {}]   ;;  %s454_s0 = inlined_call_operand.vmem [shape: bf16[16,288], index: 0, kind: input, shape index: {}]   ;;  %s455_s2 = inlined_call_operand.vmem [shape: f32[1,128], index: 2, kind: input, shape index: {}]   ;;  %s456_s3 = inlined_call_operand.vmem [shape: f32[16,128], index: 3, kind: output, shape index: {}]  }
   0x1   :  { %v337_v0 = vld [vmem:[%s453_s1 + $0x40] sm:$0xff]   ;;  %327 = vmatprep.subr.bf16.mxu1 %v359_v1  ;;  %331 = vmatprep.mubr.msk.bf16.mxu1 %vm360_vm0, %v359_v1  ;;  %v339_v3 = vld [vmem:[%s453_s1 + $0x48] sm:$0xff]   ;;  %v341_v5 = vld [vmem:[%s453_s1 + $0x50] sm:$0xff]  }
   0x2   :  { %v338_v2 = vld [vmem:[%s453_s1] sm:$0xff]   ;;  %302 = vmatprep.subr.bf16.mxu0 %v337_v0  ;;  %v340_v4 = vld [vmem:[%s453_s1 + $0x8] sm:$0xff]   ;;  %v342_v6 = vld [vmem:[%s453_s1 + $0x10] sm:$0xff]  }
   0x3   :  { %303 = vmatpush3.bf16.msra.mxu0 %v338_v2  ;;  %v343_v7 = vld [vmem:[%s453_s1 + $0x58] sm:$0xff]   ;;  %v345_v9 = vld [vmem:[%s453_s1 + $0x60] sm:$0xff]   ;;  %v347_v12 = vld [vmem:[%s453_s1 + $0x68] sm:$0xff]  }
   0x4   :  { %304 = vmatprep.subr.bf16.mxu0 %v339_v3  ;;  %v344_v8 = vld [vmem:[%s453_s1 + $0x18] sm:$0xff]   ;;  %v351_v10 = vld [vmem:[%s453_s1 + $0x80] sm:$0xff]   ;;  %v348_v13 = vld [vmem:[%s453_s1 + $0x28] sm:$0xff]  }
   0x5   :  { %v346_v11 = vld [vmem:[%s453_s1 + $0x20] sm:$0xff]   ;;  %328 = vmatpush3.bf16.msra.mxu1 %v351_v10  ;;  %v357_v15 = vld [vmem:[%s453_s1 + $0x88] sm:$0xff]   ;;  %v349_v16 = vld [vmem:[%s453_s1 + $0x70] sm:$0xff]  }
   0x6   :  { %329 = vmatprep.subr.bf16.mxu1 %v359_v1  ;;  %v356_v14 = vld [vmem:[%s454_s0 + $0x4] ss:$12 sps:$4 sm:$0xff]   ;;  %v358_v17 = vld [vmem:[%s454_s0 + $0x8] ss:$12 sps:$4 sm:$0xff]   ;;  %v352_v19 = vld [vmem:[%s453_s1 + $0x78] sm:$0xff]  }
   0x7   :  { %305 = vmatpush3.bf16.msra.mxu0 %v340_v4  ;;  %221 = vmatprep.mubr.bf16.mxu0 %v356_v14  ;;  %v350_v18 = vld [vmem:[%s453_s1 + $0x30] sm:$0xff]   ;;  %v353_v20 = vld [vmem:[%s453_s1 + $0x38] sm:$0xff]   ;;  %v354_v21 = vld [vmem:[%s454_s0] ss:$12 sps:$4 sm:$0xff]  }
   0x8   :  { %306 = vmatprep.subr.bf16.mxu0 %v341_v5  ;;  %v279_v28 = vld [vmem:[%s455_s2] ss:$0 sm:$0xff] }
   0x9   :  { %330 = vmatpush3.bf16.msra.mxu1 %v357_v15 }
   0xb   :  { %307 = vmatpush3.bf16.msra.mxu0 %v342_v6 }
   0xc   :  { %308 = vmatprep.subr.bf16.mxu0 %v343_v7  ;;  %332 = vmatmul.mubr.msk.bf16.vlgmr.msra.gmra.mrb[0].mxu1 %vm185_vm1, %v358_v17 }
   0xf   :  { %309 = vmatpush3.bf16.msra.mxu0 %v344_v8 }
  0x10   :  { %310 = vmatprep.subr.bf16.mxu0 %v345_v9 }
  0x13   :  { %311 = vmatpush3.bf16.msra.mxu0 %v346_v11 }
  0x14   :  { %312 = vmatprep.subr.bf16.mxu0 %v347_v12 }
  0x17   :  { %313 = vmatpush3.bf16.msra.mxu0 %v348_v13 }
  0x18   :  { %314 = vmatprep.subr.bf16.mxu0 %v349_v16 }
  0x1b   :  { %315 = vmatpush3.bf16.msra.mxu0 %v350_v18 }
  0x1c   :  { %316 = vmatprep.subr.bf16.mxu0 %v352_v19 }
  0x1f   :  { %317 = vmatpush3.bf16.msra.mxu0 %v353_v20 }
  0x22   :  { %222 = vmatmul.mubr.bf16.vlgmr.msra.gmra.mrb[0].mxu0 %v354_v21 }
  0xdf   :  { %v264_v22 = vpop.f32.mrb[0].mxu1 }
  0xe0   :  { %v333_v23 = vpop.f32.mrb[1].mxu1 }
  0xe1   :  { %v267_v24 = vpop.f32.mrb[2].mxu1 }
  0xe2   :  { %v334_v25 = vpop.f32.mrb[3].mxu1 }
  0xf5   :  { %v318_v26 = vpop.f32.mrb[0].mxu0 }
  0xf6   :  { %v319_v27 = vpop.f32.mrb[1].mxu0 }
  0xf7   :  { %v320_v29 = vadd.f32 %v319_v27, %v318_v26  ;;  %v321_v30 = vpop.f32.mrb[2].mxu0 }
  0xf8   :  { %v322_v31 = vpop.f32.mrb[3].mxu0 }
  0xf9   :  { %v224_v32 = vadd.f32 %v320_v29, %v279_v28  ;;  %v323_v33 = vadd.f32 %v322_v31, %v321_v30 }
  0xfb   :  { %v265_v34 = vadd.f32 %v264_v22, %v224_v32  ;;  %v227_v35 = vadd.f32 %v323_v33, %v279_v28 }
  0xfd   :  { %v271_v36 = vmax.f32 %v265_v34, 0.0  ;;  %v268_v37 = vadd.f32 %v267_v24, %v227_v35 }
  0xff   :  { %273 = vst [vmem:[%s456_s3] sm:$0xff] %v271_v36  ;;  %v272_v38 = vmax.f32 %v268_v37, 0.0 }
 0x101   :  { %274 = vst [vmem:[%s456_s3 + $0x8] sm:$0xff] %v272_v38 }

// kernel: resnet_forward.33
= control target key start
LH: loop header
LB: loop body
LE: loop exit
PB: predicated region body
PF: predicated region fallthrough
CT: control target
= control target key end

     0   :  { %v126_v0 = vmov 0.0   ;;  %vm127_vm0 = vmmov 0   ;;  %vm48_vm1 = vcmask 261120   ;;  %s177_s1 = inlined_call_operand.vmem [shape: bf16[32,128], index: 1, kind: input, shape index: {}]   ;;  %s178_s0 = inlined_call_operand.vmem [shape: bf16[16,32], index: 0, kind: input, shape index: {}]   ;;  %s179_s2 = inlined_call_operand.vmem [shape: f32[1,128], index: 2, kind: input, shape index: {}]   ;;  %s180_s3 = inlined_call_operand.vmem [shape: f32[16,128], index: 3, kind: input, shape index: {}]   ;;  %s181_s4 = inlined_call_operand.vmem [shape: f32[16,128], index: 4, kind: output, shape index: {}]  }
   0x1   :  { %113 = vmatprep.subr.bf16.mxu0 %v126_v0  ;;  %v123_v1 = vld [vmem:[%s177_s1] sm:$0xff]   ;;  %117 = vmatprep.mubr.msk.bf16.mxu0 %vm127_vm0, %v126_v0  ;;  %v124_v2 = vld [vmem:[%s177_s1 + $0x8] sm:$0xff]  }
   0x2   :  { %114 = vmatpush3.bf16.msra.mxu0 %v123_v1  ;;  %v125_v3 = vld [vmem:[%s178_s0] sm:$0xff]   ;;  %v94_v10 = vld [vmem:[%s180_s3 + $0x8] sm:$0xff] }
   0x3   :  { %115 = vmatprep.subr.bf16.mxu0 %v126_v0  ;;  %v105_v4 = vld [vmem:[%s179_s2] ss:$0 sm:$0xff] }
   0x4   :  { %v93_v6 = vld [vmem:[%s180_s3] sm:$0xff] }
   0x6   :  { %116 = vmatpush3.bf16.msra.mxu0 %v124_v2 }
   0x9   :  { %118 = vmatmul.mubr.msk.bf16.vlgmr.msra.gmra.mrb[0].mxu0 %vm48_vm1, %v125_v3 }
  0xdc   :  { %v86_v5 = vpop.f32.mrb[0].mxu0 }
  0xdd   :  { %v87_v7 = vadd.f32 %v105_v4, %v86_v5  ;;  %v119_v8 = vpop.f32.mrb[1].mxu0 }
  0xde   :  { %v89_v9 = vpop.f32.mrb[2].mxu0 }
  0xdf   :  { %v95_v11 = vadd.f32 %v93_v6, %v87_v7  ;;  %v90_v12 = vadd.f32 %v105_v4, %v89_v9  ;;  %v120_v13 = vpop.f32.mrb[3].mxu0 }
  0xe1   :  { %v97_v14 = vmax.f32 %v95_v11, 0.0  ;;  %v96_v15 = vadd.f32 %v94_v10, %v90_v12 }
  0xe3   :  { %99 = vst [vmem:[%s181_s4] sm:$0xff] %v97_v14  ;;  %v98_v16 = vmax.f32 %v96_v15, 0.0 }
  0xe5   :  { %100 = vst [vmem:[%s181_s4 + $0x8] sm:$0xff] %v98_v16 }

// kernel: resnet_forward.32
= control target key start
LH: loop header
LB: loop body
LE: loop exit
PB: predicated region body
PF: predicated region fallthrough
CT: control target
= control target key end

     0   :  { %v143_v0 = vmov 0.0   ;;  %vm144_vm0 = vmmov 0   ;;  %vm61_vm1 = vcmask 523264   ;;  %s189_s1 = inlined_call_operand.vmem [shape: bf16[64,128], index: 1, kind: input, shape index: {}]   ;;  %s190_s0 = inlined_call_operand.vmem [shape: bf16[16,64], index: 0, kind: input, shape index: {}]   ;;  %s191_s2 = inlined_call_operand.vmem [shape: f32[1,128], index: 2, kind: input, shape index: {}]   ;;  %s192_s3 = inlined_call_operand.vmem [shape: f32[16,128], index: 3, kind: output, shape index: {}]  }
   0x1   :  { %124 = vmatprep.subr.bf16.mxu0 %v143_v0  ;;  %v138_v1 = vld [vmem:[%s189_s1] sm:$0xff]   ;;  %132 = vmatprep.mubr.msk.bf16.mxu0 %vm144_vm0, %v143_v0  ;;  %v139_v2 = vld [vmem:[%s189_s1 + $0x8] sm:$0xff]   ;;  %v140_v3 = vld [vmem:[%s189_s1 + $0x10] sm:$0xff]  }
   0x2   :  { %125 = vmatpush3.bf16.msra.mxu0 %v138_v1  ;;  %v141_v4 = vld [vmem:[%s189_s1 + $0x18] sm:$0xff]   ;;  %v142_v5 = vld [vmem:[%s190_s0] sm:$0xff]  }
   0x3   :  { %126 = vmatprep.subr.bf16.mxu0 %v143_v0  ;;  %v112_v6 = vld [vmem:[%s191_s2] ss:$0 sm:$0xff] }
   0x6   :  { %127 = vmatpush3.bf16.msra.mxu0 %v139_v2 }
   0x7   :  { %128 = vmatprep.subr.bf16.mxu0 %v143_v0 }
   0xa   :  { %129 = vmatpush3.bf16.msra.mxu0 %v140_v3 }
   0xb   :  { %130 = vmatprep.subr.bf16.mxu0 %v143_v0 }
   0xe   :  { %131 = vmatpush3.bf16.msra.mxu0 %v141_v4 }
  0x11   :  { %133 = vmatmul.mubr.msk.bf16.vlgmr.msra.gmra.mrb[0].mxu0 %vm61_vm1, %v142_v5 }
  0xe4   :  { %v99_v7 = vpop.f32.mrb[0].mxu0 }
  0xe5   :  { %v100_v8 = vadd.f32 %v112_v6, %v99_v7  ;;  %v134_v9 = vpop.f32.mrb[1].mxu0 }
  0xe6   :  { %v102_v10 = vpop.f32.mrb[2].mxu0 }
  0xe7   :  { %106 = vst [vmem:[%s192_s3] sm:$0xff] %v100_v8  ;;  %v103_v11 = vadd.f32 %v112_v6, %v102_v10  ;;  %v135_v12 = vpop.f32.mrb[3].mxu0 }
  0xe9   :  { %107 = vst [vmem:[%s192_s3 + $0x8] sm:$0xff] %v103_v11 }

// kernel: closed_call.94
= control target key start
LH: loop header
LB: loop body
LE: loop exit
PB: predicated region body
PF: predicated region fallthrough
CT: control target
= control target key end

     0   :  { %v193_v0 = vmov 0.0   ;;  %vm194_vm0 = vmmov 0   ;;  %s251_s1 = inlined_call_operand.vmem [shape: bf16[128,128], index: 1, kind: input, shape index: {}]   ;;  %s252_s0 = inlined_call_operand.vmem [shape: bf16[16,128], index: 0, kind: input, shape index: {}]   ;;  %s253_s2 = inlined_call_operand.vmem [shape: f32[1,128], index: 2, kind: input, shape index: {}]   ;;  %s254_s3 = inlined_call_operand.vmem [shape: f32[16,128], index: 3, kind: output, shape index: {}]  }
   0x1   :  { %162 = vmatprep.subr.bf16.mxu0 %v193_v0  ;;  %v184_v1 = vld [vmem:[%s251_s1] sm:$0xff]   ;;  %178 = vmatprep.mubr.msk.bf16.mxu0 %vm194_vm0, %v193_v0  ;;  %v185_v2 = vld [vmem:[%s251_s1 + $0x8] sm:$0xff]   ;;  %v186_v3 = vld [vmem:[%s251_s1 + $0x10] sm:$0xff]  }
   0x2   :  { %163 = vmatpush3.bf16.msra.mxu0 %v184_v1  ;;  %v187_v4 = vld [vmem:[%s251_s1 + $0x18] sm:$0xff]   ;;  %v188_v5 = vld [vmem:[%s251_s1 + $0x20] sm:$0xff]   ;;  %v189_v6 = vld [vmem:[%s251_s1 + $0x28] sm:$0xff]  }
   0x3   :  { %164 = vmatprep.subr.bf16.mxu0 %v193_v0  ;;  %v190_v7 = vld [vmem:[%s251_s1 + $0x30] sm:$0xff]   ;;  %v191_v8 = vld [vmem:[%s251_s1 + $0x38] sm:$0xff]   ;;  %v192_v9 = vld [vmem:[%s252_s0] sm:$0xff]  }
   0x4   :  { %v143_v10 = vld [vmem:[%s253_s2] ss:$0 sm:$0xff] }
   0x6   :  { %165 = vmatpush3.bf16.msra.mxu0 %v185_v2 }
   0x7   :  { %166 = vmatprep.subr.bf16.mxu0 %v193_v0 }
   0xa   :  { %167 = vmatpush3.bf16.msra.mxu0 %v186_v3 }
   0xb   :  { %168 = vmatprep.subr.bf16.mxu0 %v193_v0 }
   0xe   :  { %169 = vmatpush3.bf16.msra.mxu0 %v187_v4 }
   0xf   :  { %170 = vmatprep.subr.bf16.mxu0 %v193_v0 }
  0x12   :  { %171 = vmatpush3.bf16.msra.mxu0 %v188_v5 }
  0x13   :  { %172 = vmatprep.subr.bf16.mxu0 %v193_v0 }
  0x16   :  { %173 = vmatpush3.bf16.msra.mxu0 %v189_v6 }
  0x17   :  { %174 = vmatprep.subr.bf16.mxu0 %v193_v0 }
  0x1a   :  { %175 = vmatpush3.bf16.msra.mxu0 %v190_v7 }
  0x1b   :  { %176 = vmatprep.subr.bf16.mxu0 %v193_v0 }
  0x1e   :  { %177 = vmatpush3.bf16.msra.mxu0 %v191_v8 }
  0x21   :  { %179 = vmatmul.mubr.bf16.vlgmr.msra.gmra.mrb[0].mxu0 %v192_v9 }
  0xf4   :  { %v128_v11 = vpop.f32.mrb[0].mxu0 }
  0xf5   :  { %v129_v12 = vadd.f32 %v143_v10, %v128_v11  ;;  %v180_v13 = vpop.f32.mrb[1].mxu0 }
  0xf6   :  { %v131_v14 = vpop.f32.mrb[2].mxu0 }
  0xf7   :  { %v135_v15 = vmax.f32 %v129_v12, 0.0  ;;  %v132_v16 = vadd.f32 %v143_v10, %v131_v14  ;;  %v181_v17 = vpop.f32.mrb[3].mxu0 }
  0xf9   :  { %137 = vst [vmem:[%s254_s3] sm:$0xff] %v135_v15  ;;  %v136_v18 = vmax.f32 %v132_v16, 0.0 }
  0xfb   :  { %138 = vst [vmem:[%s254_s3 + $0x8] sm:$0xff] %v136_v18 }

// kernel: resnet_forward.36
= control target key start
LH: loop header
LB: loop body
LE: loop exit
PB: predicated region body
PF: predicated region fallthrough
CT: control target
= control target key end

     0   :  { %v225_v1 = vmov 0   ;;  %v35_v18 = vlaneseq  ;;  %s312_s1 = inlined_call_operand.vmem [shape: bf16[128,256], index: 1, kind: input, shape index: {}]   ;;  %s313_s0 = inlined_call_operand.vmem [shape: bf16[16,128], index: 0, kind: input, shape index: {}]   ;;  %s314_s2 = inlined_call_operand.vmem [shape: f32[1,256], index: 2, kind: input, shape index: {}]   ;;  %s315_s3 = inlined_call_operand.vmem [shape: f32[16,256], index: 3, kind: output, shape index: {}]  }
   0x1   :  { %v200_v0 = vld [vmem:[%s312_s1 + $0x4] ss:$8 sps:$4 sm:$0xff]   ;;  %163 = vmatprep.mubr.bf16.mxu0 %v225_v1  ;;  %v202_v2 = vld [vmem:[%s312_s1] ss:$8 sps:$4 sm:$0xff]   ;;  %v203_v3 = vld [vmem:[%s312_s1 + $0x14] ss:$8 sps:$4 sm:$0xff]  }
   0x2   :  { %131 = vmatprep.subr.bf16.mxu0 %v200_v0  ;;  %v205_v4 = vld [vmem:[%s312_s1 + $0x10] ss:$8 sps:$4 sm:$0xff]   ;;  %v206_v5 = vld [vmem:[%s312_s1 + $0x24] ss:$8 sps:$4 sm:$0xff]   ;;  %v208_v6 = vld [vmem:[%s312_s1 + $0x20] ss:$8 sps:$4 sm:$0xff]  }
   0x3   :  { %132 = vmatpush1.bf16.msra.mxu0 %v202_v2  ;;  %v209_v7 = vld [vmem:[%s312_s1 + $0x34] ss:$8 sps:$4 sm:$0xff]   ;;  %v211_v8 = vld [vmem:[%s312_s1 + $0x30] ss:$8 sps:$4 sm:$0xff]   ;;  %v212_v9 = vld [vmem:[%s312_s1 + $0x44] ss:$8 sps:$4 sm:$0xff]  }
   0x4   :  { %133 = vmatprep.subr.bf16.mxu0 %v203_v3  ;;  %v214_v10 = vld [vmem:[%s312_s1 + $0x40] ss:$8 sps:$4 sm:$0xff]   ;;  %v215_v11 = vld [vmem:[%s312_s1 + $0x54] ss:$8 sps:$4 sm:$0xff]   ;;  %v217_v12 = vld [vmem:[%s312_s1 + $0x50] ss:$8 sps:$4 sm:$0xff]  }
   0x5   :  { %v218_v13 = vld [vmem:[%s312_s1 + $0x64] ss:$8 sps:$4 sm:$0xff]   ;;  %v220_v14 = vld [vmem:[%s312_s1 + $0x60] ss:$8 sps:$4 sm:$0xff]   ;;  %v221_v15 = vld [vmem:[%s312_s1 + $0x74] ss:$8 sps:$4 sm:$0xff]  }
   0x6   :  { %v223_v16 = vld [vmem:[%s312_s1 + $0x70] ss:$8 sps:$4 sm:$0xff]   ;;  %v224_v17 = vld [vmem:[%s313_s0] sm:$0xff]   ;;  %v36_v19 = vshrl.u32 %v35_v18, 7 }
   0x7   :  { %134 = vmatpush1.bf16.msra.mxu0 %v205_v4  ;;  %v33_v21 = vld [vmem:[%s314_s2] sm:$0x3] }
   0x8   :  { %135 = vmatprep.subr.bf16.mxu0 %v206_v5  ;;  %v37_v20 = vsub.s32 0, %v36_v19  ;;  %v41_v22 = vsub.s32 1, %v36_v19 }
   0xa   :  { %v38_v23 = vrot.slane %v33_v21, %v37_v20  ;;  %v42_v24 = vrot.slane %v33_v21, %v41_v22 }
   0xb   :  { %136 = vmatpush1.bf16.msra.mxu0 %v208_v6 }
   0xc   :  { %137 = vmatprep.subr.bf16.mxu0 %v209_v7 }
   0xf   :  { %138 = vmatpush1.bf16.msra.mxu0 %v211_v8 }
  0x10   :  { %139 = vmatprep.subr.bf16.mxu0 %v212_v9 }
  0x13   :  { %140 = vmatpush1.bf16.msra.mxu0 %v214_v10 }
  0x14   :  { %141 = vmatprep.subr.bf16.mxu0 %v215_v11 }
  0x17   :  { %142 = vmatpush1.bf16.msra.mxu0 %v217_v12 }
  0x18   :  { %143 = vmatprep.subr.bf16.mxu0 %v218_v13 }
  0x1b   :  { %144 = vmatpush1.bf16.msra.mxu0 %v220_v14 }
  0x1c   :  { %145 = vmatprep.subr.bf16.mxu0 %v221_v15 }
  0x1f   :  { %146 = vmatpush1.bf16.msra.mxu0 %v223_v16 }
  0x22   :  { %164 = vmatmul.mubr.bf16.vlgmr.msra.gmra.mrb[0].mxu0 %v224_v17 }
  0xf5   :  { %v165_v25 = vpop.f32.mrb[0].mxu0 }
  0xf6   :  { %v166_v26 = vadd.f32 %v165_v25, %v38_v23  ;;  %v167_v27 = vpop.f32.mrb[1].mxu0 }
  0xf7   :  { %v168_v28 = vadd.f32 %v167_v27, %v42_v24  ;;  %v169_v29 = vpop.f32.mrb[2].mxu0 }
  0xf8   :  { %174 = vst [vmem:[%s315_s3] sm:$0xff] %v166_v26  ;;  %v170_v30 = vadd.f32 %v169_v29, %v38_v23  ;;  %v171_v31 = vpop.f32.mrb[3].mxu0 }
  0xf9   :  { %175 = vst [vmem:[%s315_s3 + $0x8] sm:$0xff] %v168_v28  ;;  %v172_v32 = vadd.f32 %v171_v31, %v42_v24 }
  0xfa   :  { %176 = vst [vmem:[%s315_s3 + $0x10] sm:$0xff] %v170_v30 }
  0xfb   :  { %177 = vst [vmem:[%s315_s3 + $0x18] sm:$0xff] %v172_v32 }

// kernel: resnet_forward.37
= control target key start
LH: loop header
LB: loop body
LE: loop exit
PB: predicated region body
PF: predicated region fallthrough
CT: control target
= control target key end

     0   :  { %v176_v1 = vmov 0   ;;  %vm85_vm0 = vcmask 523264   ;;  %v30_v10 = vlaneseq  ;;  %s256_s1 = inlined_call_operand.vmem [shape: bf16[64,256], index: 1, kind: input, shape index: {}]   ;;  %s257_s0 = inlined_call_operand.vmem [shape: bf16[16,64], index: 0, kind: input, shape index: {}]   ;;  %s258_s2 = inlined_call_operand.vmem [shape: f32[1,256], index: 2, kind: input, shape index: {}]   ;;  %s259_s3 = inlined_call_operand.vmem [shape: f32[16,256], index: 3, kind: input, shape index: {}]   ;;  %s260_s4 = inlined_call_operand.vmem [shape: f32[16,256], index: 4, kind: output, shape index: {}]  }
   0x1   :  { %v163_v0 = vld [vmem:[%s256_s1 + $0x4] ss:$8 sps:$4 sm:$0xff]   ;;  %121 = vmatprep.mubr.bf16.mxu0 %v176_v1  ;;  %v165_v2 = vld [vmem:[%s256_s1] ss:$8 sps:$4 sm:$0xff]   ;;  %v166_v3 = vld [vmem:[%s256_s1 + $0x14] ss:$8 sps:$4 sm:$0xff]  }
   0x2   :  { %89 = vmatprep.subr.bf16.mxu0 %v163_v0  ;;  %v168_v4 = vld [vmem:[%s256_s1 + $0x10] ss:$8 sps:$4 sm:$0xff]   ;;  %v169_v5 = vld [vmem:[%s256_s1 + $0x24] ss:$8 sps:$4 sm:$0xff]   ;;  %v171_v6 = vld [vmem:[%s256_s1 + $0x20] ss:$8 sps:$4 sm:$0xff]  }
   0x3   :  { %90 = vmatpush1.bf16.msra.mxu0 %v165_v2  ;;  %v172_v7 = vld [vmem:[%s256_s1 + $0x34] ss:$8 sps:$4 sm:$0xff]   ;;  %v174_v8 = vld [vmem:[%s256_s1 + $0x30] ss:$8 sps:$4 sm:$0xff]   ;;  %v175_v9 = vld [vmem:[%s257_s0] sm:$0xff]   ;;  %v31_v11 = vshrl.u32 %v30_v10, 7 }
   0x4   :  { %91 = vmatprep.subr.bf16.mxu0 %v166_v3  ;;  %v28_v13 = vld [vmem:[%s258_s2] sm:$0x3]  ;;  %v133_v21 = vld [vmem:[%s259_s3 + $0x8] sm:$0xff]  ;;  %v134_v24 = vld [vmem:[%s259_s3 + $0x10] sm:$0xff] }
   0x5   :  { %v32_v12 = vsub.s32 0, %v31_v11  ;;  %v36_v14 = vsub.s32 1, %v31_v11  ;;  %v132_v18 = vld [vmem:[%s259_s3] sm:$0xff]  ;;  %v135_v28 = vld [vmem:[%s259_s3 + $0x18] sm:$0xff] }
   0x7   :  { %92 = vmatpush1.bf16.msra.mxu0 %v168_v4  ;;  %v33_v15 = vrot.slane %v28_v13, %v32_v12  ;;  %v37_v16 = vrot.slane %v28_v13, %v36_v14 }
   0x8   :  { %93 = vmatprep.subr.bf16.mxu0 %v169_v5 }
   0xb   :  { %94 = vmatpush1.bf16.msra.mxu0 %v171_v6 }
   0xc   :  { %95 = vmatprep.subr.bf16.mxu0 %v172_v7 }
   0xf   :  { %96 = vmatpush1.bf16.msra.mxu0 %v174_v8 }
  0x12   :  { %161 = vmatmul.mubr.msk.bf16.vlgmr.msra.gmra.mrb[0].mxu0 %vm85_vm0, %v175_v9 }
  0xe5   :  { %v123_v17 = vpop.f32.mrb[0].mxu0 }
  0xe6   :  { %v124_v19 = vadd.f32 %v123_v17, %v33_v15  ;;  %v125_v20 = vpop.f32.mrb[1].mxu0 }
  0xe7   :  { %v126_v22 = vadd.f32 %v125_v20, %v37_v16  ;;  %v127_v23 = vpop.f32.mrb[2].mxu0 }
  0xe8   :  { %v136_v25 = vadd.f32 %v132_v18, %v124_v19  ;;  %v128_v26 = vadd.f32 %v127_v23, %v33_v15  ;;  %v129_v27 = vpop.f32.mrb[3].mxu0 }
  0xe9   :  { %v137_v29 = vadd.f32 %v133_v21, %v126_v22  ;;  %v130_v30 = vadd.f32 %v129_v27, %v37_v16 }
  0xea   :  { %v140_v31 = vmax.f32 %v136_v25, 0.0  ;;  %v138_v32 = vadd.f32 %v134_v24, %v128_v26 }
  0xeb   :  { %v141_v33 = vmax.f32 %v137_v29, 0.0  ;;  %v139_v34 = vadd.f32 %v135_v28, %v130_v30 }
  0xec   :  { %144 = vst [vmem:[%s260_s4] sm:$0xff] %v140_v31  ;;  %v142_v35 = vmax.f32 %v138_v32, 0.0 }
  0xed   :  { %145 = vst [vmem:[%s260_s4 + $0x8] sm:$0xff] %v141_v33  ;;  %v143_v36 = vmax.f32 %v139_v34, 0.0 }
  0xee   :  { %146 = vst [vmem:[%s260_s4 + $0x10] sm:$0xff] %v142_v35 }
  0xef   :  { %147 = vst [vmem:[%s260_s4 + $0x18] sm:$0xff] %v143_v36 }

// kernel: resnet_forward.35
= control target key start
LH: loop header
LB: loop body
LE: loop exit
PB: predicated region body
PF: predicated region fallthrough
CT: control target
= control target key end

     0   :  { %v625_v33 = vmov 0.0   ;;  %vm626_vm0 = vmmov 0   ;;  %vm341_vm1 = vcmask 523264   ;;  %s779_s1 = inlined_call_operand.vmem [shape: bf16[576,128], index: 1, kind: input, shape index: {}]   ;;  %s780_s0 = inlined_call_operand.vmem [shape: bf16[16,576], index: 0, kind: input, shape index: {}]   ;;  %s781_s2 = inlined_call_operand.vmem [shape: f32[1,128], index: 2, kind: input, shape index: {}]   ;;  %s782_s3 = inlined_call_operand.vmem [shape: f32[16,128], index: 3, kind: output, shape index: {}]  }
   0x1   :  { %v582_v0 = vld [vmem:[%s779_s1 + $0x40] sm:$0xff]   ;;  %v586_v4 = vld [vmem:[%s779_s1 + $0x48] sm:$0xff]   ;;  %v590_v8 = vld [vmem:[%s779_s1 + $0x50] sm:$0xff]  }
   0x2   :  { %v583_v1 = vld [vmem:[%s779_s1] sm:$0xff]   ;;  %519 = vmatprep.subr.bf16.mxu0 %v582_v0  ;;  %v587_v5 = vld [vmem:[%s779_s1 + $0x8] sm:$0xff]   ;;  %v591_v9 = vld [vmem:[%s779_s1 + $0x10] sm:$0xff]  }
   0x3   :  { %v584_v2 = vld [vmem:[%s779_s1 + $0xc0] sm:$0xff]   ;;  %520 = vmatpush3.bf16.msra.mxu0 %v583_v1  ;;  %v588_v6 = vld [vmem:[%s779_s1 + $0xc8] sm:$0xff]   ;;  %v592_v10 = vld [vmem:[%s779_s1 + $0xd0] sm:$0xff]  }
   0x4   :  { %v585_v3 = vld [vmem:[%s779_s1 + $0x80] sm:$0xff]   ;;  %541 = vmatprep.subr.bf16.mxu1 %v584_v2  ;;  %521 = vmatprep.subr.bf16.mxu0 %v586_v4  ;;  %v589_v7 = vld [vmem:[%s779_s1 + $0x88] sm:$0xff]   ;;  %v593_v11 = vld [vmem:[%s779_s1 + $0x90] sm:$0xff]  }
   0x5   :  { %542 = vmatpush3.bf16.msra.mxu1 %v585_v3  ;;  %v594_v12 = vld [vmem:[%s779_s1 + $0x58] sm:$0xff]   ;;  %v598_v16 = vld [vmem:[%s779_s1 + $0x60] sm:$0xff]   ;;  %v602_v20 = vld [vmem:[%s779_s1 + $0x68] sm:$0xff]  }
   0x6   :  { %543 = vmatprep.subr.bf16.mxu1 %v588_v6  ;;  %v595_v13 = vld [vmem:[%s779_s1 + $0x18] sm:$0xff]   ;;  %v599_v17 = vld [vmem:[%s779_s1 + $0x20] sm:$0xff]   ;;  %v603_v21 = vld [vmem:[%s779_s1 + $0x28] sm:$0xff]  }
   0x7   :  { %522 = vmatpush3.bf16.msra.mxu0 %v587_v5  ;;  %v596_v14 = vld [vmem:[%s779_s1 + $0xd8] sm:$0xff]   ;;  %v600_v18 = vld [vmem:[%s779_s1 + $0xe0] sm:$0xff]   ;;  %v604_v22 = vld [vmem:[%s779_s1 + $0xe8] sm:$0xff]  }
   0x8   :  { %523 = vmatprep.subr.bf16.mxu0 %v590_v8  ;;  %v597_v15 = vld [vmem:[%s779_s1 + $0x98] sm:$0xff]   ;;  %v601_v19 = vld [vmem:[%s779_s1 + $0xa0] sm:$0xff]   ;;  %v605_v23 = vld [vmem:[%s779_s1 + $0xa8] sm:$0xff]  }
   0x9   :  { %544 = vmatpush3.bf16.msra.mxu1 %v589_v7  ;;  %v606_v24 = vld [vmem:[%s779_s1 + $0x70] sm:$0xff]   ;;  %v610_v28 = vld [vmem:[%s779_s1 + $0x78] sm:$0xff]   ;;  %v619_v36 = vld [vmem:[%s780_s0 + $0xc] ss:$20 sps:$4 sm:$0xff]  }
   0xa   :  { %545 = vmatprep.subr.bf16.mxu1 %v592_v10  ;;  %v607_v25 = vld [vmem:[%s779_s1 + $0x30] sm:$0xff]   ;;  %v611_v29 = vld [vmem:[%s779_s1 + $0x38] sm:$0xff]   ;;  %v620_v37 = vld [vmem:[%s779_s1 + $0x100] sm:$0xff]   ;;  %418 = vmatprep.mubr.bf16.mxu1 %v619_v36 }
   0xb   :  { %524 = vmatpush3.bf16.msra.mxu0 %v591_v9  ;;  %v608_v26 = vld [vmem:[%s779_s1 + $0xf0] sm:$0xff]   ;;  %v612_v30 = vld [vmem:[%s779_s1 + $0xf8] sm:$0xff]   ;;  %v621_v38 = vld [vmem:[%s779_s1 + $0x108] sm:$0xff]  }
   0xc   :  { %525 = vmatprep.subr.bf16.mxu0 %v594_v12  ;;  %v609_v27 = vld [vmem:[%s779_s1 + $0xb0] sm:$0xff]   ;;  %v615_v32 = vld [vmem:[%s780_s0 + $0x4] ss:$20 sps:$4 sm:$0xff]   ;;  %v617_v35 = vld [vmem:[%s780_s0 + $0x8] ss:$20 sps:$4 sm:$0xff]  }
   0xd   :  { %546 = vmatpush3.bf16.msra.mxu1 %v593_v11  ;;  %v613_v31 = vld [vmem:[%s780_s0] ss:$20 sps:$4 sm:$0xff]   ;;  %v616_v34 = vld [vmem:[%s779_s1 + $0xb8] sm:$0xff]   ;;  %377 = vmatprep.mubr.bf16.mxu0 %v615_v32  ;;  %v624_v41 = vld [vmem:[%s780_s0 + $0x10] ss:$20 sps:$4 sm:$0xff]  }
   0xe   :  { %547 = vmatprep.subr.bf16.mxu1 %v596_v14  ;;  %v622_v39 = vld [vmem:[%s779_s1 + $0x110] sm:$0xff]   ;;  %v623_v40 = vld [vmem:[%s779_s1 + $0x118] sm:$0xff]   ;;  %v476_v43 = vld [vmem:[%s781_s2] ss:$0 sm:$0xff] }
   0xf   :  { %526 = vmatpush3.bf16.msra.mxu0 %v595_v13 }
  0x10   :  { %527 = vmatprep.subr.bf16.mxu0 %v598_v16 }
  0x11   :  { %548 = vmatpush3.bf16.msra.mxu1 %v597_v15 }
  0x12   :  { %549 = vmatprep.subr.bf16.mxu1 %v600_v18 }
  0x13   :  { %528 = vmatpush3.bf16.msra.mxu0 %v599_v17 }
  0x14   :  { %529 = vmatprep.subr.bf16.mxu0 %v602_v20 }
  0x15   :  { %550 = vmatpush3.bf16.msra.mxu1 %v601_v19 }
  0x16   :  { %551 = vmatprep.subr.bf16.mxu1 %v604_v22 }
  0x17   :  { %530 = vmatpush3.bf16.msra.mxu0 %v603_v21 }
  0x18   :  { %531 = vmatprep.subr.bf16.mxu0 %v606_v24 }
  0x19   :  { %552 = vmatpush3.bf16.msra.mxu1 %v605_v23 }
  0x1a   :  { %553 = vmatprep.subr.bf16.mxu1 %v608_v26 }
  0x1b   :  { %532 = vmatpush3.bf16.msra.mxu0 %v607_v25 }
  0x1c   :  { %533 = vmatprep.subr.bf16.mxu0 %v610_v28 }
  0x1d   :  { %554 = vmatpush3.bf16.msra.mxu1 %v609_v27 }
  0x1e   :  { %555 = vmatprep.subr.bf16.mxu1 %v612_v30 }
  0x1f   :  { %534 = vmatpush3.bf16.msra.mxu0 %v611_v29 }
  0x20   :  { %568 = vmatprep.subr.bf16.mxu0 %v625_v33 }
  0x21   :  { %556 = vmatpush3.bf16.msra.mxu1 %v616_v34 }
  0x22   :  { %378 = vmatmul.mubr.bf16.vlgmr.msra.gmra.mrb[0].mxu0 %v613_v31 }
  0x23   :  { %576 = vmatprep.mubr.msk.bf16.mxu0 %vm626_vm0, %v625_v33  ;;  %569 = vmatpush3.bf16.msra.mxu0 %v620_v37 }
  0x24   :  { %419 = vmatmul.mubr.bf16.vlgmr.msra.gmra.mrb[0].mxu1 %v617_v35  ;;  %570 = vmatprep.subr.bf16.mxu0 %v625_v33 }
  0x27   :  { %571 = vmatpush3.bf16.msra.mxu0 %v621_v38 }
  0x28   :  { %572 = vmatprep.subr.bf16.mxu0 %v625_v33 }
  0x2b   :  { %573 = vmatpush3.bf16.msra.mxu0 %v622_v39 }
  0x2c   :  { %574 = vmatprep.subr.bf16.mxu0 %v625_v33 }
  0x2f   :  { %575 = vmatpush3.bf16.msra.mxu0 %v623_v40 }
  0x32   :  { %577 = vmatmul.mubr.msk.bf16.vlgmr.msra.gmra.mrb[4].mxu0 %vm341_vm1, %v624_v41 }
  0xf5   :  { %v535_v42 = vpop.f32.mrb[0].mxu0 }
  0xf6   :  { %v536_v44 = vpop.f32.mrb[1].mxu0 }
  0xf7   :  { %v537_v45 = vadd.f32 %v536_v44, %v535_v42  ;;  %v538_v46 = vpop.f32.mrb[2].mxu0  ;;  %v557_v47 = vpop.f32.mrb[0].mxu1 }
  0xf8   :  { %v539_v48 = vpop.f32.mrb[3].mxu0  ;;  %v558_v51 = vpop.f32.mrb[1].mxu1 }
  0xf9   :  { %v380_v49 = vadd.f32 %v537_v45, %v476_v43  ;;  %v540_v50 = vadd.f32 %v539_v48, %v538_v46  ;;  %v559_v52 = vadd.f32 %v558_v51, %v557_v47  ;;  %v560_v53 = vpop.f32.mrb[2].mxu1 }
  0xfa   :  { %v561_v55 = vpop.f32.mrb[3].mxu1 }
  0xfb   :  { %v383_v54 = vadd.f32 %v540_v50, %v476_v43  ;;  %v562_v56 = vadd.f32 %v561_v55, %v560_v53  ;;  %v421_v57 = vadd.f32 %v559_v52, %v380_v49 }
  0xfd   :  { %v424_v58 = vadd.f32 %v562_v56, %v383_v54 }
 0x105   :  { %v461_v59 = vpop.f32.mrb[4].mxu0 }
 0x106   :  { %v462_v60 = vadd.f32 %v461_v59, %v421_v57  ;;  %v578_v61 = vpop.f32.mrb[5].mxu0 }
 0x107   :  { %v464_v62 = vpop.f32.mrb[6].mxu0 }
 0x108   :  { %v468_v63 = vmax.f32 %v462_v60, 0.0  ;;  %v465_v0 = vadd.f32 %v464_v62, %v424_v58  ;;  %v579_v1 = vpop.f32.mrb[7].mxu0 }
 0x10a   :  { %470 = vst [vmem:[%s782_s3] sm:$0xff] %v468_v63  ;;  %v469_v2 = vmax.f32 %v465_v0, 0.0 }
 0x10c   :  { %471 = vst [vmem:[%s782_s3 + $0x8] sm:$0xff] %v469_v2 }

// kernel: closed_call.97
= control target key start
LH: loop header
LB: loop body
LE: loop exit
PB: predicated region body
PF: predicated region fallthrough
CT: control target
= control target key end

     0   :  { %s354_s1 = inlined_call_operand.vmem [shape: bf16[256,128], index: 1, kind: input, shape index: {}]   ;;  %s355_s0 = inlined_call_operand.vmem [shape: bf16[16,256], index: 0, kind: input, shape index: {}]   ;;  %s356_s2 = inlined_call_operand.vmem [shape: f32[1,128], index: 2, kind: input, shape index: {}]   ;;  %s357_s3 = inlined_call_operand.vmem [shape: f32[16,128], index: 3, kind: output, shape index: {}]  }
   0x1   :  { %v252_v0 = vld [vmem:[%s354_s1 + $0x40] sm:$0xff]   ;;  %v254_v2 = vld [vmem:[%s354_s1 + $0x48] sm:$0xff]   ;;  %v256_v4 = vld [vmem:[%s354_s1 + $0x50] sm:$0xff]  }
   0x2   :  { %v253_v1 = vld [vmem:[%s354_s1] sm:$0xff]   ;;  %230 = vmatprep.subr.bf16.mxu0 %v252_v0  ;;  %v255_v3 = vld [vmem:[%s354_s1 + $0x8] sm:$0xff]   ;;  %v257_v5 = vld [vmem:[%s354_s1 + $0x10] sm:$0xff]  }
   0x3   :  { %231 = vmatpush3.bf16.msra.mxu0 %v253_v1  ;;  %v258_v6 = vld [vmem:[%s354_s1 + $0x58] sm:$0xff]   ;;  %v260_v8 = vld [vmem:[%s354_s1 + $0x60] sm:$0xff]   ;;  %v262_v10 = vld [vmem:[%s354_s1 + $0x68] sm:$0xff]  }
   0x4   :  { %232 = vmatprep.subr.bf16.mxu0 %v254_v2  ;;  %v259_v7 = vld [vmem:[%s354_s1 + $0x18] sm:$0xff]   ;;  %v261_v9 = vld [vmem:[%s354_s1 + $0x20] sm:$0xff]   ;;  %v263_v12 = vld [vmem:[%s354_s1 + $0x28] sm:$0xff]  }
   0x5   :  { %v270_v11 = vld [vmem:[%s355_s0 + $0x4] ss:$8 sps:$4 sm:$0xff]   ;;  %v264_v13 = vld [vmem:[%s354_s1 + $0x70] sm:$0xff]   ;;  %v266_v15 = vld [vmem:[%s354_s1 + $0x78] sm:$0xff]  }
   0x6   :  { %194 = vmatprep.mubr.bf16.mxu0 %v270_v11  ;;  %v265_v14 = vld [vmem:[%s354_s1 + $0x30] sm:$0xff]   ;;  %v267_v16 = vld [vmem:[%s354_s1 + $0x38] sm:$0xff]   ;;  %v268_v17 = vld [vmem:[%s355_s0] ss:$8 sps:$4 sm:$0xff]  }
   0x7   :  { %233 = vmatpush3.bf16.msra.mxu0 %v255_v3  ;;  %v211_v19 = vld [vmem:[%s356_s2] ss:$0 sm:$0xff] }
   0x8   :  { %234 = vmatprep.subr.bf16.mxu0 %v256_v4 }
   0xb   :  { %235 = vmatpush3.bf16.msra.mxu0 %v257_v5 }
   0xc   :  { %236 = vmatprep.subr.bf16.mxu0 %v258_v6 }
   0xf   :  { %237 = vmatpush3.bf16.msra.mxu0 %v259_v7 }
  0x10   :  { %238 = vmatprep.subr.bf16.mxu0 %v260_v8 }
  0x13   :  { %239 = vmatpush3.bf16.msra.mxu0 %v261_v9 }
  0x14   :  { %240 = vmatprep.subr.bf16.mxu0 %v262_v10 }
  0x17   :  { %241 = vmatpush3.bf16.msra.mxu0 %v263_v12 }
  0x18   :  { %242 = vmatprep.subr.bf16.mxu0 %v264_v13 }
  0x1b   :  { %243 = vmatpush3.bf16.msra.mxu0 %v265_v14 }
  0x1c   :  { %244 = vmatprep.subr.bf16.mxu0 %v266_v15 }
  0x1f   :  { %245 = vmatpush3.bf16.msra.mxu0 %v267_v16 }
  0x22   :  { %195 = vmatmul.mubr.bf16.vlgmr.msra.gmra.mrb[0].mxu0 %v268_v17 }
  0xf5   :  { %v246_v18 = vpop.f32.mrb[0].mxu0 }
  0xf6   :  { %v247_v20 = vpop.f32.mrb[1].mxu0 }
  0xf7   :  { %v248_v21 = vadd.f32 %v247_v20, %v246_v18  ;;  %v249_v22 = vpop.f32.mrb[2].mxu0 }
  0xf8   :  { %v250_v23 = vpop.f32.mrb[3].mxu0 }
  0xf9   :  { %v197_v24 = vadd.f32 %v248_v21, %v211_v19  ;;  %v251_v25 = vadd.f32 %v250_v23, %v249_v22 }
  0xfb   :  { %v203_v26 = vmax.f32 %v197_v24, 0.0  ;;  %v200_v27 = vadd.f32 %v251_v25, %v211_v19 }
  0xfd   :  { %205 = vst [vmem:[%s357_s3] sm:$0xff] %v203_v26  ;;  %v204_v28 = vmax.f32 %v200_v27, 0.0 }
  0xff   :  { %206 = vst [vmem:[%s357_s3 + $0x8] sm:$0xff] %v204_v28 }

// kernel: resnet_forward.38
= control target key start
LH: loop header
LB: loop body
LE: loop exit
PB: predicated region body
PF: predicated region fallthrough
CT: control target
= control target key end

     0   :  { %s31_s0 = inlined_call_operand.vmem [shape: f32[1,2,256], index: 0, kind: input, shape index: {}]   ;;  %s32_s1 = inlined_call_operand.vmem [shape: f32[2,256], index: 1, kind: output, shape index: {}]  }
   0x1   :  { %v8_v0 = vld [vmem:[%s31_s0] sm:$0xf] }
   0x2   :  { %10 = vst [vmem:[%s32_s1] sm:$0xf] %v8_v0 }

// kernel: resnet_forward.39
= control target key start
LH: loop header
LB: loop body
LE: loop exit
PB: predicated region body
PF: predicated region fallthrough
CT: control target
= control target key end

     0   :  { %s352_s1 = inlined_call_operand.vmem [shape: bf16[256,128], index: 1, kind: input, shape index: {}]   ;;  %s353_s0 = inlined_call_operand.vmem [shape: bf16[16,256], index: 0, kind: input, shape index: {}]   ;;  %s354_s2 = inlined_call_operand.vmem [shape: f32[1,128], index: 2, kind: input, shape index: {}]   ;;  %s355_s3 = inlined_call_operand.vmem [shape: f32[16,128], index: 3, kind: output, shape index: {}]  }
   0x1   :  { %v250_v0 = vld [vmem:[%s352_s1 + $0x40] sm:$0xff]   ;;  %v252_v2 = vld [vmem:[%s352_s1 + $0x48] sm:$0xff]   ;;  %v254_v4 = vld [vmem:[%s352_s1 + $0x50] sm:$0xff]  }
   0x2   :  { %v251_v1 = vld [vmem:[%s352_s1] sm:$0xff]   ;;  %228 = vmatprep.subr.bf16.mxu0 %v250_v0  ;;  %v253_v3 = vld [vmem:[%s352_s1 + $0x8] sm:$0xff]   ;;  %v255_v5 = vld [vmem:[%s352_s1 + $0x10] sm:$0xff]  }
   0x3   :  { %229 = vmatpush3.bf16.msra.mxu0 %v251_v1  ;;  %v256_v6 = vld [vmem:[%s352_s1 + $0x58] sm:$0xff]   ;;  %v258_v8 = vld [vmem:[%s352_s1 + $0x60] sm:$0xff]   ;;  %v260_v10 = vld [vmem:[%s352_s1 + $0x68] sm:$0xff]  }
   0x4   :  { %230 = vmatprep.subr.bf16.mxu0 %v252_v2  ;;  %v257_v7 = vld [vmem:[%s352_s1 + $0x18] sm:$0xff]   ;;  %v259_v9 = vld [vmem:[%s352_s1 + $0x20] sm:$0xff]   ;;  %v261_v12 = vld [vmem:[%s352_s1 + $0x28] sm:$0xff]  }
   0x5   :  { %v268_v11 = vld [vmem:[%s353_s0 + $0x4] ss:$8 sps:$4 sm:$0xff]   ;;  %v262_v13 = vld [vmem:[%s352_s1 + $0x70] sm:$0xff]   ;;  %v264_v15 = vld [vmem:[%s352_s1 + $0x78] sm:$0xff]  }
   0x6   :  { %194 = vmatprep.mubr.bf16.mxu0 %v268_v11  ;;  %v263_v14 = vld [vmem:[%s352_s1 + $0x30] sm:$0xff]   ;;  %v265_v16 = vld [vmem:[%s352_s1 + $0x38] sm:$0xff]   ;;  %v266_v17 = vld [vmem:[%s353_s0] ss:$8 sps:$4 sm:$0xff]  }
   0x7   :  { %231 = vmatpush3.bf16.msra.mxu0 %v253_v3  ;;  %v209_v19 = vld [vmem:[%s354_s2] ss:$0 sm:$0xff] }
   0x8   :  { %232 = vmatprep.subr.bf16.mxu0 %v254_v4 }
   0xb   :  { %233 = vmatpush3.bf16.msra.mxu0 %v255_v5 }
   0xc   :  { %234 = vmatprep.subr.bf16.mxu0 %v256_v6 }
   0xf   :  { %235 = vmatpush3.bf16.msra.mxu0 %v257_v7 }
  0x10   :  { %236 = vmatprep.subr.bf16.mxu0 %v258_v8 }
  0x13   :  { %237 = vmatpush3.bf16.msra.mxu0 %v259_v9 }
  0x14   :  { %238 = vmatprep.subr.bf16.mxu0 %v260_v10 }
  0x17   :  { %239 = vmatpush3.bf16.msra.mxu0 %v261_v12 }
  0x18   :  { %240 = vmatprep.subr.bf16.mxu0 %v262_v13 }
  0x1b   :  { %241 = vmatpush3.bf16.msra.mxu0 %v263_v14 }
  0x1c   :  { %242 = vmatprep.subr.bf16.mxu0 %v264_v15 }
  0x1f   :  { %243 = vmatpush3.bf16.msra.mxu0 %v265_v16 }
  0x22   :  { %195 = vmatmul.mubr.bf16.vlgmr.msra.gmra.mrb[0].mxu0 %v266_v17 }
  0xf5   :  { %v244_v18 = vpop.f32.mrb[0].mxu0 }
  0xf6   :  { %v245_v20 = vpop.f32.mrb[1].mxu0 }
  0xf7   :  { %v246_v21 = vadd.f32 %v245_v20, %v244_v18  ;;  %v247_v22 = vpop.f32.mrb[2].mxu0 }
  0xf8   :  { %v248_v23 = vpop.f32.mrb[3].mxu0 }
  0xf9   :  { %v197_v24 = vadd.f32 %v246_v21, %v209_v19  ;;  %v249_v25 = vadd.f32 %v248_v23, %v247_v22 }
  0xfb   :  { %203 = vst [vmem:[%s355_s3] sm:$0xff] %v197_v24  ;;  %v200_v26 = vadd.f32 %v249_v25, %v209_v19 }
  0xfd   :  { %204 = vst [vmem:[%s355_s3 + $0x8] sm:$0xff] %v200_v26 }

</bundles_post_ra>
